<compile_context>
chip_gen: v7x
topology: tpu7x:2x2x1
jax: 0.10.0
libtpu: 0.0.40
codegen_flags: <defaults>
</compile_context>

<pallas_src>
import functools

import jax
import jax.numpy as jnp
from jax.experimental import pallas as pl
from jax.experimental.pallas import tpu as pltpu

# ---------------- config (small, deterministic, synthetic) ----------------
IMG = 16            # image side
PATCH = 4           # patch size
IN_CHANS = 3
L = (IMG // PATCH) ** 2          # 16 patches
EMB = 32            # encoder embed dim
DEPTH = 2           # encoder blocks
HEADS = 4
DEC_EMB = 32        # decoder embed dim
DEC_DEPTH = 1
DEC_HEADS = 4
MLP_RATIO = 4
MASK_RATIO = 0.75
NORM_PIX_LOSS = False
MASKED_LOSS = True
LN_EPS = 1e-6
PATCH_DIM = PATCH * PATCH * IN_CHANS   # 48
PRED_DIM = PATCH_DIM

MXU_DTYPE = jnp.bfloat16   # MXU operands; all elementwise math stays f32.


def _round8(n):
    return ((n + 7) // 8) * 8


# ---------------- host-side weight slab packing ----------------
class _Packer:
    """Packs 2-D (rows, cols<=128) arrays into one (R,128) slab.

    Every entry starts at an 8-row-aligned offset and is lane-padded to 128, so
    in-kernel unpacking is a static, relayout-free ref slice.
    """

    def __init__(self):
        self.parts = []
        self.rows = 0

    def add(self, a):
        a = jnp.asarray(a, jnp.float32)
        r, c = a.shape
        rpad = _round8(r)
        self.parts.append(jnp.pad(a, ((0, rpad - r), (0, 128 - c))))
        meta = (self.rows, r, c)          # static (offset, rows, cols)
        self.rows += rpad
        return meta

    def build(self, dtype):
        return jnp.concatenate(self.parts, axis=0).astype(dtype)


def _pack_block(blk, wpk, ppk, dim, heads):
    """Pack one ViT block; per-head q/k/v weights are stored transposed (Hd, D)."""
    hd = dim // heads
    qkv_w = blk["qkv_w"]                      # (dim, 3*dim)
    wq, wk, wv = qkv_w[:, :dim], qkv_w[:, dim:2 * dim], qkv_w[:, 2 * dim:]
    qkv_b = blk["qkv_b"][0]                   # (3*dim,)
    bw = {
        "q": [wpk.add(wq[:, h * hd:(h + 1) * hd].T) for h in range(heads)],
        "k": [wpk.add(wk[:, h * hd:(h + 1) * hd].T) for h in range(heads)],
        "v": [wpk.add(wv[:, h * hd:(h + 1) * hd].T) for h in range(heads)],
        "proj": wpk.add(blk["proj_w"]),       # (dim, dim)
        "fc1": wpk.add(blk["fc1_w"]),         # (dim, 4*dim)
        "fc2": wpk.add(blk["fc2_w"]),         # (4*dim, dim)
    }
    bp = {
        "n1g": ppk.add(blk["norm1_g"]), "n1b": ppk.add(blk["norm1_b"]),
        "qb": ppk.add(qkv_b[:dim].reshape(heads, hd)),
        "kb": ppk.add(qkv_b[dim:2 * dim].reshape(heads, hd)),
        "vb": ppk.add(qkv_b[2 * dim:].reshape(heads, hd)),
        "pb": ppk.add(blk["proj_b"]),
        "n2g": ppk.add(blk["norm2_g"]), "n2b": ppk.add(blk["norm2_b"]),
        "f1b": ppk.add(blk["fc1_b"]), "f2b": ppk.add(blk["fc2_b"]),
    }
    return bw, bp


def pack_params(params):
    """Pack raw params into 4 slabs (+ glue arrays) and static layout metadata."""
    enc_p, dec_p = params["enc"], params["dec"]

    # ---- encoder slabs (patch-embed, 2 blocks, final LN, fused decoder-embed) ----
    wpk, ppk = _Packer(), _Packer()
    ewl = {"pe_w": wpk.add(enc_p["pe_w"]), "blocks": []}
    epl = {"blocks": []}
    for blk in enc_p["blocks"]:
        bw, bp = _pack_block(blk, wpk, ppk, EMB, HEADS)
        ewl["blocks"].append(bw)
        epl["blocks"].append(bp)
    head_w = jnp.pad(dec_p["embed_w"], ((0, 0), (0, 128 - DEC_EMB)))   # lane-dense out
    head_b = jnp.pad(dec_p["embed_b"], ((0, 0), (0, 128 - DEC_EMB)))
    ewl["head_w"] = wpk.add(head_w)
    epl["norm_g"] = ppk.add(enc_p["norm_g"])
    epl["norm_b"] = ppk.add(enc_p["norm_b"])
    epl["head_b"] = ppk.add(head_b)
    enc_w_slab = wpk.build(MXU_DTYPE)          # bf16, pre-cast on host
    enc_p_slab = ppk.build(jnp.float32)

    # ---- decoder slabs (1 block, final LN, pred head) ----
    wpk, ppk = _Packer(), _Packer()
    dwl = {"blocks": []}
    dpl = {"blocks": []}
    for blk in dec_p["blocks"]:
        bw, bp = _pack_block(blk, wpk, ppk, DEC_EMB, DEC_HEADS)
        dwl["blocks"].append(bw)
        dpl["blocks"].append(bp)
    pred_w = jnp.pad(dec_p["pred_w"], ((0, 0), (0, 128 - PRED_DIM)))   # lane-dense out
    pred_b = jnp.pad(dec_p["pred_b"], ((0, 0), (0, 128 - PRED_DIM)))
    dwl["head_w"] = wpk.add(pred_w)
    dpl["norm_g"] = ppk.add(dec_p["norm_g"])
    dpl["norm_b"] = ppk.add(dec_p["norm_b"])
    dpl["head_b"] = ppk.add(pred_b)
    dec_w_slab = wpk.build(MXU_DTYPE)
    dec_p_slab = ppk.build(jnp.float32)

    arrays = dict(
        enc_w=enc_w_slab, enc_p=enc_p_slab, dec_w=dec_w_slab, dec_p=dec_p_slab,
        cls_token=enc_p["cls_token"], pos_embed=enc_p["pos_embed"], pe_b=enc_p["pe_b"],
        mask_token=dec_p["mask_token"], dec_pos_embed=dec_p["dec_pos_embed"],
    )
    layouts = dict(enc_w=ewl, enc_p=epl, dec_w=dwl, dec_p=dpl)
    return arrays, layouts


# ---------------- in-kernel math helpers ----------------
def _tk(ref, meta):
    # Static, 8-row-aligned slab unpack (no runtime cost beyond the load).
    off, r, c = meta
    return ref[off:off + r, :c]


def _mm(a, b):
    # a @ b, bf16 MXU operands (no-op cast if already bf16), f32 accumulation.
    return jax.lax.dot_general(
        a.astype(MXU_DTYPE), b.astype(MXU_DTYPE),
        dimension_numbers=(((a.ndim - 1,), (0,)), ((), ())),
        preferred_element_type=jnp.float32)


def _mm_nt(a, b):
    # a @ b.T without materializing a transpose (contract last dims of both).
    return jax.lax.dot_general(
        a.astype(MXU_DTYPE), b.astype(MXU_DTYPE),
        dimension_numbers=(((a.ndim - 1,), (b.ndim - 1,)), ((), ())),
        preferred_element_type=jnp.float32)


def _ln(x, g, b):
    mean = jnp.mean(x, axis=-1, keepdims=True)
    xc = x - mean
    var = jnp.mean(xc * xc, axis=-1, keepdims=True)
    return xc * jax.lax.rsqrt(var + LN_EPS) * g + b


def _gelu(x):
    # exact (erf-based) GELU, matching torch.nn.GELU() default
    return 0.5 * x * (1.0 + jax.lax.erf(x * 0.7071067811865476))


def _key_mask_bias(s_pad, s_real):
    # Static key-padding mask (padded token columns get -1e30 before softmax).
    col = jax.lax.broadcasted_iota(jnp.int32, (1, s_pad), 1)
    return jnp.where(col < s_real, 0.0, -1e30).astype(jnp.float32)


def _vit_block(x, w_ref, p_ref, bw, bp, heads, key_bias):
    """One pre-norm ViT block on a per-batch (S_pad, D) token tile."""
    M, D = x.shape
    hd = D // heads
    scale = hd ** -0.5

    # --- attention branch: per-head operands come from pre-split weight entries ---
    h16 = _ln(x, _tk(p_ref, bp["n1g"]), _tk(p_ref, bp["n1b"])).astype(MXU_DTYPE)
    qb = _tk(p_ref, bp["qb"])      # (H, hd) f32
    kb = _tk(p_ref, bp["kb"])
    vb = _tk(p_ref, bp["vb"])
    proj = _tk(w_ref, bw["proj"])  # (D, D) bf16, loaded once per block
    attn = jnp.zeros((M, D), jnp.float32) + _tk(p_ref, bp["pb"])
    for hh in range(heads):
        q = _mm_nt(h16, _tk(w_ref, bw["q"][hh])) + qb[hh:hh + 1, :]   # (M, hd)
        k = _mm_nt(h16, _tk(w_ref, bw["k"][hh])) + kb[hh:hh + 1, :]
        v = _mm_nt(h16, _tk(w_ref, bw["v"][hh])) + vb[hh:hh + 1, :]
        s = _mm_nt(q, k) * scale + key_bias                           # (M, M)
        s = s - jnp.max(s, axis=-1, keepdims=True)
        p = jnp.exp(s)
        p = p * pl.reciprocal(jnp.sum(p, axis=-1, keepdims=True), approx=True)
        o = _mm(p, v)                                                  # (M, hd)
        # output projection accumulated per head (8-row-aligned sublane slice)
        attn = attn + _mm(o, proj[hh * hd:(hh + 1) * hd, :])
    x = x + attn

    # --- MLP branch (FC1 intermediate never leaves the kernel) ---
    h16 = _ln(x, _tk(p_ref, bp["n2g"]), _tk(p_ref, bp["n2b"])).astype(MXU_DTYPE)
    a = _gelu(_mm(h16, _tk(w_ref, bw["fc1"])) + _tk(p_ref, bp["f1b"]))
    x = x + _mm(a, _tk(w_ref, bw["fc2"])) + _tk(p_ref, bp["f2b"])
    return x


def _tower(x, w_ref, p_ref, wl, pml, depth, heads, key_bias):
    for d in range(depth):
        x = _vit_block(x, w_ref, p_ref, wl["blocks"][d], pml["blocks"][d], heads, key_bias)
    x = _ln(x, _tk(p_ref, pml["norm_g"]), _tk(p_ref, pml["norm_b"]))
    # head linear: weights are zero-padded to 128 output lanes -> dense stores
    return _mm(x, _tk(w_ref, wl["head_w"])) + _tk(p_ref, pml["head_b"])


# ---------------- fused Pallas kernels (grid over batch) ----------------
def _encoder_kernel(x_ref, add_ref, w_ref, p_ref, out_ref, *,
                    wl, pml, depth, heads, s_real):
    key_bias = _key_mask_bias(x_ref.shape[0], s_real)
    # patch-embed linear + (cls token / pos embed / pe bias) additive term
    x = _mm(x_ref[...], _tk(w_ref, wl["pe_w"])) + add_ref[...]
    # blocks + final LN + fused decoder-embed (128-lane padded)
    out_ref[...] = _tower(x, w_ref, p_ref, wl, pml, depth, heads,
                          key_bias).astype(out_ref.dtype)


def _decoder_kernel(x_ref, w_ref, p_ref, tgt_ref, wgt_ref, pred_ref, loss_ref, *,
                    wl, pml, depth, heads, s_real, norm_pix, patch_dim):
    key_bias = _key_mask_bias(x_ref.shape[0], s_real)
    pred = _tower(x_ref[...], w_ref, p_ref, wl, pml, depth, heads, key_bias)  # (S,128)
    pred_ref[...] = pred.astype(pred_ref.dtype)

    # ---- fused masked-MSE reconstruction loss (per-batch numerator) ----
    tgt = tgt_ref[...]                     # (S, 128), zeros beyond patch_dim
    if norm_pix:
        t = tgt[:, :patch_dim]
        mean = jnp.mean(t, axis=-1, keepdims=True)
        var = jnp.sum((t - mean) ** 2, axis=-1, keepdims=True) / (patch_dim - 1)
        t = (t - mean) / jnp.sqrt(var + 1e-6)
        diff = pred[:, :patch_dim] - t
        per_patch = jnp.mean(diff * diff, axis=-1, keepdims=True)
    else:
        # pred and tgt are both exactly zero beyond patch_dim -> sum over 128 lanes is exact
        diff = pred - tgt
        per_patch = jnp.sum(diff * diff, axis=-1, keepdims=True) * (1.0 / patch_dim)
    num = jnp.sum(per_patch * wgt_ref[...])            # cls/padded rows carry weight 0
    loss_ref[...] = jnp.zeros((1, 128), jnp.float32) + num   # dense lane splat


# ---------------- plain-JAX glue ----------------
def conv_patchify(imgs):
    # Patch extraction matching Conv2d(k=p, s=p) flattening order (c, ph, pw).
    B, C, H, W = imgs.shape
    h, w = H // PATCH, W // PATCH
    x = imgs.reshape(B, C, h, PATCH, w, PATCH)
    x = jnp.transpose(x, (0, 2, 4, 1, 3, 5))
    return x.reshape(B, h * w, C * PATCH * PATCH)


def patchify_mae(imgs):
    # MAE loss-target patchify: 'nchpwq -> nhwpqc'
    B, C, H, W = imgs.shape
    h, w = H // PATCH, W // PATCH
    x = imgs.reshape(B, 3, h, PATCH, w, PATCH)
    x = jnp.transpose(x, (0, 2, 4, 3, 5, 1))
    return x.reshape(B, h * w, PATCH * PATCH * 3)


def _gather_tokens(a, idx):
    B = a.shape[0]
    return jnp.take_along_axis(
        a, jnp.broadcast_to(idx[:, :, None], (B, idx.shape[1], a.shape[-1])), axis=1)


def random_masking_ids(key, batch):
    # TODO(synk): argsort-based token shuffling has no clean Pallas equivalent;
    # kept in plain JAX (indexing glue, not the compute hot path).
    len_keep = int(L * (1 - MASK_RATIO))
    noise = jax.random.uniform(key, (batch, L))
    ids_shuffle = jnp.argsort(noise, axis=1)
    ids_restore = jnp.argsort(ids_shuffle, axis=1)
    ids_keep = ids_shuffle[:, :len_keep]
    mask = jnp.ones((batch, L), jnp.float32).at[:, :len_keep].set(0.0)
    mask = jnp.take_along_axis(mask, ids_restore, axis=1)
    return ids_keep, ids_restore, ids_shuffle, mask, len_keep


def _nbytes(*arrs):
    return sum(int(a.size) * a.dtype.itemsize for a in arrs)


def _tower_flops(batch, s, d, heads, depth, in_dim, out_dim):
    hd = d // heads
    hid = MLP_RATIO * d
    blk = (2 * s * d * hd * 3 * heads      # qkv
           + 2 * heads * s * s * hd * 2    # scores + pv
           + 2 * heads * s * hd * d        # proj
           + 2 * s * d * hid + 2 * s * hid * d)
    total = depth * blk + 2 * s * d * out_dim
    if in_dim:
        total += 2 * s * in_dim * d
    return batch * total


def make_mae_forward(layouts):
    enc_wl, enc_pl = layouts["enc_w"], layouts["enc_p"]
    dec_wl, dec_pl = layouts["dec_w"], layouts["dec_p"]

    @jax.jit
    def mae_forward(arrs, imgs, noise_key):
        B = imgs.shape[0]

        # ---- masking + encoder input assembly (glue) ----
        ids_keep, ids_restore, ids_shuffle, mask, len_keep = random_masking_ids(noise_key, B)
        s_enc = len_keep + 1
        s_enc_pad = _round8(s_enc)

        patches = conv_patchify(imgs)                                # (B, L, 48)
        patches_keep = _gather_tokens(patches, ids_keep)
        pos_patch = jnp.broadcast_to(arrs["pos_embed"][:, 1:, :], (B, L, EMB))
        pos_keep = _gather_tokens(pos_patch, ids_keep)
        cls_add = (arrs["cls_token"] + arrs["pos_embed"][:, :1, :])[0, 0]   # (EMB,)

        # token 0 = cls slot (zero patch row, cls+pos add); 1..keep = kept patches;
        # keep+1..pad = zero padding rows (key-masked in kernel, dropped after).
        patches_aug = jnp.zeros((B, s_enc_pad, PATCH_DIM), jnp.float32)
        patches_aug = patches_aug.at[:, 1:s_enc, :].set(patches_keep)
        add_aug = jnp.zeros((B, s_enc_pad, EMB), jnp.float32)
        add_aug = add_aug.at[:, 0, :].set(cls_add)
        add_aug = add_aug.at[:, 1:s_enc, :].set(pos_keep + arrs["pe_b"][None])

        enc_w, enc_pp = arrs["enc_w"], arrs["enc_p"]
        enc_out = pl.pallas_call(
            functools.partial(_encoder_kernel, wl=enc_wl, pml=enc_pl,
                              depth=DEPTH, heads=HEADS, s_real=s_enc),
            grid=(B,),
            in_specs=[
                pl.BlockSpec((None, s_enc_pad, PATCH_DIM), lambda b: (b, 0, 0)),
                pl.BlockSpec((None, s_enc_pad, EMB), lambda b: (b, 0, 0)),
                pl.BlockSpec(enc_w.shape, lambda b: (0, 0)),      # weight slab, resident
                pl.BlockSpec(enc_pp.shape, lambda b: (0, 0)),     # param slab, resident
            ],
            out_specs=pl.BlockSpec((None, s_enc_pad, 128), lambda b: (b, 0, 0)),
            out_shape=jax.ShapeDtypeStruct((B, s_enc_pad, 128), jnp.float32),
            compiler_params=pltpu.CompilerParams(dimension_semantics=("parallel",)),
            cost_estimate=pl.CostEstimate(
                flops=_tower_flops(B, s_enc_pad, EMB, HEADS, DEPTH, PATCH_DIM, 128),
                transcendentals=B * DEPTH * HEADS * s_enc_pad * s_enc_pad,
                bytes_accessed=_nbytes(patches_aug, add_aug, enc_w, enc_pp)
                + B * s_enc_pad * 128 * 4),
        )(patches_aug, add_aug, enc_w, enc_pp)

        latent_dec = enc_out[:, :s_enc, :DEC_EMB]                    # drop pad rows/lanes

        # ---- decoder token assembly: unshuffle + mask tokens + pos embed (glue) ----
        mask_tokens = jnp.broadcast_to(arrs["mask_token"], (B, L + 1 - s_enc, DEC_EMB))
        x_ = jnp.concatenate([latent_dec[:, 1:, :], mask_tokens], axis=1)
        x_ = _gather_tokens(x_, ids_restore)
        x_dec = jnp.concatenate([latent_dec[:, :1, :], x_], axis=1) + arrs["dec_pos_embed"]
        s_dec = L + 1
        s_dec_pad = _round8(s_dec)
        x_dec = jnp.pad(x_dec, ((0, 0), (0, s_dec_pad - s_dec), (0, 0)))

        target = patchify_mae(imgs)                                  # (B, L, 48)
        tgt_full = jnp.zeros((B, s_dec_pad, 128), jnp.float32)
        tgt_full = tgt_full.at[:, 1:s_dec, :PRED_DIM].set(target)
        w_rows = mask if MASKED_LOSS else jnp.ones_like(mask)
        wgt_full = jnp.zeros((B, s_dec_pad, 1), jnp.float32)
        wgt_full = wgt_full.at[:, 1:s_dec, 0].set(w_rows)

        dec_w, dec_pp = arrs["dec_w"], arrs["dec_p"]
        pred_full, loss_num = pl.pallas_call(
            functools.partial(_decoder_kernel, wl=dec_wl, pml=dec_pl,
                              depth=DEC_DEPTH, heads=DEC_HEADS, s_real=s_dec,
                              norm_pix=NORM_PIX_LOSS, patch_dim=PRED_DIM),
            grid=(B,),
            in_specs=[
                pl.BlockSpec((None, s_dec_pad, DEC_EMB), lambda b: (b, 0, 0)),
                pl.BlockSpec(dec_w.shape, lambda b: (0, 0)),
                pl.BlockSpec(dec_pp.shape, lambda b: (0, 0)),
                pl.BlockSpec((None, s_dec_pad, 128), lambda b: (b, 0, 0)),
                pl.BlockSpec((None, s_dec_pad, 1), lambda b: (b, 0, 0)),
            ],
            out_specs=(pl.BlockSpec((None, s_dec_pad, 128), lambda b: (b, 0, 0)),
                       pl.BlockSpec((None, 1, 128), lambda b: (b, 0, 0))),
            out_shape=(jax.ShapeDtypeStruct((B, s_dec_pad, 128), jnp.float32),
                       jax.ShapeDtypeStruct((B, 1, 128), jnp.float32)),
            compiler_params=pltpu.CompilerParams(dimension_semantics=("parallel",)),
            cost_estimate=pl.CostEstimate(
                flops=_tower_flops(B, s_dec_pad, DEC_EMB, DEC_HEADS, DEC_DEPTH, 0, 128),
                transcendentals=B * DEC_DEPTH * DEC_HEADS * s_dec_pad * s_dec_pad,
                bytes_accessed=_nbytes(x_dec, dec_w, dec_pp, tgt_full, wgt_full)
                + B * (s_dec_pad + 1) * 128 * 4),
        )(x_dec, dec_w, dec_pp, tgt_full, wgt_full)

        pred = pred_full[:, 1:s_dec, :PRED_DIM]                      # drop cls/pad, real lanes
        # spec: loss = sum(per-patch-mse [* mask]) / mask.sum()
        loss = jnp.sum(loss_num[:, 0, 0]) / jnp.sum(mask)
        return loss, pred, mask, ids_shuffle

    return mae_forward


# ---------------- deterministic parameter init ----------------
def init_params(key):
    keys = iter(jax.random.split(key, 256))

    def nrm(shape):
        return 0.02 * jax.random.normal(next(keys), shape, jnp.float32)

    def block_params(dim):
        hid = MLP_RATIO * dim
        return dict(
            norm1_g=jnp.ones((1, dim), jnp.float32), norm1_b=jnp.zeros((1, dim), jnp.float32),
            qkv_w=nrm((dim, 3 * dim)), qkv_b=jnp.zeros((1, 3 * dim), jnp.float32),
            proj_w=nrm((dim, dim)), proj_b=jnp.zeros((1, dim), jnp.float32),
            norm2_g=jnp.ones((1, dim), jnp.float32), norm2_b=jnp.zeros((1, dim), jnp.float32),
            fc1_w=nrm((dim, hid)), fc1_b=jnp.zeros((1, hid), jnp.float32),
            fc2_w=nrm((hid, dim)), fc2_b=jnp.zeros((1, dim), jnp.float32),
        )

    enc = dict(
        pe_w=nrm((IN_CHANS * PATCH * PATCH, EMB)), pe_b=jnp.zeros((1, EMB), jnp.float32),
        cls_token=nrm((1, 1, EMB)),
        pos_embed=nrm((1, L + 1, EMB)),
        blocks=[block_params(EMB) for _ in range(DEPTH)],
        norm_g=jnp.ones((1, EMB), jnp.float32), norm_b=jnp.zeros((1, EMB), jnp.float32),
    )
    dec = dict(
        embed_w=nrm((EMB, DEC_EMB)), embed_b=jnp.zeros((1, DEC_EMB), jnp.float32),
        mask_token=nrm((1, 1, DEC_EMB)),
        dec_pos_embed=nrm((1, L + 1, DEC_EMB)),
        blocks=[block_params(DEC_EMB) for _ in range(DEC_DEPTH)],
        norm_g=jnp.ones((1, DEC_EMB), jnp.float32), norm_b=jnp.zeros((1, DEC_EMB), jnp.float32),
        pred_w=nrm((DEC_EMB, PRED_DIM)), pred_b=jnp.zeros((1, PRED_DIM), jnp.float32),
    )
    return dict(enc=enc, dec=dec)


if __name__ == "__main__":
    root = jax.random.PRNGKey(0)
    k_param, k_img, k_mask = jax.random.split(root, 3)

    params = init_params(k_param)
    packed, layouts = pack_params(params)      # host-side slab packing (once)
    fwd = make_mae_forward(layouts)

    imgs = jax.random.normal(k_img, (2, IN_CHANS, IMG, IMG), jnp.float32)  # NCHW

    loss, pred, mask, ids_shuffle = fwd(packed, imgs, k_mask)
    jax.block_until_ready((loss, pred, mask, ids_shuffle))

    assert pred.shape == (2, L, PRED_DIM)
    assert mask.shape == (2, L)
    assert loss.shape == ()
    assert bool(jnp.isfinite(loss))
    print("KERNEL_OK")
</pallas_src>

<mosaic_0001>
module attributes {stable_mosaic.version = 11 : i64} {
  func.func @_encoder_kernel(%arg0: i32, %arg1: memref<1x8x48xf32, #tpu.memory_space<vmem>>, %arg2: memref<1x8x32xf32, #tpu.memory_space<vmem>>, %arg3: memref<656x128xbf16, #tpu.memory_space<vmem>>, %arg4: memref<184x128xf32, #tpu.memory_space<vmem>>, %arg5: memref<1x8x128xf32, #tpu.memory_space<vmem>>) attributes {dimension_semantics = [#tpu.dimension_semantics<parallel>], iteration_bounds = array<i64: 2>, scalar_prefetch = 0 : i64, scratch_operands = 0 : i64, tpu.core_type = #tpu.core_type<tc>, window_params = [{transform_indices = @transform_0, window_bounds = array<i64: 1, 8, 48>}, {transform_indices = @transform_1, window_bounds = array<i64: 1, 8, 32>}, {pipeline_mode = #tpu.pipeline_mode<synchronous>, transform_indices = @transform_2, window_bounds = array<i64: 656, 128>}, {pipeline_mode = #tpu.pipeline_mode<synchronous>, transform_indices = @transform_3, window_bounds = array<i64: 184, 128>}, {transform_indices = @transform_4, window_bounds = array<i64: 1, 8, 128>}]} {
    %0 = tpu.iota {dimensions = array<i32: 1>} : vector<1x8xi32>
    %c5_i32 = arith.constant 5 : i32
    %1 = vector.broadcast %c5_i32 : i32 to vector<1x8xi32>
    %2 = arith.cmpi slt, %0, %1 : vector<1x8xi32>
    %cst = arith.constant 0.000000e+00 : f32
    %cst_0 = arith.constant -1.000000e+30 : f32
    %3 = vector.broadcast %cst : f32 to vector<1x8xf32>
    %4 = vector.broadcast %cst_0 : f32 to vector<1x8xf32>
    %5 = arith.select %2, %3, %4 : vector<1x8xi1>, vector<1x8xf32>
    %c0 = arith.constant 0 : index
    %c0_1 = arith.constant 0 : index
    %c0_2 = arith.constant 0 : index
    %6 = vector.load %arg1[%c0, %c0_1, %c0_2] : memref<1x8x48xf32, #tpu.memory_space<vmem>>, vector<1x8x48xf32>
    %7 = vector.shape_cast %6 : vector<1x8x48xf32> to vector<8x48xf32>
    %c0_3 = arith.constant 0 : index
    %c0_4 = arith.constant 0 : index
    %8 = vector.load %arg3[%c0_3, %c0_4] : memref<656x128xbf16, #tpu.memory_space<vmem>>, vector<48x32xbf16>
    %9 = arith.truncf %7 : vector<8x48xf32> to vector<8x48xbf16>
    %cst_5 = arith.constant dense<0.000000e+00> : vector<8x32xf32>
    %10 = tpu.matmul %9, %8, %cst_5 {dimension_numbers = #tpu.dot_dimension_numbers<[1], [0], [0], [1], [0, 0, 1, 1], [], []>} : vector<8x48xbf16>, vector<48x32xbf16>, vector<8x32xf32> -> vector<8x32xf32>
    %c0_6 = arith.constant 0 : index
    %c0_7 = arith.constant 0 : index
    %c0_8 = arith.constant 0 : index
    %11 = vector.load %arg2[%c0_6, %c0_7, %c0_8] : memref<1x8x32xf32, #tpu.memory_space<vmem>>, vector<1x8x32xf32>
    %12 = vector.shape_cast %11 : vector<1x8x32xf32> to vector<8x32xf32>
    %13 = arith.addf %10, %12 : vector<8x32xf32>
    %c0_9 = arith.constant 0 : index
    %c0_10 = arith.constant 0 : index
    %14 = vector.load %arg4[%c0_9, %c0_10] : memref<184x128xf32, #tpu.memory_space<vmem>>, vector<1x32xf32>
    %c8 = arith.constant 8 : index
    %c0_11 = arith.constant 0 : index
    %15 = vector.load %arg4[%c8, %c0_11] : memref<184x128xf32, #tpu.memory_space<vmem>>, vector<1x32xf32>
    %cst_12 = arith.constant dense<0.000000e+00> : vector<8xf32>
    %16 = vector.multi_reduction <add>, %13, %cst_12 [1] : vector<8x32xf32> to vector<8xf32>
    %17 = vector.shape_cast %16 : vector<8xf32> to vector<8x1xf32>
    %cst_13 = arith.constant 3.200000e+01 : f32
    %18 = vector.broadcast %cst_13 : f32 to vector<8x1xf32>
    %19 = arith.divf %17, %18 : vector<8x1xf32>
    %20 = vector.broadcast %19 : vector<8x1xf32> to vector<8x32xf32>
    %21 = arith.subf %13, %20 : vector<8x32xf32>
    %22 = arith.mulf %21, %21 : vector<8x32xf32>
    %cst_14 = arith.constant dense<0.000000e+00> : vector<8xf32>
    %23 = vector.multi_reduction <add>, %22, %cst_14 [1] : vector<8x32xf32> to vector<8xf32>
    %24 = vector.shape_cast %23 : vector<8xf32> to vector<8x1xf32>
    %cst_15 = arith.constant 3.200000e+01 : f32
    %25 = vector.broadcast %cst_15 : f32 to vector<8x1xf32>
    %26 = arith.divf %24, %25 : vector<8x1xf32>
    %cst_16 = arith.constant 9.99999997E-7 : f32
    %27 = vector.broadcast %cst_16 : f32 to vector<8x1xf32>
    %28 = arith.addf %26, %27 : vector<8x1xf32>
    %29 = math.rsqrt %28 : vector<8x1xf32>
    %30 = vector.broadcast %29 : vector<8x1xf32> to vector<8x32xf32>
    %31 = arith.mulf %21, %30 : vector<8x32xf32>
    %32 = vector.broadcast %14 : vector<1x32xf32> to vector<8x32xf32>
    %33 = arith.mulf %31, %32 : vector<8x32xf32>
    %34 = vector.broadcast %15 : vector<1x32xf32> to vector<8x32xf32>
    %35 = arith.addf %33, %34 : vector<8x32xf32>
    %36 = arith.truncf %35 : vector<8x32xf32> to vector<8x32xbf16>
    %c16 = arith.constant 16 : index
    %c0_17 = arith.constant 0 : index
    %37 = vector.load %arg4[%c16, %c0_17] : memref<184x128xf32, #tpu.memory_space<vmem>>, vector<4x8xf32>
    %c24 = arith.constant 24 : index
    %c0_18 = arith.constant 0 : index
    %38 = vector.load %arg4[%c24, %c0_18] : memref<184x128xf32, #tpu.memory_space<vmem>>, vector<4x8xf32>
    %c32 = arith.constant 32 : index
    %c0_19 = arith.constant 0 : index
    %39 = vector.load %arg4[%c32, %c0_19] : memref<184x128xf32, #tpu.memory_space<vmem>>, vector<4x8xf32>
    %c144 = arith.constant 144 : index
    %c0_20 = arith.constant 0 : index
    %40 = vector.load %arg3[%c144, %c0_20] : memref<656x128xbf16, #tpu.memory_space<vmem>>, vector<32x32xbf16>
    %cst_21 = arith.constant 0.000000e+00 : f32
    %41 = vector.broadcast %cst_21 : f32 to vector<8x32xf32>
    %c40 = arith.constant 40 : index
    %c0_22 = arith.constant 0 : index
    %42 = vector.load %arg4[%c40, %c0_22] : memref<184x128xf32, #tpu.memory_space<vmem>>, vector<1x32xf32>
    %43 = vector.broadcast %42 : vector<1x32xf32> to vector<8x32xf32>
    %44 = arith.addf %41, %43 : vector<8x32xf32>
    %c48 = arith.constant 48 : index
    %c0_23 = arith.constant 0 : index
    %45 = vector.load %arg3[%c48, %c0_23] : memref<656x128xbf16, #tpu.memory_space<vmem>>, vector<8x32xbf16>
    %cst_24 = arith.constant dense<0.000000e+00> : vector<8x8xf32>
    %46 = tpu.matmul %36, %45, %cst_24 {dimension_numbers = #tpu.dot_dimension_numbers<[1], [1], [0], [0], [0, 0, 1, 0], [], []>} : vector<8x32xbf16>, vector<8x32xbf16>, vector<8x8xf32> -> vector<8x8xf32>
    %47 = vector.extract_strided_slice %37 {offsets = [0, 0], sizes = [1, 8], strides = [1, 1]} : vector<4x8xf32> to vector<1x8xf32>
    %48 = vector.broadcast %47 : vector<1x8xf32> to vector<8x8xf32>
    %49 = arith.addf %46, %48 : vector<8x8xf32>
    %c80 = arith.constant 80 : index
    %c0_25 = arith.constant 0 : index
    %50 = vector.load %arg3[%c80, %c0_25] : memref<656x128xbf16, #tpu.memory_space<vmem>>, vector<8x32xbf16>
    %cst_26 = arith.constant dense<0.000000e+00> : vector<8x8xf32>
    %51 = tpu.matmul %36, %50, %cst_26 {dimension_numbers = #tpu.dot_dimension_numbers<[1], [1], [0], [0], [0, 0, 1, 0], [], []>} : vector<8x32xbf16>, vector<8x32xbf16>, vector<8x8xf32> -> vector<8x8xf32>
    %52 = vector.extract_strided_slice %38 {offsets = [0, 0], sizes = [1, 8], strides = [1, 1]} : vector<4x8xf32> to vector<1x8xf32>
    %53 = vector.broadcast %52 : vector<1x8xf32> to vector<8x8xf32>
    %54 = arith.addf %51, %53 : vector<8x8xf32>
    %c112 = arith.constant 112 : index
    %c0_27 = arith.constant 0 : index
    %55 = vector.load %arg3[%c112, %c0_27] : memref<656x128xbf16, #tpu.memory_space<vmem>>, vector<8x32xbf16>
    %cst_28 = arith.constant dense<0.000000e+00> : vector<8x8xf32>
    %56 = tpu.matmul %36, %55, %cst_28 {dimension_numbers = #tpu.dot_dimension_numbers<[1], [1], [0], [0], [0, 0, 1, 0], [], []>} : vector<8x32xbf16>, vector<8x32xbf16>, vector<8x8xf32> -> vector<8x8xf32>
    %57 = vector.extract_strided_slice %39 {offsets = [0, 0], sizes = [1, 8], strides = [1, 1]} : vector<4x8xf32> to vector<1x8xf32>
    %58 = vector.broadcast %57 : vector<1x8xf32> to vector<8x8xf32>
    %59 = arith.addf %56, %58 : vector<8x8xf32>
    %60 = arith.truncf %49 : vector<8x8xf32> to vector<8x8xbf16>
    %61 = arith.truncf %54 : vector<8x8xf32> to vector<8x8xbf16>
    %cst_29 = arith.constant dense<0.000000e+00> : vector<8x8xf32>
    %62 = tpu.matmul %60, %61, %cst_29 {dimension_numbers = #tpu.dot_dimension_numbers<[1], [1], [0], [0], [0, 0, 1, 0], [], []>} : vector<8x8xbf16>, vector<8x8xbf16>, vector<8x8xf32> -> vector<8x8xf32>
    %cst_30 = arith.constant 0.353553385 : f32
    %63 = vector.broadcast %cst_30 : f32 to vector<8x8xf32>
    %64 = arith.mulf %62, %63 : vector<8x8xf32>
    %65 = vector.broadcast %5 : vector<1x8xf32> to vector<8x8xf32>
    %66 = arith.addf %64, %65 : vector<8x8xf32>
    %cst_31 = arith.constant dense<0xFF800000> : vector<8xf32>
    %67 = vector.multi_reduction <maximumf>, %66, %cst_31 [1] : vector<8x8xf32> to vector<8xf32>
    %68 = vector.shape_cast %67 : vector<8xf32> to vector<8x1xf32>
    %69 = vector.broadcast %68 : vector<8x1xf32> to vector<8x8xf32>
    %70 = arith.subf %66, %69 : vector<8x8xf32>
    %71 = math.exp %70 : vector<8x8xf32>
    %cst_32 = arith.constant dense<0.000000e+00> : vector<8xf32>
    %72 = vector.multi_reduction <add>, %71, %cst_32 [1] : vector<8x8xf32> to vector<8xf32>
    %73 = vector.shape_cast %72 : vector<8xf32> to vector<8x1xf32>
    %74 = tpu.reciprocal %73 {approx = true} : vector<8x1xf32> -> vector<8x1xf32>
    %75 = vector.broadcast %74 : vector<8x1xf32> to vector<8x8xf32>
    %76 = arith.mulf %71, %75 : vector<8x8xf32>
    %77 = arith.truncf %76 : vector<8x8xf32> to vector<8x8xbf16>
    %78 = arith.truncf %59 : vector<8x8xf32> to vector<8x8xbf16>
    %cst_33 = arith.constant dense<0.000000e+00> : vector<8x8xf32>
    %79 = tpu.matmul %77, %78, %cst_33 {dimension_numbers = #tpu.dot_dimension_numbers<[1], [0], [0], [1], [0, 0, 1, 1], [], []>} : vector<8x8xbf16>, vector<8x8xbf16>, vector<8x8xf32> -> vector<8x8xf32>
    %80 = vector.extract_strided_slice %40 {offsets = [0, 0], sizes = [8, 32], strides = [1, 1]} : vector<32x32xbf16> to vector<8x32xbf16>
    %81 = arith.truncf %79 : vector<8x8xf32> to vector<8x8xbf16>
    %cst_34 = arith.constant dense<0.000000e+00> : vector<8x32xf32>
    %82 = tpu.matmul %81, %80, %cst_34 {dimension_numbers = #tpu.dot_dimension_numbers<[1], [0], [0], [1], [0, 0, 1, 1], [], []>} : vector<8x8xbf16>, vector<8x32xbf16>, vector<8x32xf32> -> vector<8x32xf32>
    %83 = arith.addf %44, %82 : vector<8x32xf32>
    %c56 = arith.constant 56 : index
    %c0_35 = arith.constant 0 : index
    %84 = vector.load %arg3[%c56, %c0_35] : memref<656x128xbf16, #tpu.memory_space<vmem>>, vector<8x32xbf16>
    %cst_36 = arith.constant dense<0.000000e+00> : vector<8x8xf32>
    %85 = tpu.matmul %36, %84, %cst_36 {dimension_numbers = #tpu.dot_dimension_numbers<[1], [1], [0], [0], [0, 0, 1, 0], [], []>} : vector<8x32xbf16>, vector<8x32xbf16>, vector<8x8xf32> -> vector<8x8xf32>
    %86 = vector.extract_strided_slice %37 {offsets = [1, 0], sizes = [1, 8], strides = [1, 1]} : vector<4x8xf32> to vector<1x8xf32>
    %87 = vector.broadcast %86 : vector<1x8xf32> to vector<8x8xf32>
    %88 = arith.addf %85, %87 : vector<8x8xf32>
    %c88 = arith.constant 88 : index
    %c0_37 = arith.constant 0 : index
    %89 = vector.load %arg3[%c88, %c0_37] : memref<656x128xbf16, #tpu.memory_space<vmem>>, vector<8x32xbf16>
    %cst_38 = arith.constant dense<0.000000e+00> : vector<8x8xf32>
    %90 = tpu.matmul %36, %89, %cst_38 {dimension_numbers = #tpu.dot_dimension_numbers<[1], [1], [0], [0], [0, 0, 1, 0], [], []>} : vector<8x32xbf16>, vector<8x32xbf16>, vector<8x8xf32> -> vector<8x8xf32>
    %91 = vector.extract_strided_slice %38 {offsets = [1, 0], sizes = [1, 8], strides = [1, 1]} : vector<4x8xf32> to vector<1x8xf32>
    %92 = vector.broadcast %91 : vector<1x8xf32> to vector<8x8xf32>
    %93 = arith.addf %90, %92 : vector<8x8xf32>
    %c120 = arith.constant 120 : index
    %c0_39 = arith.constant 0 : index
    %94 = vector.load %arg3[%c120, %c0_39] : memref<656x128xbf16, #tpu.memory_space<vmem>>, vector<8x32xbf16>
    %cst_40 = arith.constant dense<0.000000e+00> : vector<8x8xf32>
    %95 = tpu.matmul %36, %94, %cst_40 {dimension_numbers = #tpu.dot_dimension_numbers<[1], [1], [0], [0], [0, 0, 1, 0], [], []>} : vector<8x32xbf16>, vector<8x32xbf16>, vector<8x8xf32> -> vector<8x8xf32>
    %96 = vector.extract_strided_slice %39 {offsets = [1, 0], sizes = [1, 8], strides = [1, 1]} : vector<4x8xf32> to vector<1x8xf32>
    %97 = vector.broadcast %96 : vector<1x8xf32> to vector<8x8xf32>
    %98 = arith.addf %95, %97 : vector<8x8xf32>
    %99 = arith.truncf %88 : vector<8x8xf32> to vector<8x8xbf16>
    %100 = arith.truncf %93 : vector<8x8xf32> to vector<8x8xbf16>
    %cst_41 = arith.constant dense<0.000000e+00> : vector<8x8xf32>
    %101 = tpu.matmul %99, %100, %cst_41 {dimension_numbers = #tpu.dot_dimension_numbers<[1], [1], [0], [0], [0, 0, 1, 0], [], []>} : vector<8x8xbf16>, vector<8x8xbf16>, vector<8x8xf32> -> vector<8x8xf32>
    %cst_42 = arith.constant 0.353553385 : f32
    %102 = vector.broadcast %cst_42 : f32 to vector<8x8xf32>
    %103 = arith.mulf %101, %102 : vector<8x8xf32>
    %104 = vector.broadcast %5 : vector<1x8xf32> to vector<8x8xf32>
    %105 = arith.addf %103, %104 : vector<8x8xf32>
    %cst_43 = arith.constant dense<0xFF800000> : vector<8xf32>
    %106 = vector.multi_reduction <maximumf>, %105, %cst_43 [1] : vector<8x8xf32> to vector<8xf32>
    %107 = vector.shape_cast %106 : vector<8xf32> to vector<8x1xf32>
    %108 = vector.broadcast %107 : vector<8x1xf32> to vector<8x8xf32>
    %109 = arith.subf %105, %108 : vector<8x8xf32>
    %110 = math.exp %109 : vector<8x8xf32>
    %cst_44 = arith.constant dense<0.000000e+00> : vector<8xf32>
    %111 = vector.multi_reduction <add>, %110, %cst_44 [1] : vector<8x8xf32> to vector<8xf32>
    %112 = vector.shape_cast %111 : vector<8xf32> to vector<8x1xf32>
    %113 = tpu.reciprocal %112 {approx = true} : vector<8x1xf32> -> vector<8x1xf32>
    %114 = vector.broadcast %113 : vector<8x1xf32> to vector<8x8xf32>
    %115 = arith.mulf %110, %114 : vector<8x8xf32>
    %116 = arith.truncf %115 : vector<8x8xf32> to vector<8x8xbf16>
    %117 = arith.truncf %98 : vector<8x8xf32> to vector<8x8xbf16>
    %cst_45 = arith.constant dense<0.000000e+00> : vector<8x8xf32>
    %118 = tpu.matmul %116, %117, %cst_45 {dimension_numbers = #tpu.dot_dimension_numbers<[1], [0], [0], [1], [0, 0, 1, 1], [], []>} : vector<8x8xbf16>, vector<8x8xbf16>, vector<8x8xf32> -> vector<8x8xf32>
    %119 = vector.extract_strided_slice %40 {offsets = [8, 0], sizes = [8, 32], strides = [1, 1]} : vector<32x32xbf16> to vector<8x32xbf16>
    %120 = arith.truncf %118 : vector<8x8xf32> to vector<8x8xbf16>
    %cst_46 = arith.constant dense<0.000000e+00> : vector<8x32xf32>
    %121 = tpu.matmul %120, %119, %cst_46 {dimension_numbers = #tpu.dot_dimension_numbers<[1], [0], [0], [1], [0, 0, 1, 1], [], []>} : vector<8x8xbf16>, vector<8x32xbf16>, vector<8x32xf32> -> vector<8x32xf32>
    %122 = arith.addf %83, %121 : vector<8x32xf32>
    %c64 = arith.constant 64 : index
    %c0_47 = arith.constant 0 : index
    %123 = vector.load %arg3[%c64, %c0_47] : memref<656x128xbf16, #tpu.memory_space<vmem>>, vector<8x32xbf16>
    %cst_48 = arith.constant dense<0.000000e+00> : vector<8x8xf32>
    %124 = tpu.matmul %36, %123, %cst_48 {dimension_numbers = #tpu.dot_dimension_numbers<[1], [1], [0], [0], [0, 0, 1, 0], [], []>} : vector<8x32xbf16>, vector<8x32xbf16>, vector<8x8xf32> -> vector<8x8xf32>
    %125 = vector.extract_strided_slice %37 {offsets = [2, 0], sizes = [1, 8], strides = [1, 1]} : vector<4x8xf32> to vector<1x8xf32>
    %126 = vector.broadcast %125 : vector<1x8xf32> to vector<8x8xf32>
    %127 = arith.addf %124, %126 : vector<8x8xf32>
    %c96 = arith.constant 96 : index
    %c0_49 = arith.constant 0 : index
    %128 = vector.load %arg3[%c96, %c0_49] : memref<656x128xbf16, #tpu.memory_space<vmem>>, vector<8x32xbf16>
    %cst_50 = arith.constant dense<0.000000e+00> : vector<8x8xf32>
    %129 = tpu.matmul %36, %128, %cst_50 {dimension_numbers = #tpu.dot_dimension_numbers<[1], [1], [0], [0], [0, 0, 1, 0], [], []>} : vector<8x32xbf16>, vector<8x32xbf16>, vector<8x8xf32> -> vector<8x8xf32>
    %130 = vector.extract_strided_slice %38 {offsets = [2, 0], sizes = [1, 8], strides = [1, 1]} : vector<4x8xf32> to vector<1x8xf32>
    %131 = vector.broadcast %130 : vector<1x8xf32> to vector<8x8xf32>
    %132 = arith.addf %129, %131 : vector<8x8xf32>
    %c128 = arith.constant 128 : index
    %c0_51 = arith.constant 0 : index
    %133 = vector.load %arg3[%c128, %c0_51] : memref<656x128xbf16, #tpu.memory_space<vmem>>, vector<8x32xbf16>
    %cst_52 = arith.constant dense<0.000000e+00> : vector<8x8xf32>
    %134 = tpu.matmul %36, %133, %cst_52 {dimension_numbers = #tpu.dot_dimension_numbers<[1], [1], [0], [0], [0, 0, 1, 0], [], []>} : vector<8x32xbf16>, vector<8x32xbf16>, vector<8x8xf32> -> vector<8x8xf32>
    %135 = vector.extract_strided_slice %39 {offsets = [2, 0], sizes = [1, 8], strides = [1, 1]} : vector<4x8xf32> to vector<1x8xf32>
    %136 = vector.broadcast %135 : vector<1x8xf32> to vector<8x8xf32>
    %137 = arith.addf %134, %136 : vector<8x8xf32>
    %138 = arith.truncf %127 : vector<8x8xf32> to vector<8x8xbf16>
    %139 = arith.truncf %132 : vector<8x8xf32> to vector<8x8xbf16>
    %cst_53 = arith.constant dense<0.000000e+00> : vector<8x8xf32>
    %140 = tpu.matmul %138, %139, %cst_53 {dimension_numbers = #tpu.dot_dimension_numbers<[1], [1], [0], [0], [0, 0, 1, 0], [], []>} : vector<8x8xbf16>, vector<8x8xbf16>, vector<8x8xf32> -> vector<8x8xf32>
    %cst_54 = arith.constant 0.353553385 : f32
    %141 = vector.broadcast %cst_54 : f32 to vector<8x8xf32>
    %142 = arith.mulf %140, %141 : vector<8x8xf32>
    %143 = vector.broadcast %5 : vector<1x8xf32> to vector<8x8xf32>
    %144 = arith.addf %142, %143 : vector<8x8xf32>
    %cst_55 = arith.constant dense<0xFF800000> : vector<8xf32>
    %145 = vector.multi_reduction <maximumf>, %144, %cst_55 [1] : vector<8x8xf32> to vector<8xf32>
    %146 = vector.shape_cast %145 : vector<8xf32> to vector<8x1xf32>
    %147 = vector.broadcast %146 : vector<8x1xf32> to vector<8x8xf32>
    %148 = arith.subf %144, %147 : vector<8x8xf32>
    %149 = math.exp %148 : vector<8x8xf32>
    %cst_56 = arith.constant dense<0.000000e+00> : vector<8xf32>
    %150 = vector.multi_reduction <add>, %149, %cst_56 [1] : vector<8x8xf32> to vector<8xf32>
    %151 = vector.shape_cast %150 : vector<8xf32> to vector<8x1xf32>
    %152 = tpu.reciprocal %151 {approx = true} : vector<8x1xf32> -> vector<8x1xf32>
    %153 = vector.broadcast %152 : vector<8x1xf32> to vector<8x8xf32>
    %154 = arith.mulf %149, %153 : vector<8x8xf32>
    %155 = arith.truncf %154 : vector<8x8xf32> to vector<8x8xbf16>
    %156 = arith.truncf %137 : vector<8x8xf32> to vector<8x8xbf16>
    %cst_57 = arith.constant dense<0.000000e+00> : vector<8x8xf32>
    %157 = tpu.matmul %155, %156, %cst_57 {dimension_numbers = #tpu.dot_dimension_numbers<[1], [0], [0], [1], [0, 0, 1, 1], [], []>} : vector<8x8xbf16>, vector<8x8xbf16>, vector<8x8xf32> -> vector<8x8xf32>
    %158 = vector.extract_strided_slice %40 {offsets = [16, 0], sizes = [8, 32], strides = [1, 1]} : vector<32x32xbf16> to vector<8x32xbf16>
    %159 = arith.truncf %157 : vector<8x8xf32> to vector<8x8xbf16>
    %cst_58 = arith.constant dense<0.000000e+00> : vector<8x32xf32>
    %160 = tpu.matmul %159, %158, %cst_58 {dimension_numbers = #tpu.dot_dimension_numbers<[1], [0], [0], [1], [0, 0, 1, 1], [], []>} : vector<8x8xbf16>, vector<8x32xbf16>, vector<8x32xf32> -> vector<8x32xf32>
    %161 = arith.addf %122, %160 : vector<8x32xf32>
    %c72 = arith.constant 72 : index
    %c0_59 = arith.constant 0 : index
    %162 = vector.load %arg3[%c72, %c0_59] : memref<656x128xbf16, #tpu.memory_space<vmem>>, vector<8x32xbf16>
    %cst_60 = arith.constant dense<0.000000e+00> : vector<8x8xf32>
    %163 = tpu.matmul %36, %162, %cst_60 {dimension_numbers = #tpu.dot_dimension_numbers<[1], [1], [0], [0], [0, 0, 1, 0], [], []>} : vector<8x32xbf16>, vector<8x32xbf16>, vector<8x8xf32> -> vector<8x8xf32>
    %164 = vector.extract_strided_slice %37 {offsets = [3, 0], sizes = [1, 8], strides = [1, 1]} : vector<4x8xf32> to vector<1x8xf32>
    %165 = vector.broadcast %164 : vector<1x8xf32> to vector<8x8xf32>
    %166 = arith.addf %163, %165 : vector<8x8xf32>
    %c104 = arith.constant 104 : index
    %c0_61 = arith.constant 0 : index
    %167 = vector.load %arg3[%c104, %c0_61] : memref<656x128xbf16, #tpu.memory_space<vmem>>, vector<8x32xbf16>
    %cst_62 = arith.constant dense<0.000000e+00> : vector<8x8xf32>
    %168 = tpu.matmul %36, %167, %cst_62 {dimension_numbers = #tpu.dot_dimension_numbers<[1], [1], [0], [0], [0, 0, 1, 0], [], []>} : vector<8x32xbf16>, vector<8x32xbf16>, vector<8x8xf32> -> vector<8x8xf32>
    %169 = vector.extract_strided_slice %38 {offsets = [3, 0], sizes = [1, 8], strides = [1, 1]} : vector<4x8xf32> to vector<1x8xf32>
    %170 = vector.broadcast %169 : vector<1x8xf32> to vector<8x8xf32>
    %171 = arith.addf %168, %170 : vector<8x8xf32>
    %c136 = arith.constant 136 : index
    %c0_63 = arith.constant 0 : index
    %172 = vector.load %arg3[%c136, %c0_63] : memref<656x128xbf16, #tpu.memory_space<vmem>>, vector<8x32xbf16>
    %cst_64 = arith.constant dense<0.000000e+00> : vector<8x8xf32>
    %173 = tpu.matmul %36, %172, %cst_64 {dimension_numbers = #tpu.dot_dimension_numbers<[1], [1], [0], [0], [0, 0, 1, 0], [], []>} : vector<8x32xbf16>, vector<8x32xbf16>, vector<8x8xf32> -> vector<8x8xf32>
    %174 = vector.extract_strided_slice %39 {offsets = [3, 0], sizes = [1, 8], strides = [1, 1]} : vector<4x8xf32> to vector<1x8xf32>
    %175 = vector.broadcast %174 : vector<1x8xf32> to vector<8x8xf32>
    %176 = arith.addf %173, %175 : vector<8x8xf32>
    %177 = arith.truncf %166 : vector<8x8xf32> to vector<8x8xbf16>
    %178 = arith.truncf %171 : vector<8x8xf32> to vector<8x8xbf16>
    %cst_65 = arith.constant dense<0.000000e+00> : vector<8x8xf32>
    %179 = tpu.matmul %177, %178, %cst_65 {dimension_numbers = #tpu.dot_dimension_numbers<[1], [1], [0], [0], [0, 0, 1, 0], [], []>} : vector<8x8xbf16>, vector<8x8xbf16>, vector<8x8xf32> -> vector<8x8xf32>
    %cst_66 = arith.constant 0.353553385 : f32
    %180 = vector.broadcast %cst_66 : f32 to vector<8x8xf32>
    %181 = arith.mulf %179, %180 : vector<8x8xf32>
    %182 = vector.broadcast %5 : vector<1x8xf32> to vector<8x8xf32>
    %183 = arith.addf %181, %182 : vector<8x8xf32>
    %cst_67 = arith.constant dense<0xFF800000> : vector<8xf32>
    %184 = vector.multi_reduction <maximumf>, %183, %cst_67 [1] : vector<8x8xf32> to vector<8xf32>
    %185 = vector.shape_cast %184 : vector<8xf32> to vector<8x1xf32>
    %186 = vector.broadcast %185 : vector<8x1xf32> to vector<8x8xf32>
    %187 = arith.subf %183, %186 : vector<8x8xf32>
    %188 = math.exp %187 : vector<8x8xf32>
    %cst_68 = arith.constant dense<0.000000e+00> : vector<8xf32>
    %189 = vector.multi_reduction <add>, %188, %cst_68 [1] : vector<8x8xf32> to vector<8xf32>
    %190 = vector.shape_cast %189 : vector<8xf32> to vector<8x1xf32>
    %191 = tpu.reciprocal %190 {approx = true} : vector<8x1xf32> -> vector<8x1xf32>
    %192 = vector.broadcast %191 : vector<8x1xf32> to vector<8x8xf32>
    %193 = arith.mulf %188, %192 : vector<8x8xf32>
    %194 = arith.truncf %193 : vector<8x8xf32> to vector<8x8xbf16>
    %195 = arith.truncf %176 : vector<8x8xf32> to vector<8x8xbf16>
    %cst_69 = arith.constant dense<0.000000e+00> : vector<8x8xf32>
    %196 = tpu.matmul %194, %195, %cst_69 {dimension_numbers = #tpu.dot_dimension_numbers<[1], [0], [0], [1], [0, 0, 1, 1], [], []>} : vector<8x8xbf16>, vector<8x8xbf16>, vector<8x8xf32> -> vector<8x8xf32>
    %197 = vector.extract_strided_slice %40 {offsets = [24, 0], sizes = [8, 32], strides = [1, 1]} : vector<32x32xbf16> to vector<8x32xbf16>
    %198 = arith.truncf %196 : vector<8x8xf32> to vector<8x8xbf16>
    %cst_70 = arith.constant dense<0.000000e+00> : vector<8x32xf32>
    %199 = tpu.matmul %198, %197, %cst_70 {dimension_numbers = #tpu.dot_dimension_numbers<[1], [0], [0], [1], [0, 0, 1, 1], [], []>} : vector<8x8xbf16>, vector<8x32xbf16>, vector<8x32xf32> -> vector<8x32xf32>
    %200 = arith.addf %161, %199 : vector<8x32xf32>
    %201 = arith.addf %13, %200 : vector<8x32xf32>
    %c48_71 = arith.constant 48 : index
    %c0_72 = arith.constant 0 : index
    %202 = vector.load %arg4[%c48_71, %c0_72] : memref<184x128xf32, #tpu.memory_space<vmem>>, vector<1x32xf32>
    %c56_73 = arith.constant 56 : index
    %c0_74 = arith.constant 0 : index
    %203 = vector.load %arg4[%c56_73, %c0_74] : memref<184x128xf32, #tpu.memory_space<vmem>>, vector<1x32xf32>
    %cst_75 = arith.constant dense<0.000000e+00> : vector<8xf32>
    %204 = vector.multi_reduction <add>, %201, %cst_75 [1] : vector<8x32xf32> to vector<8xf32>
    %205 = vector.shape_cast %204 : vector<8xf32> to vector<8x1xf32>
    %cst_76 = arith.constant 3.200000e+01 : f32
    %206 = vector.broadcast %cst_76 : f32 to vector<8x1xf32>
    %207 = arith.divf %205, %206 : vector<8x1xf32>
    %208 = vector.broadcast %207 : vector<8x1xf32> to vector<8x32xf32>
    %209 = arith.subf %201, %208 : vector<8x32xf32>
    %210 = arith.mulf %209, %209 : vector<8x32xf32>
    %cst_77 = arith.constant dense<0.000000e+00> : vector<8xf32>
    %211 = vector.multi_reduction <add>, %210, %cst_77 [1] : vector<8x32xf32> to vector<8xf32>
    %212 = vector.shape_cast %211 : vector<8xf32> to vector<8x1xf32>
    %cst_78 = arith.constant 3.200000e+01 : f32
    %213 = vector.broadcast %cst_78 : f32 to vector<8x1xf32>
    %214 = arith.divf %212, %213 : vector<8x1xf32>
    %cst_79 = arith.constant 9.99999997E-7 : f32
    %215 = vector.broadcast %cst_79 : f32 to vector<8x1xf32>
    %216 = arith.addf %214, %215 : vector<8x1xf32>
    %217 = math.rsqrt %216 : vector<8x1xf32>
    %218 = vector.broadcast %217 : vector<8x1xf32> to vector<8x32xf32>
    %219 = arith.mulf %209, %218 : vector<8x32xf32>
    %220 = vector.broadcast %202 : vector<1x32xf32> to vector<8x32xf32>
    %221 = arith.mulf %219, %220 : vector<8x32xf32>
    %222 = vector.broadcast %203 : vector<1x32xf32> to vector<8x32xf32>
    %223 = arith.addf %221, %222 : vector<8x32xf32>
    %224 = arith.truncf %223 : vector<8x32xf32> to vector<8x32xbf16>
    %c176 = arith.constant 176 : index
    %c0_80 = arith.constant 0 : index
    %225 = vector.load %arg3[%c176, %c0_80] : memref<656x128xbf16, #tpu.memory_space<vmem>>, vector<32x128xbf16>
    %cst_81 = arith.constant dense<0.000000e+00> : vector<8x128xf32>
    %226 = tpu.matmul %224, %225, %cst_81 {dimension_numbers = #tpu.dot_dimension_numbers<[1], [0], [0], [1], [0, 0, 1, 1], [], []>} : vector<8x32xbf16>, vector<32x128xbf16>, vector<8x128xf32> -> vector<8x128xf32>
    %c64_82 = arith.constant 64 : index
    %c0_83 = arith.constant 0 : index
    %227 = vector.load %arg4[%c64_82, %c0_83] : memref<184x128xf32, #tpu.memory_space<vmem>>, vector<1x128xf32>
    %228 = vector.broadcast %227 : vector<1x128xf32> to vector<8x128xf32>
    %229 = arith.addf %226, %228 : vector<8x128xf32>
    %cst_84 = arith.constant 5.000000e-01 : f32
    %230 = vector.broadcast %cst_84 : f32 to vector<8x128xf32>
    %231 = arith.mulf %230, %229 : vector<8x128xf32>
    %cst_85 = arith.constant 0.707106769 : f32
    %232 = vector.broadcast %cst_85 : f32 to vector<8x128xf32>
    %233 = arith.mulf %229, %232 : vector<8x128xf32>
    %234 = math.erf %233 : vector<8x128xf32>
    %cst_86 = arith.constant 1.000000e+00 : f32
    %235 = vector.broadcast %cst_86 : f32 to vector<8x128xf32>
    %236 = arith.addf %235, %234 : vector<8x128xf32>
    %237 = arith.mulf %231, %236 : vector<8x128xf32>
    %c208 = arith.constant 208 : index
    %c0_87 = arith.constant 0 : index
    %238 = vector.load %arg3[%c208, %c0_87] : memref<656x128xbf16, #tpu.memory_space<vmem>>, vector<128x32xbf16>
    %239 = arith.truncf %237 : vector<8x128xf32> to vector<8x128xbf16>
    %cst_88 = arith.constant dense<0.000000e+00> : vector<8x32xf32>
    %240 = tpu.matmul %239, %238, %cst_88 {dimension_numbers = #tpu.dot_dimension_numbers<[1], [0], [0], [1], [0, 0, 1, 1], [], []>} : vector<8x128xbf16>, vector<128x32xbf16>, vector<8x32xf32> -> vector<8x32xf32>
    %241 = arith.addf %201, %240 : vector<8x32xf32>
    %c72_89 = arith.constant 72 : index
    %c0_90 = arith.constant 0 : index
    %242 = vector.load %arg4[%c72_89, %c0_90] : memref<184x128xf32, #tpu.memory_space<vmem>>, vector<1x32xf32>
    %243 = vector.broadcast %242 : vector<1x32xf32> to vector<8x32xf32>
    %244 = arith.addf %241, %243 : vector<8x32xf32>
    %c80_91 = arith.constant 80 : index
    %c0_92 = arith.constant 0 : index
    %245 = vector.load %arg4[%c80_91, %c0_92] : memref<184x128xf32, #tpu.memory_space<vmem>>, vector<1x32xf32>
    %c88_93 = arith.constant 88 : index
    %c0_94 = arith.constant 0 : index
    %246 = vector.load %arg4[%c88_93, %c0_94] : memref<184x128xf32, #tpu.memory_space<vmem>>, vector<1x32xf32>
    %cst_95 = arith.constant dense<0.000000e+00> : vector<8xf32>
    %247 = vector.multi_reduction <add>, %244, %cst_95 [1] : vector<8x32xf32> to vector<8xf32>
    %248 = vector.shape_cast %247 : vector<8xf32> to vector<8x1xf32>
    %cst_96 = arith.constant 3.200000e+01 : f32
    %249 = vector.broadcast %cst_96 : f32 to vector<8x1xf32>
    %250 = arith.divf %248, %249 : vector<8x1xf32>
    %251 = vector.broadcast %250 : vector<8x1xf32> to vector<8x32xf32>
    %252 = arith.subf %244, %251 : vector<8x32xf32>
    %253 = arith.mulf %252, %252 : vector<8x32xf32>
    %cst_97 = arith.constant dense<0.000000e+00> : vector<8xf32>
    %254 = vector.multi_reduction <add>, %253, %cst_97 [1] : vector<8x32xf32> to vector<8xf32>
    %255 = vector.shape_cast %254 : vector<8xf32> to vector<8x1xf32>
    %cst_98 = arith.constant 3.200000e+01 : f32
    %256 = vector.broadcast %cst_98 : f32 to vector<8x1xf32>
    %257 = arith.divf %255, %256 : vector<8x1xf32>
    %cst_99 = arith.constant 9.99999997E-7 : f32
    %258 = vector.broadcast %cst_99 : f32 to vector<8x1xf32>
    %259 = arith.addf %257, %258 : vector<8x1xf32>
    %260 = math.rsqrt %259 : vector<8x1xf32>
    %261 = vector.broadcast %260 : vector<8x1xf32> to vector<8x32xf32>
    %262 = arith.mulf %252, %261 : vector<8x32xf32>
    %263 = vector.broadcast %245 : vector<1x32xf32> to vector<8x32xf32>
    %264 = arith.mulf %262, %263 : vector<8x32xf32>
    %265 = vector.broadcast %246 : vector<1x32xf32> to vector<8x32xf32>
    %266 = arith.addf %264, %265 : vector<8x32xf32>
    %267 = arith.truncf %266 : vector<8x32xf32> to vector<8x32xbf16>
    %c96_100 = arith.constant 96 : index
    %c0_101 = arith.constant 0 : index
    %268 = vector.load %arg4[%c96_100, %c0_101] : memref<184x128xf32, #tpu.memory_space<vmem>>, vector<4x8xf32>
    %c104_102 = arith.constant 104 : index
    %c0_103 = arith.constant 0 : index
    %269 = vector.load %arg4[%c104_102, %c0_103] : memref<184x128xf32, #tpu.memory_space<vmem>>, vector<4x8xf32>
    %c112_104 = arith.constant 112 : index
    %c0_105 = arith.constant 0 : index
    %270 = vector.load %arg4[%c112_104, %c0_105] : memref<184x128xf32, #tpu.memory_space<vmem>>, vector<4x8xf32>
    %c432 = arith.constant 432 : index
    %c0_106 = arith.constant 0 : index
    %271 = vector.load %arg3[%c432, %c0_106] : memref<656x128xbf16, #tpu.memory_space<vmem>>, vector<32x32xbf16>
    %cst_107 = arith.constant 0.000000e+00 : f32
    %272 = vector.broadcast %cst_107 : f32 to vector<8x32xf32>
    %c120_108 = arith.constant 120 : index
    %c0_109 = arith.constant 0 : index
    %273 = vector.load %arg4[%c120_108, %c0_109] : memref<184x128xf32, #tpu.memory_space<vmem>>, vector<1x32xf32>
    %274 = vector.broadcast %273 : vector<1x32xf32> to vector<8x32xf32>
    %275 = arith.addf %272, %274 : vector<8x32xf32>
    %c336 = arith.constant 336 : index
    %c0_110 = arith.constant 0 : index
    %276 = vector.load %arg3[%c336, %c0_110] : memref<656x128xbf16, #tpu.memory_space<vmem>>, vector<8x32xbf16>
    %cst_111 = arith.constant dense<0.000000e+00> : vector<8x8xf32>
    %277 = tpu.matmul %267, %276, %cst_111 {dimension_numbers = #tpu.dot_dimension_numbers<[1], [1], [0], [0], [0, 0, 1, 0], [], []>} : vector<8x32xbf16>, vector<8x32xbf16>, vector<8x8xf32> -> vector<8x8xf32>
    %278 = vector.extract_strided_slice %268 {offsets = [0, 0], sizes = [1, 8], strides = [1, 1]} : vector<4x8xf32> to vector<1x8xf32>
    %279 = vector.broadcast %278 : vector<1x8xf32> to vector<8x8xf32>
    %280 = arith.addf %277, %279 : vector<8x8xf32>
    %c368 = arith.constant 368 : index
    %c0_112 = arith.constant 0 : index
    %281 = vector.load %arg3[%c368, %c0_112] : memref<656x128xbf16, #tpu.memory_space<vmem>>, vector<8x32xbf16>
    %cst_113 = arith.constant dense<0.000000e+00> : vector<8x8xf32>
    %282 = tpu.matmul %267, %281, %cst_113 {dimension_numbers = #tpu.dot_dimension_numbers<[1], [1], [0], [0], [0, 0, 1, 0], [], []>} : vector<8x32xbf16>, vector<8x32xbf16>, vector<8x8xf32> -> vector<8x8xf32>
    %283 = vector.extract_strided_slice %269 {offsets = [0, 0], sizes = [1, 8], strides = [1, 1]} : vector<4x8xf32> to vector<1x8xf32>
    %284 = vector.broadcast %283 : vector<1x8xf32> to vector<8x8xf32>
    %285 = arith.addf %282, %284 : vector<8x8xf32>
    %c400 = arith.constant 400 : index
    %c0_114 = arith.constant 0 : index
    %286 = vector.load %arg3[%c400, %c0_114] : memref<656x128xbf16, #tpu.memory_space<vmem>>, vector<8x32xbf16>
    %cst_115 = arith.constant dense<0.000000e+00> : vector<8x8xf32>
    %287 = tpu.matmul %267, %286, %cst_115 {dimension_numbers = #tpu.dot_dimension_numbers<[1], [1], [0], [0], [0, 0, 1, 0], [], []>} : vector<8x32xbf16>, vector<8x32xbf16>, vector<8x8xf32> -> vector<8x8xf32>
    %288 = vector.extract_strided_slice %270 {offsets = [0, 0], sizes = [1, 8], strides = [1, 1]} : vector<4x8xf32> to vector<1x8xf32>
    %289 = vector.broadcast %288 : vector<1x8xf32> to vector<8x8xf32>
    %290 = arith.addf %287, %289 : vector<8x8xf32>
    %291 = arith.truncf %280 : vector<8x8xf32> to vector<8x8xbf16>
    %292 = arith.truncf %285 : vector<8x8xf32> to vector<8x8xbf16>
    %cst_116 = arith.constant dense<0.000000e+00> : vector<8x8xf32>
    %293 = tpu.matmul %291, %292, %cst_116 {dimension_numbers = #tpu.dot_dimension_numbers<[1], [1], [0], [0], [0, 0, 1, 0], [], []>} : vector<8x8xbf16>, vector<8x8xbf16>, vector<8x8xf32> -> vector<8x8xf32>
    %cst_117 = arith.constant 0.353553385 : f32
    %294 = vector.broadcast %cst_117 : f32 to vector<8x8xf32>
    %295 = arith.mulf %293, %294 : vector<8x8xf32>
    %296 = vector.broadcast %5 : vector<1x8xf32> to vector<8x8xf32>
    %297 = arith.addf %295, %296 : vector<8x8xf32>
    %cst_118 = arith.constant dense<0xFF800000> : vector<8xf32>
    %298 = vector.multi_reduction <maximumf>, %297, %cst_118 [1] : vector<8x8xf32> to vector<8xf32>
    %299 = vector.shape_cast %298 : vector<8xf32> to vector<8x1xf32>
    %300 = vector.broadcast %299 : vector<8x1xf32> to vector<8x8xf32>
    %301 = arith.subf %297, %300 : vector<8x8xf32>
    %302 = math.exp %301 : vector<8x8xf32>
    %cst_119 = arith.constant dense<0.000000e+00> : vector<8xf32>
    %303 = vector.multi_reduction <add>, %302, %cst_119 [1] : vector<8x8xf32> to vector<8xf32>
    %304 = vector.shape_cast %303 : vector<8xf32> to vector<8x1xf32>
    %305 = tpu.reciprocal %304 {approx = true} : vector<8x1xf32> -> vector<8x1xf32>
    %306 = vector.broadcast %305 : vector<8x1xf32> to vector<8x8xf32>
    %307 = arith.mulf %302, %306 : vector<8x8xf32>
    %308 = arith.truncf %307 : vector<8x8xf32> to vector<8x8xbf16>
    %309 = arith.truncf %290 : vector<8x8xf32> to vector<8x8xbf16>
    %cst_120 = arith.constant dense<0.000000e+00> : vector<8x8xf32>
    %310 = tpu.matmul %308, %309, %cst_120 {dimension_numbers = #tpu.dot_dimension_numbers<[1], [0], [0], [1], [0, 0, 1, 1], [], []>} : vector<8x8xbf16>, vector<8x8xbf16>, vector<8x8xf32> -> vector<8x8xf32>
    %311 = vector.extract_strided_slice %271 {offsets = [0, 0], sizes = [8, 32], strides = [1, 1]} : vector<32x32xbf16> to vector<8x32xbf16>
    %312 = arith.truncf %310 : vector<8x8xf32> to vector<8x8xbf16>
    %cst_121 = arith.constant dense<0.000000e+00> : vector<8x32xf32>
    %313 = tpu.matmul %312, %311, %cst_121 {dimension_numbers = #tpu.dot_dimension_numbers<[1], [0], [0], [1], [0, 0, 1, 1], [], []>} : vector<8x8xbf16>, vector<8x32xbf16>, vector<8x32xf32> -> vector<8x32xf32>
    %314 = arith.addf %275, %313 : vector<8x32xf32>
    %c344 = arith.constant 344 : index
    %c0_122 = arith.constant 0 : index
    %315 = vector.load %arg3[%c344, %c0_122] : memref<656x128xbf16, #tpu.memory_space<vmem>>, vector<8x32xbf16>
    %cst_123 = arith.constant dense<0.000000e+00> : vector<8x8xf32>
    %316 = tpu.matmul %267, %315, %cst_123 {dimension_numbers = #tpu.dot_dimension_numbers<[1], [1], [0], [0], [0, 0, 1, 0], [], []>} : vector<8x32xbf16>, vector<8x32xbf16>, vector<8x8xf32> -> vector<8x8xf32>
    %317 = vector.extract_strided_slice %268 {offsets = [1, 0], sizes = [1, 8], strides = [1, 1]} : vector<4x8xf32> to vector<1x8xf32>
    %318 = vector.broadcast %317 : vector<1x8xf32> to vector<8x8xf32>
    %319 = arith.addf %316, %318 : vector<8x8xf32>
    %c376 = arith.constant 376 : index
    %c0_124 = arith.constant 0 : index
    %320 = vector.load %arg3[%c376, %c0_124] : memref<656x128xbf16, #tpu.memory_space<vmem>>, vector<8x32xbf16>
    %cst_125 = arith.constant dense<0.000000e+00> : vector<8x8xf32>
    %321 = tpu.matmul %267, %320, %cst_125 {dimension_numbers = #tpu.dot_dimension_numbers<[1], [1], [0], [0], [0, 0, 1, 0], [], []>} : vector<8x32xbf16>, vector<8x32xbf16>, vector<8x8xf32> -> vector<8x8xf32>
    %322 = vector.extract_strided_slice %269 {offsets = [1, 0], sizes = [1, 8], strides = [1, 1]} : vector<4x8xf32> to vector<1x8xf32>
    %323 = vector.broadcast %322 : vector<1x8xf32> to vector<8x8xf32>
    %324 = arith.addf %321, %323 : vector<8x8xf32>
    %c408 = arith.constant 408 : index
    %c0_126 = arith.constant 0 : index
    %325 = vector.load %arg3[%c408, %c0_126] : memref<656x128xbf16, #tpu.memory_space<vmem>>, vector<8x32xbf16>
    %cst_127 = arith.constant dense<0.000000e+00> : vector<8x8xf32>
    %326 = tpu.matmul %267, %325, %cst_127 {dimension_numbers = #tpu.dot_dimension_numbers<[1], [1], [0], [0], [0, 0, 1, 0], [], []>} : vector<8x32xbf16>, vector<8x32xbf16>, vector<8x8xf32> -> vector<8x8xf32>
    %327 = vector.extract_strided_slice %270 {offsets = [1, 0], sizes = [1, 8], strides = [1, 1]} : vector<4x8xf32> to vector<1x8xf32>
    %328 = vector.broadcast %327 : vector<1x8xf32> to vector<8x8xf32>
    %329 = arith.addf %326, %328 : vector<8x8xf32>
    %330 = arith.truncf %319 : vector<8x8xf32> to vector<8x8xbf16>
    %331 = arith.truncf %324 : vector<8x8xf32> to vector<8x8xbf16>
    %cst_128 = arith.constant dense<0.000000e+00> : vector<8x8xf32>
    %332 = tpu.matmul %330, %331, %cst_128 {dimension_numbers = #tpu.dot_dimension_numbers<[1], [1], [0], [0], [0, 0, 1, 0], [], []>} : vector<8x8xbf16>, vector<8x8xbf16>, vector<8x8xf32> -> vector<8x8xf32>
    %cst_129 = arith.constant 0.353553385 : f32
    %333 = vector.broadcast %cst_129 : f32 to vector<8x8xf32>
    %334 = arith.mulf %332, %333 : vector<8x8xf32>
    %335 = vector.broadcast %5 : vector<1x8xf32> to vector<8x8xf32>
    %336 = arith.addf %334, %335 : vector<8x8xf32>
    %cst_130 = arith.constant dense<0xFF800000> : vector<8xf32>
    %337 = vector.multi_reduction <maximumf>, %336, %cst_130 [1] : vector<8x8xf32> to vector<8xf32>
    %338 = vector.shape_cast %337 : vector<8xf32> to vector<8x1xf32>
    %339 = vector.broadcast %338 : vector<8x1xf32> to vector<8x8xf32>
    %340 = arith.subf %336, %339 : vector<8x8xf32>
    %341 = math.exp %340 : vector<8x8xf32>
    %cst_131 = arith.constant dense<0.000000e+00> : vector<8xf32>
    %342 = vector.multi_reduction <add>, %341, %cst_131 [1] : vector<8x8xf32> to vector<8xf32>
    %343 = vector.shape_cast %342 : vector<8xf32> to vector<8x1xf32>
    %344 = tpu.reciprocal %343 {approx = true} : vector<8x1xf32> -> vector<8x1xf32>
    %345 = vector.broadcast %344 : vector<8x1xf32> to vector<8x8xf32>
    %346 = arith.mulf %341, %345 : vector<8x8xf32>
    %347 = arith.truncf %346 : vector<8x8xf32> to vector<8x8xbf16>
    %348 = arith.truncf %329 : vector<8x8xf32> to vector<8x8xbf16>
    %cst_132 = arith.constant dense<0.000000e+00> : vector<8x8xf32>
    %349 = tpu.matmul %347, %348, %cst_132 {dimension_numbers = #tpu.dot_dimension_numbers<[1], [0], [0], [1], [0, 0, 1, 1], [], []>} : vector<8x8xbf16>, vector<8x8xbf16>, vector<8x8xf32> -> vector<8x8xf32>
    %350 = vector.extract_strided_slice %271 {offsets = [8, 0], sizes = [8, 32], strides = [1, 1]} : vector<32x32xbf16> to vector<8x32xbf16>
    %351 = arith.truncf %349 : vector<8x8xf32> to vector<8x8xbf16>
    %cst_133 = arith.constant dense<0.000000e+00> : vector<8x32xf32>
    %352 = tpu.matmul %351, %350, %cst_133 {dimension_numbers = #tpu.dot_dimension_numbers<[1], [0], [0], [1], [0, 0, 1, 1], [], []>} : vector<8x8xbf16>, vector<8x32xbf16>, vector<8x32xf32> -> vector<8x32xf32>
    %353 = arith.addf %314, %352 : vector<8x32xf32>
    %c352 = arith.constant 352 : index
    %c0_134 = arith.constant 0 : index
    %354 = vector.load %arg3[%c352, %c0_134] : memref<656x128xbf16, #tpu.memory_space<vmem>>, vector<8x32xbf16>
    %cst_135 = arith.constant dense<0.000000e+00> : vector<8x8xf32>
    %355 = tpu.matmul %267, %354, %cst_135 {dimension_numbers = #tpu.dot_dimension_numbers<[1], [1], [0], [0], [0, 0, 1, 0], [], []>} : vector<8x32xbf16>, vector<8x32xbf16>, vector<8x8xf32> -> vector<8x8xf32>
    %356 = vector.extract_strided_slice %268 {offsets = [2, 0], sizes = [1, 8], strides = [1, 1]} : vector<4x8xf32> to vector<1x8xf32>
    %357 = vector.broadcast %356 : vector<1x8xf32> to vector<8x8xf32>
    %358 = arith.addf %355, %357 : vector<8x8xf32>
    %c384 = arith.constant 384 : index
    %c0_136 = arith.constant 0 : index
    %359 = vector.load %arg3[%c384, %c0_136] : memref<656x128xbf16, #tpu.memory_space<vmem>>, vector<8x32xbf16>
    %cst_137 = arith.constant dense<0.000000e+00> : vector<8x8xf32>
    %360 = tpu.matmul %267, %359, %cst_137 {dimension_numbers = #tpu.dot_dimension_numbers<[1], [1], [0], [0], [0, 0, 1, 0], [], []>} : vector<8x32xbf16>, vector<8x32xbf16>, vector<8x8xf32> -> vector<8x8xf32>
    %361 = vector.extract_strided_slice %269 {offsets = [2, 0], sizes = [1, 8], strides = [1, 1]} : vector<4x8xf32> to vector<1x8xf32>
    %362 = vector.broadcast %361 : vector<1x8xf32> to vector<8x8xf32>
    %363 = arith.addf %360, %362 : vector<8x8xf32>
    %c416 = arith.constant 416 : index
    %c0_138 = arith.constant 0 : index
    %364 = vector.load %arg3[%c416, %c0_138] : memref<656x128xbf16, #tpu.memory_space<vmem>>, vector<8x32xbf16>
    %cst_139 = arith.constant dense<0.000000e+00> : vector<8x8xf32>
    %365 = tpu.matmul %267, %364, %cst_139 {dimension_numbers = #tpu.dot_dimension_numbers<[1], [1], [0], [0], [0, 0, 1, 0], [], []>} : vector<8x32xbf16>, vector<8x32xbf16>, vector<8x8xf32> -> vector<8x8xf32>
    %366 = vector.extract_strided_slice %270 {offsets = [2, 0], sizes = [1, 8], strides = [1, 1]} : vector<4x8xf32> to vector<1x8xf32>
    %367 = vector.broadcast %366 : vector<1x8xf32> to vector<8x8xf32>
    %368 = arith.addf %365, %367 : vector<8x8xf32>
    %369 = arith.truncf %358 : vector<8x8xf32> to vector<8x8xbf16>
    %370 = arith.truncf %363 : vector<8x8xf32> to vector<8x8xbf16>
    %cst_140 = arith.constant dense<0.000000e+00> : vector<8x8xf32>
    %371 = tpu.matmul %369, %370, %cst_140 {dimension_numbers = #tpu.dot_dimension_numbers<[1], [1], [0], [0], [0, 0, 1, 0], [], []>} : vector<8x8xbf16>, vector<8x8xbf16>, vector<8x8xf32> -> vector<8x8xf32>
    %cst_141 = arith.constant 0.353553385 : f32
    %372 = vector.broadcast %cst_141 : f32 to vector<8x8xf32>
    %373 = arith.mulf %371, %372 : vector<8x8xf32>
    %374 = vector.broadcast %5 : vector<1x8xf32> to vector<8x8xf32>
    %375 = arith.addf %373, %374 : vector<8x8xf32>
    %cst_142 = arith.constant dense<0xFF800000> : vector<8xf32>
    %376 = vector.multi_reduction <maximumf>, %375, %cst_142 [1] : vector<8x8xf32> to vector<8xf32>
    %377 = vector.shape_cast %376 : vector<8xf32> to vector<8x1xf32>
    %378 = vector.broadcast %377 : vector<8x1xf32> to vector<8x8xf32>
    %379 = arith.subf %375, %378 : vector<8x8xf32>
    %380 = math.exp %379 : vector<8x8xf32>
    %cst_143 = arith.constant dense<0.000000e+00> : vector<8xf32>
    %381 = vector.multi_reduction <add>, %380, %cst_143 [1] : vector<8x8xf32> to vector<8xf32>
    %382 = vector.shape_cast %381 : vector<8xf32> to vector<8x1xf32>
    %383 = tpu.reciprocal %382 {approx = true} : vector<8x1xf32> -> vector<8x1xf32>
    %384 = vector.broadcast %383 : vector<8x1xf32> to vector<8x8xf32>
    %385 = arith.mulf %380, %384 : vector<8x8xf32>
    %386 = arith.truncf %385 : vector<8x8xf32> to vector<8x8xbf16>
    %387 = arith.truncf %368 : vector<8x8xf32> to vector<8x8xbf16>
    %cst_144 = arith.constant dense<0.000000e+00> : vector<8x8xf32>
    %388 = tpu.matmul %386, %387, %cst_144 {dimension_numbers = #tpu.dot_dimension_numbers<[1], [0], [0], [1], [0, 0, 1, 1], [], []>} : vector<8x8xbf16>, vector<8x8xbf16>, vector<8x8xf32> -> vector<8x8xf32>
    %389 = vector.extract_strided_slice %271 {offsets = [16, 0], sizes = [8, 32], strides = [1, 1]} : vector<32x32xbf16> to vector<8x32xbf16>
    %390 = arith.truncf %388 : vector<8x8xf32> to vector<8x8xbf16>
    %cst_145 = arith.constant dense<0.000000e+00> : vector<8x32xf32>
    %391 = tpu.matmul %390, %389, %cst_145 {dimension_numbers = #tpu.dot_dimension_numbers<[1], [0], [0], [1], [0, 0, 1, 1], [], []>} : vector<8x8xbf16>, vector<8x32xbf16>, vector<8x32xf32> -> vector<8x32xf32>
    %392 = arith.addf %353, %391 : vector<8x32xf32>
    %c360 = arith.constant 360 : index
    %c0_146 = arith.constant 0 : index
    %393 = vector.load %arg3[%c360, %c0_146] : memref<656x128xbf16, #tpu.memory_space<vmem>>, vector<8x32xbf16>
    %cst_147 = arith.constant dense<0.000000e+00> : vector<8x8xf32>
    %394 = tpu.matmul %267, %393, %cst_147 {dimension_numbers = #tpu.dot_dimension_numbers<[1], [1], [0], [0], [0, 0, 1, 0], [], []>} : vector<8x32xbf16>, vector<8x32xbf16>, vector<8x8xf32> -> vector<8x8xf32>
    %395 = vector.extract_strided_slice %268 {offsets = [3, 0], sizes = [1, 8], strides = [1, 1]} : vector<4x8xf32> to vector<1x8xf32>
    %396 = vector.broadcast %395 : vector<1x8xf32> to vector<8x8xf32>
    %397 = arith.addf %394, %396 : vector<8x8xf32>
    %c392 = arith.constant 392 : index
    %c0_148 = arith.constant 0 : index
    %398 = vector.load %arg3[%c392, %c0_148] : memref<656x128xbf16, #tpu.memory_space<vmem>>, vector<8x32xbf16>
    %cst_149 = arith.constant dense<0.000000e+00> : vector<8x8xf32>
    %399 = tpu.matmul %267, %398, %cst_149 {dimension_numbers = #tpu.dot_dimension_numbers<[1], [1], [0], [0], [0, 0, 1, 0], [], []>} : vector<8x32xbf16>, vector<8x32xbf16>, vector<8x8xf32> -> vector<8x8xf32>
    %400 = vector.extract_strided_slice %269 {offsets = [3, 0], sizes = [1, 8], strides = [1, 1]} : vector<4x8xf32> to vector<1x8xf32>
    %401 = vector.broadcast %400 : vector<1x8xf32> to vector<8x8xf32>
    %402 = arith.addf %399, %401 : vector<8x8xf32>
    %c424 = arith.constant 424 : index
    %c0_150 = arith.constant 0 : index
    %403 = vector.load %arg3[%c424, %c0_150] : memref<656x128xbf16, #tpu.memory_space<vmem>>, vector<8x32xbf16>
    %cst_151 = arith.constant dense<0.000000e+00> : vector<8x8xf32>
    %404 = tpu.matmul %267, %403, %cst_151 {dimension_numbers = #tpu.dot_dimension_numbers<[1], [1], [0], [0], [0, 0, 1, 0], [], []>} : vector<8x32xbf16>, vector<8x32xbf16>, vector<8x8xf32> -> vector<8x8xf32>
    %405 = vector.extract_strided_slice %270 {offsets = [3, 0], sizes = [1, 8], strides = [1, 1]} : vector<4x8xf32> to vector<1x8xf32>
    %406 = vector.broadcast %405 : vector<1x8xf32> to vector<8x8xf32>
    %407 = arith.addf %404, %406 : vector<8x8xf32>
    %408 = arith.truncf %397 : vector<8x8xf32> to vector<8x8xbf16>
    %409 = arith.truncf %402 : vector<8x8xf32> to vector<8x8xbf16>
    %cst_152 = arith.constant dense<0.000000e+00> : vector<8x8xf32>
    %410 = tpu.matmul %408, %409, %cst_152 {dimension_numbers = #tpu.dot_dimension_numbers<[1], [1], [0], [0], [0, 0, 1, 0], [], []>} : vector<8x8xbf16>, vector<8x8xbf16>, vector<8x8xf32> -> vector<8x8xf32>
    %cst_153 = arith.constant 0.353553385 : f32
    %411 = vector.broadcast %cst_153 : f32 to vector<8x8xf32>
    %412 = arith.mulf %410, %411 : vector<8x8xf32>
    %413 = vector.broadcast %5 : vector<1x8xf32> to vector<8x8xf32>
    %414 = arith.addf %412, %413 : vector<8x8xf32>
    %cst_154 = arith.constant dense<0xFF800000> : vector<8xf32>
    %415 = vector.multi_reduction <maximumf>, %414, %cst_154 [1] : vector<8x8xf32> to vector<8xf32>
    %416 = vector.shape_cast %415 : vector<8xf32> to vector<8x1xf32>
    %417 = vector.broadcast %416 : vector<8x1xf32> to vector<8x8xf32>
    %418 = arith.subf %414, %417 : vector<8x8xf32>
    %419 = math.exp %418 : vector<8x8xf32>
    %cst_155 = arith.constant dense<0.000000e+00> : vector<8xf32>
    %420 = vector.multi_reduction <add>, %419, %cst_155 [1] : vector<8x8xf32> to vector<8xf32>
    %421 = vector.shape_cast %420 : vector<8xf32> to vector<8x1xf32>
    %422 = tpu.reciprocal %421 {approx = true} : vector<8x1xf32> -> vector<8x1xf32>
    %423 = vector.broadcast %422 : vector<8x1xf32> to vector<8x8xf32>
    %424 = arith.mulf %419, %423 : vector<8x8xf32>
    %425 = arith.truncf %424 : vector<8x8xf32> to vector<8x8xbf16>
    %426 = arith.truncf %407 : vector<8x8xf32> to vector<8x8xbf16>
    %cst_156 = arith.constant dense<0.000000e+00> : vector<8x8xf32>
    %427 = tpu.matmul %425, %426, %cst_156 {dimension_numbers = #tpu.dot_dimension_numbers<[1], [0], [0], [1], [0, 0, 1, 1], [], []>} : vector<8x8xbf16>, vector<8x8xbf16>, vector<8x8xf32> -> vector<8x8xf32>
    %428 = vector.extract_strided_slice %271 {offsets = [24, 0], sizes = [8, 32], strides = [1, 1]} : vector<32x32xbf16> to vector<8x32xbf16>
    %429 = arith.truncf %427 : vector<8x8xf32> to vector<8x8xbf16>
    %cst_157 = arith.constant dense<0.000000e+00> : vector<8x32xf32>
    %430 = tpu.matmul %429, %428, %cst_157 {dimension_numbers = #tpu.dot_dimension_numbers<[1], [0], [0], [1], [0, 0, 1, 1], [], []>} : vector<8x8xbf16>, vector<8x32xbf16>, vector<8x32xf32> -> vector<8x32xf32>
    %431 = arith.addf %392, %430 : vector<8x32xf32>
    %432 = arith.addf %244, %431 : vector<8x32xf32>
    %c128_158 = arith.constant 128 : index
    %c0_159 = arith.constant 0 : index
    %433 = vector.load %arg4[%c128_158, %c0_159] : memref<184x128xf32, #tpu.memory_space<vmem>>, vector<1x32xf32>
    %c136_160 = arith.constant 136 : index
    %c0_161 = arith.constant 0 : index
    %434 = vector.load %arg4[%c136_160, %c0_161] : memref<184x128xf32, #tpu.memory_space<vmem>>, vector<1x32xf32>
    %cst_162 = arith.constant dense<0.000000e+00> : vector<8xf32>
    %435 = vector.multi_reduction <add>, %432, %cst_162 [1] : vector<8x32xf32> to vector<8xf32>
    %436 = vector.shape_cast %435 : vector<8xf32> to vector<8x1xf32>
    %cst_163 = arith.constant 3.200000e+01 : f32
    %437 = vector.broadcast %cst_163 : f32 to vector<8x1xf32>
    %438 = arith.divf %436, %437 : vector<8x1xf32>
    %439 = vector.broadcast %438 : vector<8x1xf32> to vector<8x32xf32>
    %440 = arith.subf %432, %439 : vector<8x32xf32>
    %441 = arith.mulf %440, %440 : vector<8x32xf32>
    %cst_164 = arith.constant dense<0.000000e+00> : vector<8xf32>
    %442 = vector.multi_reduction <add>, %441, %cst_164 [1] : vector<8x32xf32> to vector<8xf32>
    %443 = vector.shape_cast %442 : vector<8xf32> to vector<8x1xf32>
    %cst_165 = arith.constant 3.200000e+01 : f32
    %444 = vector.broadcast %cst_165 : f32 to vector<8x1xf32>
    %445 = arith.divf %443, %444 : vector<8x1xf32>
    %cst_166 = arith.constant 9.99999997E-7 : f32
    %446 = vector.broadcast %cst_166 : f32 to vector<8x1xf32>
    %447 = arith.addf %445, %446 : vector<8x1xf32>
    %448 = math.rsqrt %447 : vector<8x1xf32>
    %449 = vector.broadcast %448 : vector<8x1xf32> to vector<8x32xf32>
    %450 = arith.mulf %440, %449 : vector<8x32xf32>
    %451 = vector.broadcast %433 : vector<1x32xf32> to vector<8x32xf32>
    %452 = arith.mulf %450, %451 : vector<8x32xf32>
    %453 = vector.broadcast %434 : vector<1x32xf32> to vector<8x32xf32>
    %454 = arith.addf %452, %453 : vector<8x32xf32>
    %455 = arith.truncf %454 : vector<8x32xf32> to vector<8x32xbf16>
    %c464 = arith.constant 464 : index
    %c0_167 = arith.constant 0 : index
    %456 = vector.load %arg3[%c464, %c0_167] : memref<656x128xbf16, #tpu.memory_space<vmem>>, vector<32x128xbf16>
    %cst_168 = arith.constant dense<0.000000e+00> : vector<8x128xf32>
    %457 = tpu.matmul %455, %456, %cst_168 {dimension_numbers = #tpu.dot_dimension_numbers<[1], [0], [0], [1], [0, 0, 1, 1], [], []>} : vector<8x32xbf16>, vector<32x128xbf16>, vector<8x128xf32> -> vector<8x128xf32>
    %c144_169 = arith.constant 144 : index
    %c0_170 = arith.constant 0 : index
    %458 = vector.load %arg4[%c144_169, %c0_170] : memref<184x128xf32, #tpu.memory_space<vmem>>, vector<1x128xf32>
    %459 = vector.broadcast %458 : vector<1x128xf32> to vector<8x128xf32>
    %460 = arith.addf %457, %459 : vector<8x128xf32>
    %cst_171 = arith.constant 5.000000e-01 : f32
    %461 = vector.broadcast %cst_171 : f32 to vector<8x128xf32>
    %462 = arith.mulf %461, %460 : vector<8x128xf32>
    %cst_172 = arith.constant 0.707106769 : f32
    %463 = vector.broadcast %cst_172 : f32 to vector<8x128xf32>
    %464 = arith.mulf %460, %463 : vector<8x128xf32>
    %465 = math.erf %464 : vector<8x128xf32>
    %cst_173 = arith.constant 1.000000e+00 : f32
    %466 = vector.broadcast %cst_173 : f32 to vector<8x128xf32>
    %467 = arith.addf %466, %465 : vector<8x128xf32>
    %468 = arith.mulf %462, %467 : vector<8x128xf32>
    %c496 = arith.constant 496 : index
    %c0_174 = arith.constant 0 : index
    %469 = vector.load %arg3[%c496, %c0_174] : memref<656x128xbf16, #tpu.memory_space<vmem>>, vector<128x32xbf16>
    %470 = arith.truncf %468 : vector<8x128xf32> to vector<8x128xbf16>
    %cst_175 = arith.constant dense<0.000000e+00> : vector<8x32xf32>
    %471 = tpu.matmul %470, %469, %cst_175 {dimension_numbers = #tpu.dot_dimension_numbers<[1], [0], [0], [1], [0, 0, 1, 1], [], []>} : vector<8x128xbf16>, vector<128x32xbf16>, vector<8x32xf32> -> vector<8x32xf32>
    %472 = arith.addf %432, %471 : vector<8x32xf32>
    %c152 = arith.constant 152 : index
    %c0_176 = arith.constant 0 : index
    %473 = vector.load %arg4[%c152, %c0_176] : memref<184x128xf32, #tpu.memory_space<vmem>>, vector<1x32xf32>
    %474 = vector.broadcast %473 : vector<1x32xf32> to vector<8x32xf32>
    %475 = arith.addf %472, %474 : vector<8x32xf32>
    %c160 = arith.constant 160 : index
    %c0_177 = arith.constant 0 : index
    %476 = vector.load %arg4[%c160, %c0_177] : memref<184x128xf32, #tpu.memory_space<vmem>>, vector<1x32xf32>
    %c168 = arith.constant 168 : index
    %c0_178 = arith.constant 0 : index
    %477 = vector.load %arg4[%c168, %c0_178] : memref<184x128xf32, #tpu.memory_space<vmem>>, vector<1x32xf32>
    %cst_179 = arith.constant dense<0.000000e+00> : vector<8xf32>
    %478 = vector.multi_reduction <add>, %475, %cst_179 [1] : vector<8x32xf32> to vector<8xf32>
    %479 = vector.shape_cast %478 : vector<8xf32> to vector<8x1xf32>
    %cst_180 = arith.constant 3.200000e+01 : f32
    %480 = vector.broadcast %cst_180 : f32 to vector<8x1xf32>
    %481 = arith.divf %479, %480 : vector<8x1xf32>
    %482 = vector.broadcast %481 : vector<8x1xf32> to vector<8x32xf32>
    %483 = arith.subf %475, %482 : vector<8x32xf32>
    %484 = arith.mulf %483, %483 : vector<8x32xf32>
    %cst_181 = arith.constant dense<0.000000e+00> : vector<8xf32>
    %485 = vector.multi_reduction <add>, %484, %cst_181 [1] : vector<8x32xf32> to vector<8xf32>
    %486 = vector.shape_cast %485 : vector<8xf32> to vector<8x1xf32>
    %cst_182 = arith.constant 3.200000e+01 : f32
    %487 = vector.broadcast %cst_182 : f32 to vector<8x1xf32>
    %488 = arith.divf %486, %487 : vector<8x1xf32>
    %cst_183 = arith.constant 9.99999997E-7 : f32
    %489 = vector.broadcast %cst_183 : f32 to vector<8x1xf32>
    %490 = arith.addf %488, %489 : vector<8x1xf32>
    %491 = math.rsqrt %490 : vector<8x1xf32>
    %492 = vector.broadcast %491 : vector<8x1xf32> to vector<8x32xf32>
    %493 = arith.mulf %483, %492 : vector<8x32xf32>
    %494 = vector.broadcast %476 : vector<1x32xf32> to vector<8x32xf32>
    %495 = arith.mulf %493, %494 : vector<8x32xf32>
    %496 = vector.broadcast %477 : vector<1x32xf32> to vector<8x32xf32>
    %497 = arith.addf %495, %496 : vector<8x32xf32>
    %c624 = arith.constant 624 : index
    %c0_184 = arith.constant 0 : index
    %498 = vector.load %arg3[%c624, %c0_184] : memref<656x128xbf16, #tpu.memory_space<vmem>>, vector<32x128xbf16>
    %499 = arith.truncf %497 : vector<8x32xf32> to vector<8x32xbf16>
    %cst_185 = arith.constant dense<0.000000e+00> : vector<8x128xf32>
    %500 = tpu.matmul %499, %498, %cst_185 {dimension_numbers = #tpu.dot_dimension_numbers<[1], [0], [0], [1], [0, 0, 1, 1], [], []>} : vector<8x32xbf16>, vector<32x128xbf16>, vector<8x128xf32> -> vector<8x128xf32>
    %c176_186 = arith.constant 176 : index
    %c0_187 = arith.constant 0 : index
    %501 = vector.load %arg4[%c176_186, %c0_187] : memref<184x128xf32, #tpu.memory_space<vmem>>, vector<1x128xf32>
    %502 = vector.broadcast %501 : vector<1x128xf32> to vector<8x128xf32>
    %503 = arith.addf %500, %502 : vector<8x128xf32>
    %c0_188 = arith.constant 0 : index
    %c0_189 = arith.constant 0 : index
    %c0_190 = arith.constant 0 : index
    %504 = vector.load %arg5[%c0_188, %c0_189, %c0_190] : memref<1x8x128xf32, #tpu.memory_space<vmem>>, vector<1x8x128xf32>
    %505 = vector.shape_cast %504 : vector<1x8x128xf32> to vector<8x128xf32>
    %506 = vector.shape_cast %503 : vector<8x128xf32> to vector<1x8x128xf32>
    tpu.vector_store %arg5[%c0_188, %c0_189, %c0_190], %506 {strides = array<i32>} : memref<1x8x128xf32, #tpu.memory_space<vmem>>, vector<1x8x128xf32>,
    return
  }
  func.func @transform_0(%arg0: i32) -> (i32, i32, i32) {
    %c0_i32 = arith.constant 0 : i32
    %c0_i32_0 = arith.constant 0 : i32
    %c0_i32_1 = arith.constant 0 : i32
    return %arg0, %c0_i32, %c0_i32_0 : i32, i32, i32
  }
  func.func @transform_1(%arg0: i32) -> (i32, i32, i32) {
    %c0_i32 = arith.constant 0 : i32
    %c0_i32_0 = arith.constant 0 : i32
    %c0_i32_1 = arith.constant 0 : i32
    return %arg0, %c0_i32, %c0_i32_0 : i32, i32, i32
  }
  func.func @transform_2(%arg0: i32) -> (i32, i32) {
    %c0_i32 = arith.constant 0 : i32
    %c0_i32_0 = arith.constant 0 : i32
    %c0_i32_1 = arith.constant 0 : i32
    return %c0_i32, %c0_i32_0 : i32, i32
  }
  func.func @transform_3(%arg0: i32) -> (i32, i32) {
    %c0_i32 = arith.constant 0 : i32
    %c0_i32_0 = arith.constant 0 : i32
    %c0_i32_1 = arith.constant 0 : i32
    return %c0_i32, %c0_i32_0 : i32, i32
  }
  func.func @transform_4(%arg0: i32) -> (i32, i32, i32) {
    %c0_i32 = arith.constant 0 : i32
    %c0_i32_0 = arith.constant 0 : i32
    %c0_i32_1 = arith.constant 0 : i32
    return %arg0, %c0_i32, %c0_i32_0 : i32, i32, i32
  }
}

module attributes {stable_mosaic.version = 11 : i64} {
  func.func @_decoder_kernel(%arg0: i32, %arg1: memref<1x24x32xf32, #tpu.memory_space<vmem>>, %arg2: memref<320x128xbf16, #tpu.memory_space<vmem>>, %arg3: memref<104x128xf32, #tpu.memory_space<vmem>>, %arg4: memref<1x24x128xf32, #tpu.memory_space<vmem>>, %arg5: memref<1x24x1xf32, #tpu.memory_space<vmem>>, %arg6: memref<1x24x128xf32, #tpu.memory_space<vmem>>, %arg7: memref<1x1x128xf32, #tpu.memory_space<vmem>>) attributes {dimension_semantics = [#tpu.dimension_semantics<parallel>], iteration_bounds = array<i64: 2>, scalar_prefetch = 0 : i64, scratch_operands = 0 : i64, tpu.core_type = #tpu.core_type<tc>, window_params = [{transform_indices = @transform_0, window_bounds = array<i64: 1, 24, 32>}, {pipeline_mode = #tpu.pipeline_mode<synchronous>, transform_indices = @transform_1, window_bounds = array<i64: 320, 128>}, {pipeline_mode = #tpu.pipeline_mode<synchronous>, transform_indices = @transform_2, window_bounds = array<i64: 104, 128>}, {transform_indices = @transform_3, window_bounds = array<i64: 1, 24, 128>}, {transform_indices = @transform_4, window_bounds = array<i64: 1, 24, 1>}, {transform_indices = @transform_5, window_bounds = array<i64: 1, 24, 128>}, {transform_indices = @transform_6, window_bounds = array<i64: 1, 1, 128>}]} {
    %0 = tpu.iota {dimensions = array<i32: 1>} : vector<1x24xi32>
    %c17_i32 = arith.constant 17 : i32
    %1 = vector.broadcast %c17_i32 : i32 to vector<1x24xi32>
    %2 = arith.cmpi slt, %0, %1 : vector<1x24xi32>
    %cst = arith.constant 0.000000e+00 : f32
    %cst_0 = arith.constant -1.000000e+30 : f32
    %3 = vector.broadcast %cst : f32 to vector<1x24xf32>
    %4 = vector.broadcast %cst_0 : f32 to vector<1x24xf32>
    %5 = arith.select %2, %3, %4 : vector<1x24xi1>, vector<1x24xf32>
    %c0 = arith.constant 0 : index
    %c0_1 = arith.constant 0 : index
    %c0_2 = arith.constant 0 : index
    %6 = vector.load %arg1[%c0, %c0_1, %c0_2] : memref<1x24x32xf32, #tpu.memory_space<vmem>>, vector<1x24x32xf32>
    %7 = vector.shape_cast %6 : vector<1x24x32xf32> to vector<24x32xf32>
    %c0_3 = arith.constant 0 : index
    %c0_4 = arith.constant 0 : index
    %8 = vector.load %arg3[%c0_3, %c0_4] : memref<104x128xf32, #tpu.memory_space<vmem>>, vector<1x32xf32>
    %c8 = arith.constant 8 : index
    %c0_5 = arith.constant 0 : index
    %9 = vector.load %arg3[%c8, %c0_5] : memref<104x128xf32, #tpu.memory_space<vmem>>, vector<1x32xf32>
    %cst_6 = arith.constant dense<0.000000e+00> : vector<24xf32>
    %10 = vector.multi_reduction <add>, %7, %cst_6 [1] : vector<24x32xf32> to vector<24xf32>
    %11 = vector.shape_cast %10 : vector<24xf32> to vector<24x1xf32>
    %cst_7 = arith.constant 3.200000e+01 : f32
    %12 = vector.broadcast %cst_7 : f32 to vector<24x1xf32>
    %13 = arith.divf %11, %12 : vector<24x1xf32>
    %14 = vector.broadcast %13 : vector<24x1xf32> to vector<24x32xf32>
    %15 = arith.subf %7, %14 : vector<24x32xf32>
    %16 = arith.mulf %15, %15 : vector<24x32xf32>
    %cst_8 = arith.constant dense<0.000000e+00> : vector<24xf32>
    %17 = vector.multi_reduction <add>, %16, %cst_8 [1] : vector<24x32xf32> to vector<24xf32>
    %18 = vector.shape_cast %17 : vector<24xf32> to vector<24x1xf32>
    %cst_9 = arith.constant 3.200000e+01 : f32
    %19 = vector.broadcast %cst_9 : f32 to vector<24x1xf32>
    %20 = arith.divf %18, %19 : vector<24x1xf32>
    %cst_10 = arith.constant 9.99999997E-7 : f32
    %21 = vector.broadcast %cst_10 : f32 to vector<24x1xf32>
    %22 = arith.addf %20, %21 : vector<24x1xf32>
    %23 = math.rsqrt %22 : vector<24x1xf32>
    %24 = vector.broadcast %23 : vector<24x1xf32> to vector<24x32xf32>
    %25 = arith.mulf %15, %24 : vector<24x32xf32>
    %26 = vector.broadcast %8 : vector<1x32xf32> to vector<24x32xf32>
    %27 = arith.mulf %25, %26 : vector<24x32xf32>
    %28 = vector.broadcast %9 : vector<1x32xf32> to vector<24x32xf32>
    %29 = arith.addf %27, %28 : vector<24x32xf32>
    %30 = arith.truncf %29 : vector<24x32xf32> to vector<24x32xbf16>
    %c16 = arith.constant 16 : index
    %c0_11 = arith.constant 0 : index
    %31 = vector.load %arg3[%c16, %c0_11] : memref<104x128xf32, #tpu.memory_space<vmem>>, vector<4x8xf32>
    %c24 = arith.constant 24 : index
    %c0_12 = arith.constant 0 : index
    %32 = vector.load %arg3[%c24, %c0_12] : memref<104x128xf32, #tpu.memory_space<vmem>>, vector<4x8xf32>
    %c32 = arith.constant 32 : index
    %c0_13 = arith.constant 0 : index
    %33 = vector.load %arg3[%c32, %c0_13] : memref<104x128xf32, #tpu.memory_space<vmem>>, vector<4x8xf32>
    %c96 = arith.constant 96 : index
    %c0_14 = arith.constant 0 : index
    %34 = vector.load %arg2[%c96, %c0_14] : memref<320x128xbf16, #tpu.memory_space<vmem>>, vector<32x32xbf16>
    %cst_15 = arith.constant 0.000000e+00 : f32
    %35 = vector.broadcast %cst_15 : f32 to vector<24x32xf32>
    %c40 = arith.constant 40 : index
    %c0_16 = arith.constant 0 : index
    %36 = vector.load %arg3[%c40, %c0_16] : memref<104x128xf32, #tpu.memory_space<vmem>>, vector<1x32xf32>
    %37 = vector.broadcast %36 : vector<1x32xf32> to vector<24x32xf32>
    %38 = arith.addf %35, %37 : vector<24x32xf32>
    %c0_17 = arith.constant 0 : index
    %c0_18 = arith.constant 0 : index
    %39 = vector.load %arg2[%c0_17, %c0_18] : memref<320x128xbf16, #tpu.memory_space<vmem>>, vector<8x32xbf16>
    %cst_19 = arith.constant dense<0.000000e+00> : vector<24x8xf32>
    %40 = tpu.matmul %30, %39, %cst_19 {dimension_numbers = #tpu.dot_dimension_numbers<[1], [1], [0], [0], [0, 0, 1, 0], [], []>} : vector<24x32xbf16>, vector<8x32xbf16>, vector<24x8xf32> -> vector<24x8xf32>
    %41 = vector.extract_strided_slice %31 {offsets = [0, 0], sizes = [1, 8], strides = [1, 1]} : vector<4x8xf32> to vector<1x8xf32>
    %42 = vector.broadcast %41 : vector<1x8xf32> to vector<24x8xf32>
    %43 = arith.addf %40, %42 : vector<24x8xf32>
    %c32_20 = arith.constant 32 : index
    %c0_21 = arith.constant 0 : index
    %44 = vector.load %arg2[%c32_20, %c0_21] : memref<320x128xbf16, #tpu.memory_space<vmem>>, vector<8x32xbf16>
    %cst_22 = arith.constant dense<0.000000e+00> : vector<24x8xf32>
    %45 = tpu.matmul %30, %44, %cst_22 {dimension_numbers = #tpu.dot_dimension_numbers<[1], [1], [0], [0], [0, 0, 1, 0], [], []>} : vector<24x32xbf16>, vector<8x32xbf16>, vector<24x8xf32> -> vector<24x8xf32>
    %46 = vector.extract_strided_slice %32 {offsets = [0, 0], sizes = [1, 8], strides = [1, 1]} : vector<4x8xf32> to vector<1x8xf32>
    %47 = vector.broadcast %46 : vector<1x8xf32> to vector<24x8xf32>
    %48 = arith.addf %45, %47 : vector<24x8xf32>
    %c64 = arith.constant 64 : index
    %c0_23 = arith.constant 0 : index
    %49 = vector.load %arg2[%c64, %c0_23] : memref<320x128xbf16, #tpu.memory_space<vmem>>, vector<8x32xbf16>
    %cst_24 = arith.constant dense<0.000000e+00> : vector<24x8xf32>
    %50 = tpu.matmul %30, %49, %cst_24 {dimension_numbers = #tpu.dot_dimension_numbers<[1], [1], [0], [0], [0, 0, 1, 0], [], []>} : vector<24x32xbf16>, vector<8x32xbf16>, vector<24x8xf32> -> vector<24x8xf32>
    %51 = vector.extract_strided_slice %33 {offsets = [0, 0], sizes = [1, 8], strides = [1, 1]} : vector<4x8xf32> to vector<1x8xf32>
    %52 = vector.broadcast %51 : vector<1x8xf32> to vector<24x8xf32>
    %53 = arith.addf %50, %52 : vector<24x8xf32>
    %54 = arith.truncf %43 : vector<24x8xf32> to vector<24x8xbf16>
    %55 = arith.truncf %48 : vector<24x8xf32> to vector<24x8xbf16>
    %cst_25 = arith.constant dense<0.000000e+00> : vector<24x24xf32>
    %56 = tpu.matmul %54, %55, %cst_25 {dimension_numbers = #tpu.dot_dimension_numbers<[1], [1], [0], [0], [0, 0, 1, 0], [], []>} : vector<24x8xbf16>, vector<24x8xbf16>, vector<24x24xf32> -> vector<24x24xf32>
    %cst_26 = arith.constant 0.353553385 : f32
    %57 = vector.broadcast %cst_26 : f32 to vector<24x24xf32>
    %58 = arith.mulf %56, %57 : vector<24x24xf32>
    %59 = vector.broadcast %5 : vector<1x24xf32> to vector<24x24xf32>
    %60 = arith.addf %58, %59 : vector<24x24xf32>
    %cst_27 = arith.constant dense<0xFF800000> : vector<24xf32>
    %61 = vector.multi_reduction <maximumf>, %60, %cst_27 [1] : vector<24x24xf32> to vector<24xf32>
    %62 = vector.shape_cast %61 : vector<24xf32> to vector<24x1xf32>
    %63 = vector.broadcast %62 : vector<24x1xf32> to vector<24x24xf32>
    %64 = arith.subf %60, %63 : vector<24x24xf32>
    %65 = math.exp %64 : vector<24x24xf32>
    %cst_28 = arith.constant dense<0.000000e+00> : vector<24xf32>
    %66 = vector.multi_reduction <add>, %65, %cst_28 [1] : vector<24x24xf32> to vector<24xf32>
    %67 = vector.shape_cast %66 : vector<24xf32> to vector<24x1xf32>
    %68 = tpu.reciprocal %67 {approx = true} : vector<24x1xf32> -> vector<24x1xf32>
    %69 = vector.broadcast %68 : vector<24x1xf32> to vector<24x24xf32>
    %70 = arith.mulf %65, %69 : vector<24x24xf32>
    %71 = arith.truncf %70 : vector<24x24xf32> to vector<24x24xbf16>
    %72 = arith.truncf %53 : vector<24x8xf32> to vector<24x8xbf16>
    %cst_29 = arith.constant dense<0.000000e+00> : vector<24x8xf32>
    %73 = tpu.matmul %71, %72, %cst_29 {dimension_numbers = #tpu.dot_dimension_numbers<[1], [0], [0], [1], [0, 0, 1, 1], [], []>} : vector<24x24xbf16>, vector<24x8xbf16>, vector<24x8xf32> -> vector<24x8xf32>
    %74 = vector.extract_strided_slice %34 {offsets = [0, 0], sizes = [8, 32], strides = [1, 1]} : vector<32x32xbf16> to vector<8x32xbf16>
    %75 = arith.truncf %73 : vector<24x8xf32> to vector<24x8xbf16>
    %cst_30 = arith.constant dense<0.000000e+00> : vector<24x32xf32>
    %76 = tpu.matmul %75, %74, %cst_30 {dimension_numbers = #tpu.dot_dimension_numbers<[1], [0], [0], [1], [0, 0, 1, 1], [], []>} : vector<24x8xbf16>, vector<8x32xbf16>, vector<24x32xf32> -> vector<24x32xf32>
    %77 = arith.addf %38, %76 : vector<24x32xf32>
    %c8_31 = arith.constant 8 : index
    %c0_32 = arith.constant 0 : index
    %78 = vector.load %arg2[%c8_31, %c0_32] : memref<320x128xbf16, #tpu.memory_space<vmem>>, vector<8x32xbf16>
    %cst_33 = arith.constant dense<0.000000e+00> : vector<24x8xf32>
    %79 = tpu.matmul %30, %78, %cst_33 {dimension_numbers = #tpu.dot_dimension_numbers<[1], [1], [0], [0], [0, 0, 1, 0], [], []>} : vector<24x32xbf16>, vector<8x32xbf16>, vector<24x8xf32> -> vector<24x8xf32>
    %80 = vector.extract_strided_slice %31 {offsets = [1, 0], sizes = [1, 8], strides = [1, 1]} : vector<4x8xf32> to vector<1x8xf32>
    %81 = vector.broadcast %80 : vector<1x8xf32> to vector<24x8xf32>
    %82 = arith.addf %79, %81 : vector<24x8xf32>
    %c40_34 = arith.constant 40 : index
    %c0_35 = arith.constant 0 : index
    %83 = vector.load %arg2[%c40_34, %c0_35] : memref<320x128xbf16, #tpu.memory_space<vmem>>, vector<8x32xbf16>
    %cst_36 = arith.constant dense<0.000000e+00> : vector<24x8xf32>
    %84 = tpu.matmul %30, %83, %cst_36 {dimension_numbers = #tpu.dot_dimension_numbers<[1], [1], [0], [0], [0, 0, 1, 0], [], []>} : vector<24x32xbf16>, vector<8x32xbf16>, vector<24x8xf32> -> vector<24x8xf32>
    %85 = vector.extract_strided_slice %32 {offsets = [1, 0], sizes = [1, 8], strides = [1, 1]} : vector<4x8xf32> to vector<1x8xf32>
    %86 = vector.broadcast %85 : vector<1x8xf32> to vector<24x8xf32>
    %87 = arith.addf %84, %86 : vector<24x8xf32>
    %c72 = arith.constant 72 : index
    %c0_37 = arith.constant 0 : index
    %88 = vector.load %arg2[%c72, %c0_37] : memref<320x128xbf16, #tpu.memory_space<vmem>>, vector<8x32xbf16>
    %cst_38 = arith.constant dense<0.000000e+00> : vector<24x8xf32>
    %89 = tpu.matmul %30, %88, %cst_38 {dimension_numbers = #tpu.dot_dimension_numbers<[1], [1], [0], [0], [0, 0, 1, 0], [], []>} : vector<24x32xbf16>, vector<8x32xbf16>, vector<24x8xf32> -> vector<24x8xf32>
    %90 = vector.extract_strided_slice %33 {offsets = [1, 0], sizes = [1, 8], strides = [1, 1]} : vector<4x8xf32> to vector<1x8xf32>
    %91 = vector.broadcast %90 : vector<1x8xf32> to vector<24x8xf32>
    %92 = arith.addf %89, %91 : vector<24x8xf32>
    %93 = arith.truncf %82 : vector<24x8xf32> to vector<24x8xbf16>
    %94 = arith.truncf %87 : vector<24x8xf32> to vector<24x8xbf16>
    %cst_39 = arith.constant dense<0.000000e+00> : vector<24x24xf32>
    %95 = tpu.matmul %93, %94, %cst_39 {dimension_numbers = #tpu.dot_dimension_numbers<[1], [1], [0], [0], [0, 0, 1, 0], [], []>} : vector<24x8xbf16>, vector<24x8xbf16>, vector<24x24xf32> -> vector<24x24xf32>
    %cst_40 = arith.constant 0.353553385 : f32
    %96 = vector.broadcast %cst_40 : f32 to vector<24x24xf32>
    %97 = arith.mulf %95, %96 : vector<24x24xf32>
    %98 = vector.broadcast %5 : vector<1x24xf32> to vector<24x24xf32>
    %99 = arith.addf %97, %98 : vector<24x24xf32>
    %cst_41 = arith.constant dense<0xFF800000> : vector<24xf32>
    %100 = vector.multi_reduction <maximumf>, %99, %cst_41 [1] : vector<24x24xf32> to vector<24xf32>
    %101 = vector.shape_cast %100 : vector<24xf32> to vector<24x1xf32>
    %102 = vector.broadcast %101 : vector<24x1xf32> to vector<24x24xf32>
    %103 = arith.subf %99, %102 : vector<24x24xf32>
    %104 = math.exp %103 : vector<24x24xf32>
    %cst_42 = arith.constant dense<0.000000e+00> : vector<24xf32>
    %105 = vector.multi_reduction <add>, %104, %cst_42 [1] : vector<24x24xf32> to vector<24xf32>
    %106 = vector.shape_cast %105 : vector<24xf32> to vector<24x1xf32>
    %107 = tpu.reciprocal %106 {approx = true} : vector<24x1xf32> -> vector<24x1xf32>
    %108 = vector.broadcast %107 : vector<24x1xf32> to vector<24x24xf32>
    %109 = arith.mulf %104, %108 : vector<24x24xf32>
    %110 = arith.truncf %109 : vector<24x24xf32> to vector<24x24xbf16>
    %111 = arith.truncf %92 : vector<24x8xf32> to vector<24x8xbf16>
    %cst_43 = arith.constant dense<0.000000e+00> : vector<24x8xf32>
    %112 = tpu.matmul %110, %111, %cst_43 {dimension_numbers = #tpu.dot_dimension_numbers<[1], [0], [0], [1], [0, 0, 1, 1], [], []>} : vector<24x24xbf16>, vector<24x8xbf16>, vector<24x8xf32> -> vector<24x8xf32>
    %113 = vector.extract_strided_slice %34 {offsets = [8, 0], sizes = [8, 32], strides = [1, 1]} : vector<32x32xbf16> to vector<8x32xbf16>
    %114 = arith.truncf %112 : vector<24x8xf32> to vector<24x8xbf16>
    %cst_44 = arith.constant dense<0.000000e+00> : vector<24x32xf32>
    %115 = tpu.matmul %114, %113, %cst_44 {dimension_numbers = #tpu.dot_dimension_numbers<[1], [0], [0], [1], [0, 0, 1, 1], [], []>} : vector<24x8xbf16>, vector<8x32xbf16>, vector<24x32xf32> -> vector<24x32xf32>
    %116 = arith.addf %77, %115 : vector<24x32xf32>
    %c16_45 = arith.constant 16 : index
    %c0_46 = arith.constant 0 : index
    %117 = vector.load %arg2[%c16_45, %c0_46] : memref<320x128xbf16, #tpu.memory_space<vmem>>, vector<8x32xbf16>
    %cst_47 = arith.constant dense<0.000000e+00> : vector<24x8xf32>
    %118 = tpu.matmul %30, %117, %cst_47 {dimension_numbers = #tpu.dot_dimension_numbers<[1], [1], [0], [0], [0, 0, 1, 0], [], []>} : vector<24x32xbf16>, vector<8x32xbf16>, vector<24x8xf32> -> vector<24x8xf32>
    %119 = vector.extract_strided_slice %31 {offsets = [2, 0], sizes = [1, 8], strides = [1, 1]} : vector<4x8xf32> to vector<1x8xf32>
    %120 = vector.broadcast %119 : vector<1x8xf32> to vector<24x8xf32>
    %121 = arith.addf %118, %120 : vector<24x8xf32>
    %c48 = arith.constant 48 : index
    %c0_48 = arith.constant 0 : index
    %122 = vector.load %arg2[%c48, %c0_48] : memref<320x128xbf16, #tpu.memory_space<vmem>>, vector<8x32xbf16>
    %cst_49 = arith.constant dense<0.000000e+00> : vector<24x8xf32>
    %123 = tpu.matmul %30, %122, %cst_49 {dimension_numbers = #tpu.dot_dimension_numbers<[1], [1], [0], [0], [0, 0, 1, 0], [], []>} : vector<24x32xbf16>, vector<8x32xbf16>, vector<24x8xf32> -> vector<24x8xf32>
    %124 = vector.extract_strided_slice %32 {offsets = [2, 0], sizes = [1, 8], strides = [1, 1]} : vector<4x8xf32> to vector<1x8xf32>
    %125 = vector.broadcast %124 : vector<1x8xf32> to vector<24x8xf32>
    %126 = arith.addf %123, %125 : vector<24x8xf32>
    %c80 = arith.constant 80 : index
    %c0_50 = arith.constant 0 : index
    %127 = vector.load %arg2[%c80, %c0_50] : memref<320x128xbf16, #tpu.memory_space<vmem>>, vector<8x32xbf16>
    %cst_51 = arith.constant dense<0.000000e+00> : vector<24x8xf32>
    %128 = tpu.matmul %30, %127, %cst_51 {dimension_numbers = #tpu.dot_dimension_numbers<[1], [1], [0], [0], [0, 0, 1, 0], [], []>} : vector<24x32xbf16>, vector<8x32xbf16>, vector<24x8xf32> -> vector<24x8xf32>
    %129 = vector.extract_strided_slice %33 {offsets = [2, 0], sizes = [1, 8], strides = [1, 1]} : vector<4x8xf32> to vector<1x8xf32>
    %130 = vector.broadcast %129 : vector<1x8xf32> to vector<24x8xf32>
    %131 = arith.addf %128, %130 : vector<24x8xf32>
    %132 = arith.truncf %121 : vector<24x8xf32> to vector<24x8xbf16>
    %133 = arith.truncf %126 : vector<24x8xf32> to vector<24x8xbf16>
    %cst_52 = arith.constant dense<0.000000e+00> : vector<24x24xf32>
    %134 = tpu.matmul %132, %133, %cst_52 {dimension_numbers = #tpu.dot_dimension_numbers<[1], [1], [0], [0], [0, 0, 1, 0], [], []>} : vector<24x8xbf16>, vector<24x8xbf16>, vector<24x24xf32> -> vector<24x24xf32>
    %cst_53 = arith.constant 0.353553385 : f32
    %135 = vector.broadcast %cst_53 : f32 to vector<24x24xf32>
    %136 = arith.mulf %134, %135 : vector<24x24xf32>
    %137 = vector.broadcast %5 : vector<1x24xf32> to vector<24x24xf32>
    %138 = arith.addf %136, %137 : vector<24x24xf32>
    %cst_54 = arith.constant dense<0xFF800000> : vector<24xf32>
    %139 = vector.multi_reduction <maximumf>, %138, %cst_54 [1] : vector<24x24xf32> to vector<24xf32>
    %140 = vector.shape_cast %139 : vector<24xf32> to vector<24x1xf32>
    %141 = vector.broadcast %140 : vector<24x1xf32> to vector<24x24xf32>
    %142 = arith.subf %138, %141 : vector<24x24xf32>
    %143 = math.exp %142 : vector<24x24xf32>
    %cst_55 = arith.constant dense<0.000000e+00> : vector<24xf32>
    %144 = vector.multi_reduction <add>, %143, %cst_55 [1] : vector<24x24xf32> to vector<24xf32>
    %145 = vector.shape_cast %144 : vector<24xf32> to vector<24x1xf32>
    %146 = tpu.reciprocal %145 {approx = true} : vector<24x1xf32> -> vector<24x1xf32>
    %147 = vector.broadcast %146 : vector<24x1xf32> to vector<24x24xf32>
    %148 = arith.mulf %143, %147 : vector<24x24xf32>
    %149 = arith.truncf %148 : vector<24x24xf32> to vector<24x24xbf16>
    %150 = arith.truncf %131 : vector<24x8xf32> to vector<24x8xbf16>
    %cst_56 = arith.constant dense<0.000000e+00> : vector<24x8xf32>
    %151 = tpu.matmul %149, %150, %cst_56 {dimension_numbers = #tpu.dot_dimension_numbers<[1], [0], [0], [1], [0, 0, 1, 1], [], []>} : vector<24x24xbf16>, vector<24x8xbf16>, vector<24x8xf32> -> vector<24x8xf32>
    %152 = vector.extract_strided_slice %34 {offsets = [16, 0], sizes = [8, 32], strides = [1, 1]} : vector<32x32xbf16> to vector<8x32xbf16>
    %153 = arith.truncf %151 : vector<24x8xf32> to vector<24x8xbf16>
    %cst_57 = arith.constant dense<0.000000e+00> : vector<24x32xf32>
    %154 = tpu.matmul %153, %152, %cst_57 {dimension_numbers = #tpu.dot_dimension_numbers<[1], [0], [0], [1], [0, 0, 1, 1], [], []>} : vector<24x8xbf16>, vector<8x32xbf16>, vector<24x32xf32> -> vector<24x32xf32>
    %155 = arith.addf %116, %154 : vector<24x32xf32>
    %c24_58 = arith.constant 24 : index
    %c0_59 = arith.constant 0 : index
    %156 = vector.load %arg2[%c24_58, %c0_59] : memref<320x128xbf16, #tpu.memory_space<vmem>>, vector<8x32xbf16>
    %cst_60 = arith.constant dense<0.000000e+00> : vector<24x8xf32>
    %157 = tpu.matmul %30, %156, %cst_60 {dimension_numbers = #tpu.dot_dimension_numbers<[1], [1], [0], [0], [0, 0, 1, 0], [], []>} : vector<24x32xbf16>, vector<8x32xbf16>, vector<24x8xf32> -> vector<24x8xf32>
    %158 = vector.extract_strided_slice %31 {offsets = [3, 0], sizes = [1, 8], strides = [1, 1]} : vector<4x8xf32> to vector<1x8xf32>
    %159 = vector.broadcast %158 : vector<1x8xf32> to vector<24x8xf32>
    %160 = arith.addf %157, %159 : vector<24x8xf32>
    %c56 = arith.constant 56 : index
    %c0_61 = arith.constant 0 : index
    %161 = vector.load %arg2[%c56, %c0_61] : memref<320x128xbf16, #tpu.memory_space<vmem>>, vector<8x32xbf16>
    %cst_62 = arith.constant dense<0.000000e+00> : vector<24x8xf32>
    %162 = tpu.matmul %30, %161, %cst_62 {dimension_numbers = #tpu.dot_dimension_numbers<[1], [1], [0], [0], [0, 0, 1, 0], [], []>} : vector<24x32xbf16>, vector<8x32xbf16>, vector<24x8xf32> -> vector<24x8xf32>
    %163 = vector.extract_strided_slice %32 {offsets = [3, 0], sizes = [1, 8], strides = [1, 1]} : vector<4x8xf32> to vector<1x8xf32>
    %164 = vector.broadcast %163 : vector<1x8xf32> to vector<24x8xf32>
    %165 = arith.addf %162, %164 : vector<24x8xf32>
    %c88 = arith.constant 88 : index
    %c0_63 = arith.constant 0 : index
    %166 = vector.load %arg2[%c88, %c0_63] : memref<320x128xbf16, #tpu.memory_space<vmem>>, vector<8x32xbf16>
    %cst_64 = arith.constant dense<0.000000e+00> : vector<24x8xf32>
    %167 = tpu.matmul %30, %166, %cst_64 {dimension_numbers = #tpu.dot_dimension_numbers<[1], [1], [0], [0], [0, 0, 1, 0], [], []>} : vector<24x32xbf16>, vector<8x32xbf16>, vector<24x8xf32> -> vector<24x8xf32>
    %168 = vector.extract_strided_slice %33 {offsets = [3, 0], sizes = [1, 8], strides = [1, 1]} : vector<4x8xf32> to vector<1x8xf32>
    %169 = vector.broadcast %168 : vector<1x8xf32> to vector<24x8xf32>
    %170 = arith.addf %167, %169 : vector<24x8xf32>
    %171 = arith.truncf %160 : vector<24x8xf32> to vector<24x8xbf16>
    %172 = arith.truncf %165 : vector<24x8xf32> to vector<24x8xbf16>
    %cst_65 = arith.constant dense<0.000000e+00> : vector<24x24xf32>
    %173 = tpu.matmul %171, %172, %cst_65 {dimension_numbers = #tpu.dot_dimension_numbers<[1], [1], [0], [0], [0, 0, 1, 0], [], []>} : vector<24x8xbf16>, vector<24x8xbf16>, vector<24x24xf32> -> vector<24x24xf32>
    %cst_66 = arith.constant 0.353553385 : f32
    %174 = vector.broadcast %cst_66 : f32 to vector<24x24xf32>
    %175 = arith.mulf %173, %174 : vector<24x24xf32>
    %176 = vector.broadcast %5 : vector<1x24xf32> to vector<24x24xf32>
    %177 = arith.addf %175, %176 : vector<24x24xf32>
    %cst_67 = arith.constant dense<0xFF800000> : vector<24xf32>
    %178 = vector.multi_reduction <maximumf>, %177, %cst_67 [1] : vector<24x24xf32> to vector<24xf32>
    %179 = vector.shape_cast %178 : vector<24xf32> to vector<24x1xf32>
    %180 = vector.broadcast %179 : vector<24x1xf32> to vector<24x24xf32>
    %181 = arith.subf %177, %180 : vector<24x24xf32>
    %182 = math.exp %181 : vector<24x24xf32>
    %cst_68 = arith.constant dense<0.000000e+00> : vector<24xf32>
    %183 = vector.multi_reduction <add>, %182, %cst_68 [1] : vector<24x24xf32> to vector<24xf32>
    %184 = vector.shape_cast %183 : vector<24xf32> to vector<24x1xf32>
    %185 = tpu.reciprocal %184 {approx = true} : vector<24x1xf32> -> vector<24x1xf32>
    %186 = vector.broadcast %185 : vector<24x1xf32> to vector<24x24xf32>
    %187 = arith.mulf %182, %186 : vector<24x24xf32>
    %188 = arith.truncf %187 : vector<24x24xf32> to vector<24x24xbf16>
    %189 = arith.truncf %170 : vector<24x8xf32> to vector<24x8xbf16>
    %cst_69 = arith.constant dense<0.000000e+00> : vector<24x8xf32>
    %190 = tpu.matmul %188, %189, %cst_69 {dimension_numbers = #tpu.dot_dimension_numbers<[1], [0], [0], [1], [0, 0, 1, 1], [], []>} : vector<24x24xbf16>, vector<24x8xbf16>, vector<24x8xf32> -> vector<24x8xf32>
    %191 = vector.extract_strided_slice %34 {offsets = [24, 0], sizes = [8, 32], strides = [1, 1]} : vector<32x32xbf16> to vector<8x32xbf16>
    %192 = arith.truncf %190 : vector<24x8xf32> to vector<24x8xbf16>
    %cst_70 = arith.constant dense<0.000000e+00> : vector<24x32xf32>
    %193 = tpu.matmul %192, %191, %cst_70 {dimension_numbers = #tpu.dot_dimension_numbers<[1], [0], [0], [1], [0, 0, 1, 1], [], []>} : vector<24x8xbf16>, vector<8x32xbf16>, vector<24x32xf32> -> vector<24x32xf32>
    %194 = arith.addf %155, %193 : vector<24x32xf32>
    %195 = arith.addf %7, %194 : vector<24x32xf32>
    %c48_71 = arith.constant 48 : index
    %c0_72 = arith.constant 0 : index
    %196 = vector.load %arg3[%c48_71, %c0_72] : memref<104x128xf32, #tpu.memory_space<vmem>>, vector<1x32xf32>
    %c56_73 = arith.constant 56 : index
    %c0_74 = arith.constant 0 : index
    %197 = vector.load %arg3[%c56_73, %c0_74] : memref<104x128xf32, #tpu.memory_space<vmem>>, vector<1x32xf32>
    %cst_75 = arith.constant dense<0.000000e+00> : vector<24xf32>
    %198 = vector.multi_reduction <add>, %195, %cst_75 [1] : vector<24x32xf32> to vector<24xf32>
    %199 = vector.shape_cast %198 : vector<24xf32> to vector<24x1xf32>
    %cst_76 = arith.constant 3.200000e+01 : f32
    %200 = vector.broadcast %cst_76 : f32 to vector<24x1xf32>
    %201 = arith.divf %199, %200 : vector<24x1xf32>
    %202 = vector.broadcast %201 : vector<24x1xf32> to vector<24x32xf32>
    %203 = arith.subf %195, %202 : vector<24x32xf32>
    %204 = arith.mulf %203, %203 : vector<24x32xf32>
    %cst_77 = arith.constant dense<0.000000e+00> : vector<24xf32>
    %205 = vector.multi_reduction <add>, %204, %cst_77 [1] : vector<24x32xf32> to vector<24xf32>
    %206 = vector.shape_cast %205 : vector<24xf32> to vector<24x1xf32>
    %cst_78 = arith.constant 3.200000e+01 : f32
    %207 = vector.broadcast %cst_78 : f32 to vector<24x1xf32>
    %208 = arith.divf %206, %207 : vector<24x1xf32>
    %cst_79 = arith.constant 9.99999997E-7 : f32
    %209 = vector.broadcast %cst_79 : f32 to vector<24x1xf32>
    %210 = arith.addf %208, %209 : vector<24x1xf32>
    %211 = math.rsqrt %210 : vector<24x1xf32>
    %212 = vector.broadcast %211 : vector<24x1xf32> to vector<24x32xf32>
    %213 = arith.mulf %203, %212 : vector<24x32xf32>
    %214 = vector.broadcast %196 : vector<1x32xf32> to vector<24x32xf32>
    %215 = arith.mulf %213, %214 : vector<24x32xf32>
    %216 = vector.broadcast %197 : vector<1x32xf32> to vector<24x32xf32>
    %217 = arith.addf %215, %216 : vector<24x32xf32>
    %218 = arith.truncf %217 : vector<24x32xf32> to vector<24x32xbf16>
    %c128 = arith.constant 128 : index
    %c0_80 = arith.constant 0 : index
    %219 = vector.load %arg2[%c128, %c0_80] : memref<320x128xbf16, #tpu.memory_space<vmem>>, vector<32x128xbf16>
    %cst_81 = arith.constant dense<0.000000e+00> : vector<24x128xf32>
    %220 = tpu.matmul %218, %219, %cst_81 {dimension_numbers = #tpu.dot_dimension_numbers<[1], [0], [0], [1], [0, 0, 1, 1], [], []>} : vector<24x32xbf16>, vector<32x128xbf16>, vector<24x128xf32> -> vector<24x128xf32>
    %c64_82 = arith.constant 64 : index
    %c0_83 = arith.constant 0 : index
    %221 = vector.load %arg3[%c64_82, %c0_83] : memref<104x128xf32, #tpu.memory_space<vmem>>, vector<1x128xf32>
    %222 = vector.broadcast %221 : vector<1x128xf32> to vector<24x128xf32>
    %223 = arith.addf %220, %222 : vector<24x128xf32>
    %cst_84 = arith.constant 5.000000e-01 : f32
    %224 = vector.broadcast %cst_84 : f32 to vector<24x128xf32>
    %225 = arith.mulf %224, %223 : vector<24x128xf32>
    %cst_85 = arith.constant 0.707106769 : f32
    %226 = vector.broadcast %cst_85 : f32 to vector<24x128xf32>
    %227 = arith.mulf %223, %226 : vector<24x128xf32>
    %228 = math.erf %227 : vector<24x128xf32>
    %cst_86 = arith.constant 1.000000e+00 : f32
    %229 = vector.broadcast %cst_86 : f32 to vector<24x128xf32>
    %230 = arith.addf %229, %228 : vector<24x128xf32>
    %231 = arith.mulf %225, %230 : vector<24x128xf32>
    %c160 = arith.constant 160 : index
    %c0_87 = arith.constant 0 : index
    %232 = vector.load %arg2[%c160, %c0_87] : memref<320x128xbf16, #tpu.memory_space<vmem>>, vector<128x32xbf16>
    %233 = arith.truncf %231 : vector<24x128xf32> to vector<24x128xbf16>
    %cst_88 = arith.constant dense<0.000000e+00> : vector<24x32xf32>
    %234 = tpu.matmul %233, %232, %cst_88 {dimension_numbers = #tpu.dot_dimension_numbers<[1], [0], [0], [1], [0, 0, 1, 1], [], []>} : vector<24x128xbf16>, vector<128x32xbf16>, vector<24x32xf32> -> vector<24x32xf32>
    %235 = arith.addf %195, %234 : vector<24x32xf32>
    %c72_89 = arith.constant 72 : index
    %c0_90 = arith.constant 0 : index
    %236 = vector.load %arg3[%c72_89, %c0_90] : memref<104x128xf32, #tpu.memory_space<vmem>>, vector<1x32xf32>
    %237 = vector.broadcast %236 : vector<1x32xf32> to vector<24x32xf32>
    %238 = arith.addf %235, %237 : vector<24x32xf32>
    %c80_91 = arith.constant 80 : index
    %c0_92 = arith.constant 0 : index
    %239 = vector.load %arg3[%c80_91, %c0_92] : memref<104x128xf32, #tpu.memory_space<vmem>>, vector<1x32xf32>
    %c88_93 = arith.constant 88 : index
    %c0_94 = arith.constant 0 : index
    %240 = vector.load %arg3[%c88_93, %c0_94] : memref<104x128xf32, #tpu.memory_space<vmem>>, vector<1x32xf32>
    %cst_95 = arith.constant dense<0.000000e+00> : vector<24xf32>
    %241 = vector.multi_reduction <add>, %238, %cst_95 [1] : vector<24x32xf32> to vector<24xf32>
    %242 = vector.shape_cast %241 : vector<24xf32> to vector<24x1xf32>
    %cst_96 = arith.constant 3.200000e+01 : f32
    %243 = vector.broadcast %cst_96 : f32 to vector<24x1xf32>
    %244 = arith.divf %242, %243 : vector<24x1xf32>
    %245 = vector.broadcast %244 : vector<24x1xf32> to vector<24x32xf32>
    %246 = arith.subf %238, %245 : vector<24x32xf32>
    %247 = arith.mulf %246, %246 : vector<24x32xf32>
    %cst_97 = arith.constant dense<0.000000e+00> : vector<24xf32>
    %248 = vector.multi_reduction <add>, %247, %cst_97 [1] : vector<24x32xf32> to vector<24xf32>
    %249 = vector.shape_cast %248 : vector<24xf32> to vector<24x1xf32>
    %cst_98 = arith.constant 3.200000e+01 : f32
    %250 = vector.broadcast %cst_98 : f32 to vector<24x1xf32>
    %251 = arith.divf %249, %250 : vector<24x1xf32>
    %cst_99 = arith.constant 9.99999997E-7 : f32
    %252 = vector.broadcast %cst_99 : f32 to vector<24x1xf32>
    %253 = arith.addf %251, %252 : vector<24x1xf32>
    %254 = math.rsqrt %253 : vector<24x1xf32>
    %255 = vector.broadcast %254 : vector<24x1xf32> to vector<24x32xf32>
    %256 = arith.mulf %246, %255 : vector<24x32xf32>
    %257 = vector.broadcast %239 : vector<1x32xf32> to vector<24x32xf32>
    %258 = arith.mulf %256, %257 : vector<24x32xf32>
    %259 = vector.broadcast %240 : vector<1x32xf32> to vector<24x32xf32>
    %260 = arith.addf %258, %259 : vector<24x32xf32>
    %c288 = arith.constant 288 : index
    %c0_100 = arith.constant 0 : index
    %261 = vector.load %arg2[%c288, %c0_100] : memref<320x128xbf16, #tpu.memory_space<vmem>>, vector<32x128xbf16>
    %262 = arith.truncf %260 : vector<24x32xf32> to vector<24x32xbf16>
    %cst_101 = arith.constant dense<0.000000e+00> : vector<24x128xf32>
    %263 = tpu.matmul %262, %261, %cst_101 {dimension_numbers = #tpu.dot_dimension_numbers<[1], [0], [0], [1], [0, 0, 1, 1], [], []>} : vector<24x32xbf16>, vector<32x128xbf16>, vector<24x128xf32> -> vector<24x128xf32>
    %c96_102 = arith.constant 96 : index
    %c0_103 = arith.constant 0 : index
    %264 = vector.load %arg3[%c96_102, %c0_103] : memref<104x128xf32, #tpu.memory_space<vmem>>, vector<1x128xf32>
    %265 = vector.broadcast %264 : vector<1x128xf32> to vector<24x128xf32>
    %266 = arith.addf %263, %265 : vector<24x128xf32>
    %c0_104 = arith.constant 0 : index
    %c0_105 = arith.constant 0 : index
    %c0_106 = arith.constant 0 : index
    %267 = vector.load %arg6[%c0_104, %c0_105, %c0_106] : memref<1x24x128xf32, #tpu.memory_space<vmem>>, vector<1x24x128xf32>
    %268 = vector.shape_cast %267 : vector<1x24x128xf32> to vector<24x128xf32>
    %269 = vector.shape_cast %266 : vector<24x128xf32> to vector<1x24x128xf32>
    tpu.vector_store %arg6[%c0_104, %c0_105, %c0_106], %269 {strides = array<i32>} : memref<1x24x128xf32, #tpu.memory_space<vmem>>, vector<1x24x128xf32>,
    %c0_107 = arith.constant 0 : index
    %c0_108 = arith.constant 0 : index
    %c0_109 = arith.constant 0 : index
    %270 = vector.load %arg4[%c0_107, %c0_108, %c0_109] : memref<1x24x128xf32, #tpu.memory_space<vmem>>, vector<1x24x128xf32>
    %271 = vector.shape_cast %270 : vector<1x24x128xf32> to vector<24x128xf32>
    %272 = arith.subf %266, %271 : vector<24x128xf32>
    %273 = arith.mulf %272, %272 : vector<24x128xf32>
    %cst_110 = arith.constant dense<0.000000e+00> : vector<24xf32>
    %274 = vector.multi_reduction <add>, %273, %cst_110 [1] : vector<24x128xf32> to vector<24xf32>
    %275 = vector.shape_cast %274 : vector<24xf32> to vector<24x1xf32>
    %cst_111 = arith.constant 0.020833334 : f32
    %276 = vector.broadcast %cst_111 : f32 to vector<24x1xf32>
    %277 = arith.mulf %275, %276 : vector<24x1xf32>
    %c0_112 = arith.constant 0 : index
    %c0_113 = arith.constant 0 : index
    %c0_114 = arith.constant 0 : index
    %278 = vector.load %arg5[%c0_112, %c0_113, %c0_114] : memref<1x24x1xf32, #tpu.memory_space<vmem>>, vector<1x24x1xf32>
    %279 = vector.shape_cast %278 : vector<1x24x1xf32> to vector<24x1xf32>
    %280 = arith.mulf %277, %279 : vector<24x1xf32>
    %281 = vector.shape_cast %280 : vector<24x1xf32> to vector<1x24x1xf32>
    %cst_115 = arith.constant dense<0.000000e+00> : vector<1xf32>
    %282 = vector.multi_reduction <add>, %281, %cst_115 [1, 2] : vector<1x24x1xf32> to vector<1xf32>
    %283 = vector.shape_cast %282 : vector<1xf32> to vector<1x1x1xf32>
    %284 = vector.extract %283[0, 0, 0] : f32 from vector<1x1x1xf32>
    %cst_116 = arith.constant 0.000000e+00 : f32
    %285 = vector.broadcast %cst_116 : f32 to vector<1x128xf32>
    %286 = vector.broadcast %284 : f32 to vector<1x128xf32>
    %287 = arith.addf %285, %286 : vector<1x128xf32>
    %c0_117 = arith.constant 0 : index
    %c0_118 = arith.constant 0 : index
    %c0_119 = arith.constant 0 : index
    %288 = vector.load %arg7[%c0_117, %c0_118, %c0_119] : memref<1x1x128xf32, #tpu.memory_space<vmem>>, vector<1x1x128xf32>
    %289 = vector.shape_cast %288 : vector<1x1x128xf32> to vector<1x128xf32>
    %290 = vector.shape_cast %287 : vector<1x128xf32> to vector<1x1x128xf32>
    tpu.vector_store %arg7[%c0_117, %c0_118, %c0_119], %290 {strides = array<i32>} : memref<1x1x128xf32, #tpu.memory_space<vmem>>, vector<1x1x128xf32>,
    return
  }
  func.func @transform_0(%arg0: i32) -> (i32, i32, i32) {
    %c0_i32 = arith.constant 0 : i32
    %c0_i32_0 = arith.constant 0 : i32
    %c0_i32_1 = arith.constant 0 : i32
    return %arg0, %c0_i32, %c0_i32_0 : i32, i32, i32
  }
  func.func @transform_1(%arg0: i32) -> (i32, i32) {
    %c0_i32 = arith.constant 0 : i32
    %c0_i32_0 = arith.constant 0 : i32
    %c0_i32_1 = arith.constant 0 : i32
    return %c0_i32, %c0_i32_0 : i32, i32
  }
  func.func @transform_2(%arg0: i32) -> (i32, i32) {
    %c0_i32 = arith.constant 0 : i32
    %c0_i32_0 = arith.constant 0 : i32
    %c0_i32_1 = arith.constant 0 : i32
    return %c0_i32, %c0_i32_0 : i32, i32
  }
  func.func @transform_3(%arg0: i32) -> (i32, i32, i32) {
    %c0_i32 = arith.constant 0 : i32
    %c0_i32_0 = arith.constant 0 : i32
    %c0_i32_1 = arith.constant 0 : i32
    return %arg0, %c0_i32, %c0_i32_0 : i32, i32, i32
  }
  func.func @transform_4(%arg0: i32) -> (i32, i32, i32) {
    %c0_i32 = arith.constant 0 : i32
    %c0_i32_0 = arith.constant 0 : i32
    %c0_i32_1 = arith.constant 0 : i32
    return %arg0, %c0_i32, %c0_i32_0 : i32, i32, i32
  }
  func.func @transform_5(%arg0: i32) -> (i32, i32, i32) {
    %c0_i32 = arith.constant 0 : i32
    %c0_i32_0 = arith.constant 0 : i32
    %c0_i32_1 = arith.constant 0 : i32
    return %arg0, %c0_i32, %c0_i32_0 : i32, i32, i32
  }
  func.func @transform_6(%arg0: i32) -> (i32, i32, i32) {
    %c0_i32 = arith.constant 0 : i32
    %c0_i32_0 = arith.constant 0 : i32
    %c0_i32_1 = arith.constant 0 : i32
    return %arg0, %c0_i32, %c0_i32_0 : i32, i32, i32
  }
}

</mosaic_0001>

<bundles_post_ra>
// kernel: mae_forward.2
= control target key start
LH: loop header
LB: loop body
LE: loop exit
PB: predicated region body
PF: predicated region fallthrough
CT: control target
= control target key end

     0   :  { %s4065_s15 = smov 0   ;;  %s4780_s0 = inlined_call_operand.vmem [shape: f32[2,8,48], index: 0, kind: input, shape index: {}]   ;;  %s4781_s1 = inlined_call_operand.vmem [shape: f32[2,8,32], index: 1, kind: input, shape index: {}]   ;;  %s4782_s2 = inlined_call_operand.vmem [shape: bf16[656,128], index: 2, kind: input, shape index: {}]   ;;  %s4783_s3 = inlined_call_operand.vmem [shape: f32[184,128], index: 3, kind: input, shape index: {}]   ;;  %s4784_s4 = inlined_call_operand.vmem [shape: f32[2,8,128], index: 4, kind: output, shape index: {}]  }
   0x1 LB: > { %s3354_s16 = sadd.s32 4294967295, %s4035_s15   ;;  %p3358_p0 = scmp.ge.s32.totalorder %s4035_s15, 1  ;;  %s4035_s15 = sphi %s4065_s15, %s14_s15  }
   0x2   : > { %p170_p1 = scmp.lt.s32.totalorder %s4035_s15, 3 }
   0x4   : > { %p171_p2 = pnand %p3358_p0, %p170_p1 }
   0x5   : > { %v3958_v0 = vld [vmem:[%s4782_s2] sm:$0xff] (!%p171_p2)   ;;  %v4037_v1 = vmov (!%p171_p2), 0.0   ;;  %v3959_v2 = vld [vmem:[%s4782_s2 + $0x8] sm:$0xff] (!%p171_p2)   ;;  %vm4038_vm0 = vmmov (!%p171_p2), 0   ;;  %p198_p3 = scmp.lt.s32.totalorder (!%p171_p2), %s3354_s16, 1  ;;  %v3960_v3 = vld [vmem:[%s4782_s2 + $0x10] sm:$0xff] (!%p171_p2)   ;;  %v211_v34 = vlaneseq (!%p171_p2) }
   0x6   : > { %174 = sbr.rel (%p171_p2) target bundleno = 11177 (0x2ba9), region = 36  ;;  %3585 = vmatprep.subr.bf16.mxu1 (!%p171_p2), %v4037_v1  ;;  %3607 = vmatprep.subr.bf16.mxu0 (!%p171_p2), %v4037_v1  ;;  %vm242_vm1 = vcmask (!%p171_p2), 392192   ;;  %vm288_vm2 = vcmask (!%p171_p2), 261120   ;;  %v327_v18 = vld [vmem:[%s4782_s2 + $0x18] sm:$0xf] (!%p171_p2)  ;;  %vm541_vm3 = vcmask (!%p171_p2), 1043456  }
   0x7   : > { %3586 = vmatpush3.bf16.msra.mxu1 (!%p171_p2), %v3958_v0  ;;  %3591 = vmatprep.mubr.msk.bf16.mxu1 (!%p171_p2), %vm4038_vm0, %v4037_v1  ;;  %v426_v19 = vld [vmem:[%s4782_s2 + $0x38] sm:$0xf] (!%p171_p2)  ;;  %v336_v20 = vsel (!%p171_p2), %vm288_vm2, %v327_v18, 0  ;;  %v3366_v26 = vld [vmem:[%s4783_s3] ss:$0 sm:$0xff] (!%p171_p2)  ;;  %v4144_v35 = vshrl.u32 (!%p171_p2), %v211_v34, 7 }
   0x8   : > { %3587 = vmatprep.subr.bf16.mxu1 (!%p171_p2), %v4037_v1  ;;  %3609 = vmatprep.mubr.msk.bf16.mxu0 (!%p171_p2), %vm4038_vm0, %v4037_v1  ;;  %v432_v21 = vsel (!%p171_p2), %vm288_vm2, %v426_v19, 0  ;;  %v3367_v28 = vld [vmem:[%s4783_s3 + $0x8] ss:$0 sm:$0xff] (!%p171_p2)  ;;  %v4152_v37 = vld [vmem:[%s4783_s3 + $0x20] sm:$0xf] (!%p171_p2)  ;;  %vm476_vm4 = vcmask (!%p171_p2), 64512  }
   0x9   : > { %3608 = vmatpush3.bf16.xpose.msra.mxu0 (!%p171_p2), %v432_v21  ;;  %v378_v30 = vld [vmem:[%s4782_s2 + $0x28] sm:$0xf] (!%p171_p2)  ;;  %v4147_v36 = vsub.s32 (!%p171_p2), 0, %v4144_v35  ;;  %v4159_v46 = vld [vmem:[%s4783_s3 + $0x18] sm:$0xf] (!%p171_p2)  ;;  %v212_v63 = vand.u32 (!%p171_p2), 127, %v211_v34 }
   0xa   : > { %3619 = vmatprep.subr.bf16.mxu0 (!%p171_p2), %v4037_v1  ;;  %v384_v33 = vsel (!%p171_p2), %vm288_vm2, %v378_v30, 0  ;;  %v4168_v52 = vld [vmem:[%s4783_s3 + $0x10] sm:$0xf] (!%p171_p2) }
   0xb   : > { %3588 = vmatpush3.bf16.msra.mxu1 (!%p171_p2), %v3959_v2  ;;  %v430_v38 = vrot.slane (!%p171_p2), %v4152_v37, %v4147_v36  ;;  %v382_v51 = vrot.slane (!%p171_p2), %v4159_v46, %v4147_v36  ;;  %v331_v57 = vrot.slane (!%p171_p2), %v4168_v52, %v4147_v36  ;;  %vm213_vm5 = vcmp.lt.s32.totalorder (!%p171_p2), %v212_v63, 5 }
   0xc   : > { %3589 = vmatprep.subr.bf16.mxu1 (!%p171_p2), %v4037_v1  ;;  %v4039_v2 = vmov (!%p171_p2), -1e+30  }
   0xd   : > { %s4786_s16 = smov (!%p198_p3, %s3354_s16), 1 }
   0xe   : > { %s4089_s23 = sshll.u32 %s4786_s16, 3 }
   0xf   : > { %s201_s26 = scalar_lea.vmem %s4780_s0, %s4089_s23  ;;  %3590 = vmatpush3.bf16.msra.mxu1 %v3960_v3  ;;  %s205_s29 = scalar_lea.vmem %s4781_s1, %s4089_s23  ;;  %v4177_v3 = vsel %vm213_vm5, 0.0, %v4039_v2 }
  0x10   : > { %v215_v4 = vld [vmem:[%s201_s26] sm:$0xff]  ;;  %3595 = vmatprep.subr.bf16.mxu1 %v4037_v1  ;;  %s209_s17 = scalar_lea.vmem %s4784_s4, %s4089_s23 }
  0x11   : > { %v222_v5 = vpack.c.bf16 %v215_v4, %v215_v4  ;;  %v223_v6 = vld [vmem:[%s205_s29] sm:$0xff] }
  0x13   : > { %3592 = vmatmul.mubr.msk.bf16.vlgmr.msra.gmra.mrb[0].mxu1 %vm242_vm1, %v222_v5 }
  0x14   : > { %3597 = vmatprep.mubr.msk.bf16.mxu1 %vm4038_vm0, %v4037_v1 }
  0x18   : > { %3596 = vmatpush3.bf16.xpose.msra.mxu1 %v336_v20  ;;  %v633_v20 = vld [vmem:[%s4782_s2 + $0x1c] sm:$0xf] }
  0x19   : > { %3601 = vmatprep.subr.bf16.mxu1 %v4037_v1 }
  0xe6   : > { %v280_v7 = vpop.f32.mrb[0].mxu1 }
  0xe7   : > { %v4103_v8 = vadd.f32 %v280_v7, %v223_v6  ;;  %v3593_v9 = vpop.f32.mrb[1].mxu1 }
  0xe8   : > { %v283_v10 = vpop.f32.mrb[2].mxu1 }
  0xe9   : > { %v3594_v11 = vpop.f32.mrb[3].mxu1  ;;  %v289_v12 = vsel %vm288_vm2, %v4103_v8, 0.0 }
  0xea   : > { %290 = vadd.xlane.f32.xlu0 %v289_v12 }
 0x177   : > { %v291_v13 = vpop.xlane.xlu0 %290 }
 0x178   : > { %v293_v14 = vmul.f32 0.03125, %v291_v13 }
 0x17a   : > { %v294_v15 = vsub.f32 %v4103_v8, %v293_v14 }
 0x17c   : > { %v295_v16 = vmul.f32 %v294_v15, %v294_v15 }
 0x17e   : > { %v296_v17 = vsel %vm288_vm2, %v295_v16, 0.0  ;;  %v317_v16 = vld [vmem:[%s4782_s2 + $0x48] sm:$0xf] }
 0x17f   : > { %297 = vadd.xlane.f32.xlu0 %v296_v17  ;;  %v590_v17 = vsel %vm541_vm3, %v317_v16, 0 }
 0x20c   : > { %v298_v22 = vpop.xlane.xlu0 %297 }
 0x20d   : > { %v299_v23 = vmul.f32 0.03125, %v298_v22 }
 0x20f   : > { %v300_v24 = vadd.f32 1e-06, %v299_v23  ;;  %v639_v23 = vsel %vm288_vm2, %v633_v20, 0 }
 0x211   : > { %3983 = vrsqrt.f32 %v300_v24  ;;  %v729_v24 = vld [vmem:[%s4782_s2 + $0x3c] sm:$0xf] }
 0x21b   : > { %v3984_v25 = vpop.eup %3983 }
 0x21c   : > { %v302_v27 = vmul.f32 %v3984_v25, %v294_v15  ;;  %v735_v25 = vsel %vm288_vm2, %v729_v24, 0 }
 0x21e   : > { %v307_v29 = vmul.f32 %v3366_v26, %v302_v27  ;;  %v681_v26 = vld [vmem:[%s4782_s2 + $0x2c] sm:$0xf] }
 0x21f   : > { %v687_v30 = vsel %vm288_vm2, %v681_v26, 0  ;;  %v1030_v26 = vld [vmem:[%s4782_s2 + $0x40] sm:$0xf] }
 0x220   : > { %v312_v31 = vadd.f32 %v3367_v28, %v307_v29 }
 0x222   : > { %v4128_v32 = vpack.c.bf16 %v312_v31, %v312_v31 }
 0x224   : > { %3598 = vmatmul.mubr.msk.bf16.vlgmr.msra.gmra.mrb[4].mxu1 %vm288_vm2, %v4128_v32  ;;  %3610 = vmatmul.mubr.msk.bf16.vlgmr.msra.gmra.mrb[0].mxu0 %vm288_vm2, %v4128_v32 }
 0x225   : > { %3602 = vmatpush3.bf16.xpose.msra.mxu1 %v384_v33  ;;  %3603 = vmatprep.mubr.msk.bf16.mxu1 %vm4038_vm0, %v4037_v1 }
 0x226   : > { %3613 = vmatprep.subr.bf16.mxu1 %v4037_v1  ;;  %3621 = vmatprep.mubr.msk.bf16.mxu0 %vm4038_vm0, %v4037_v1 }
 0x22c   : > { %3604 = vmatmul.mubr.msk.bf16.vlgmr.msra.gmra.mrb[8].mxu1 %vm288_vm2, %v4128_v32 }
 0x22d   : > { %3615 = vmatprep.mubr.msk.bf16.mxu1 %vm4038_vm0, %v4037_v1 }
 0x2f7   : > { %v372_v39 = vpop.f32.mrb[4].mxu1  ;;  %v468_v40 = vpop.f32.mrb[0].mxu0 }
 0x2f8   : > { %v469_v41 = vadd.f32 %v468_v40, %v430_v38  ;;  %v3599_v42 = vpop.f32.mrb[5].mxu1  ;;  %v3611_v43 = vpop.f32.mrb[1].mxu0  ;;  %v373_v61 = vadd.f32 %v372_v39, %v331_v57  ;;  %v4217_v40 = vsub.s32 1, %v4144_v35 }
 0x2f9   : > { %v375_v44 = vpop.f32.mrb[6].mxu1  ;;  %v471_v45 = vpop.f32.mrb[2].mxu0 }
 0x2fa   : > { %v537_v47 = vpack.c.bf16 %v469_v41, %v469_v41  ;;  %v3600_v48 = vpop.f32.mrb[7].mxu1  ;;  %v3612_v49 = vpop.f32.mrb[3].mxu0  ;;  %v474_v62 = vpack.c.bf16 %v373_v61, %v373_v61  ;;  %v733_v42 = vrot.slane %v4152_v37, %v4217_v40  ;;  %v637_v61 = vrot.slane %v4168_v52, %v4217_v40 }
 0x2fc   : > { %v543_v50 = vsel %vm541_vm3, %v537_v47, 0 }
 0x2fd   : > { %3620 = vmatpush3.bf16.msra.mxu0 %v543_v50 }
 0x2fe   : > { %3631 = vmatprep.subr.bf16.mxu0 %v4037_v1 }
 0x2ff   : > { %v420_v53 = vpop.f32.mrb[8].mxu1 }
 0x300   : > { %v421_v54 = vadd.f32 %v420_v53, %v382_v51  ;;  %v3605_v55 = vpop.f32.mrb[9].mxu1 }
 0x301   : > { %v423_v56 = vpop.f32.mrb[10].mxu1 }
 0x302   : > { %v475_v58 = vpack.c.bf16 %v421_v54, %v421_v54  ;;  %v3606_v59 = vpop.f32.mrb[11].mxu1  ;;  %v685_v56 = vrot.slane %v4159_v46, %v4217_v40 }
 0x304   : > { %v481_v60 = vsel %vm476_vm4, %v475_v58, 0 }
 0x305   : > { %3614 = vmatpush3.bf16.xpose.msra.mxu1 %v481_v60 }
 0x306   : > { %3625 = vmatprep.subr.bf16.mxu1 %v4037_v1 }
 0x30c   : > { %3616 = vmatmul.mubr.msk.bf16.vlgmr.msra.gmra.mrb[12].mxu1 %vm476_vm4, %v474_v62 }
 0x30d   : > { %3627 = vmatprep.mubr.msk.bf16.mxu1 %vm4038_vm0, %v4037_v1  ;;  %3626 = vmatpush3.bf16.msra.mxu1 %v590_v17 }
 0x30e   : > { %3637 = vmatprep.subr.bf16.mxu1 %v4037_v1 }
 0x3df   : > { %v517_v0 = vpop.f32.mrb[12].mxu1 }
 0x3e0   : > { %v523_v4 = vmul.f32 0.35355338, %v517_v0  ;;  %v3617_v5 = vpop.f32.mrb[13].mxu1 }
 0x3e1   : > { %v520_v6 = vpop.f32.mrb[14].mxu1 }
 0x3e2   : > { %v3618_v7 = vpop.f32.mrb[15].mxu1  ;;  %v524_v9 = vadd.f32 %v523_v4, %v4177_v3 }
 0x3e4   : > { %v525_v10 = vsel %vm476_vm4, %v524_v9, -inf }
 0x3e5   : > { %526 = vmax.xlane.f32.xlu1 %v525_v10 }
 0x472   : > { %v527_v11 = vpop.xlane.xlu1 %526 }
 0x473   : > { %v528_v12 = vsub.f32 %v524_v9, %v527_v11 }
 0x475   : > { %v529_v13 = vmul.f32 1.442695, %v528_v12 }
 0x477   : > { %3985 = vpow2.f32 %v529_v13 }
 0x481   : > { %v3986_v14 = vpop.eup %3985 }
 0x482   : > { %v531_v15 = vsel %vm476_vm4, %v3986_v14, 0.0 }
 0x483   : > { %532 = vadd.xlane.f32.xlu1 %v531_v15 }
 0x510   : > { %v533_v18 = vpop.xlane.xlu1 %532 }
 0x511   : > { %3987 = vrcp.f32 %v533_v18  ;;  %v318_v18 = vld [vmem:[%s4782_s2 + $0x4c] sm:$0xf] }
 0x51b   : > { %v3988_v19 = vpop.eup %3987 }
 0x51c   : > { %v535_v21 = vmul.f32 %v3988_v19, %v3986_v14  ;;  %v891_v19 = vsel %vm541_vm3, %v318_v18, 0 }
 0x51e   : > { %v536_v22 = vpack.c.bf16 %v535_v21, %v535_v21 }
 0x520   : > { %3622 = vmatmul.mubr.msk.bf16.vlgmr.msra.gmra.mrb[4].mxu0 %vm476_vm4, %v536_v22  ;;  %v934_v22 = vld [vmem:[%s4782_s2 + $0x20] sm:$0xf] }
 0x521   : > { %3632 = vmatpush3.bf16.xpose.msra.mxu0 %v639_v23  ;;  %3633 = vmatprep.mubr.msk.bf16.mxu0 %vm4038_vm0, %v4037_v1 }
 0x522   : > { %3643 = vmatprep.subr.bf16.mxu0 %v4037_v1 }
 0x528   : > { %3634 = vmatmul.mubr.msk.bf16.vlgmr.msra.gmra.mrb[8].mxu0 %vm288_vm2, %v4128_v32 }
 0x529   : > { %3644 = vmatpush3.bf16.xpose.msra.mxu0 %v735_v25  ;;  %3645 = vmatprep.mubr.msk.bf16.mxu0 %vm4038_vm0, %v4037_v1  ;;  %v940_v25 = vsel %vm288_vm2, %v934_v22, 0 }
 0x52a   : > { %3655 = vmatprep.subr.bf16.mxu0 %v4037_v1 }
 0x530   : > { %3646 = vmatmul.mubr.msk.bf16.vlgmr.msra.gmra.mrb[12].mxu0 %vm288_vm2, %v4128_v32 }
 0x531   : > { %3657 = vmatprep.mubr.msk.bf16.mxu0 %vm4038_vm0, %v4037_v1 }
 0x5f3   : > { %v579_v27 = vpop.f32.mrb[4].mxu0 }
 0x5f4   : > { %v585_v28 = vpack.c.bf16 %v579_v27, %v579_v27  ;;  %v3623_v29 = vpop.f32.mrb[5].mxu0  ;;  %v1036_v27 = vsel %vm288_vm2, %v1030_v26, 0 }
 0x5f5   : > { %v582_v31 = vpop.f32.mrb[6].mxu0 }
 0x5f6   : > { %v3624_v33 = vpop.f32.mrb[7].mxu0  ;;  %3628 = vmatmul.mubr.msk.bf16.vlgmr.msra.gmra.mrb[16].mxu1 %vm476_vm4, %v585_v28  ;;  %v982_v28 = vld [vmem:[%s4782_s2 + $0x30] sm:$0xf] }
 0x5f7   : > { %3638 = vmatpush3.bf16.xpose.msra.mxu1 %v687_v30  ;;  %3639 = vmatprep.mubr.msk.bf16.mxu1 %vm4038_vm0, %v4037_v1  ;;  %v988_v33 = vsel %vm288_vm2, %v982_v28, 0  ;;  %v1235_v28 = vld [vmem:[%s4782_s2 + $0x24] sm:$0xf] }
 0x5f8   : > { %3649 = vmatprep.subr.bf16.mxu1 %v4037_v1 }
 0x5fb   : > { %v675_v34 = vpop.f32.mrb[8].mxu0 }
 0x5fc   : > { %v3635_v38 = vpop.f32.mrb[9].mxu0  ;;  %v676_v2 = vadd.f32 %v675_v34, %v637_v61 }
 0x5fd   : > { %v678_v39 = vpop.f32.mrb[10].mxu0 }
 0x5fe   : > { %v3636_v41 = vpop.f32.mrb[11].mxu0  ;;  %3640 = vmatmul.mubr.msk.bf16.vlgmr.msra.gmra.mrb[20].mxu1 %vm288_vm2, %v4128_v32  ;;  %v777_v4 = vpack.c.bf16 %v676_v2, %v676_v2 }
 0x5ff   : > { %3651 = vmatprep.mubr.msk.bf16.mxu1 %vm4038_vm0, %v4037_v1 }
 0x603   : > { %v771_v43 = vpop.f32.mrb[12].mxu0 }
 0x604   : > { %v772_v44 = vadd.f32 %v771_v43, %v733_v42  ;;  %v3647_v45 = vpop.f32.mrb[13].mxu0  ;;  %v4276_v43 = vsub.s32 2, %v4144_v35 }
 0x605   : > { %v774_v47 = vpop.f32.mrb[14].mxu0 }
 0x606   : > { %v839_v48 = vpack.c.bf16 %v772_v44, %v772_v44  ;;  %v3648_v49 = vpop.f32.mrb[15].mxu0  ;;  %v1034_v45 = vrot.slane %v4152_v37, %v4276_v43 }
 0x608   : > { %v844_v50 = vsel %vm541_vm3, %v839_v48, 0 }
 0x609   : > { %3656 = vmatpush3.bf16.msra.mxu0 %v844_v50 }
 0x60a   : > { %3667 = vmatprep.subr.bf16.mxu0 %v4037_v1 }
 0x6c9   : > { %v4227_v51 = vpop.f32.mrb[16].mxu1 }
 0x6ca   : > { %v3629_v53 = vpop.f32.mrb[17].mxu1 }
 0x6cb   : > { %v629_v54 = vpop.f32.mrb[18].mxu1 }
 0x6cc   : > { %v3630_v55 = vpop.f32.mrb[19].mxu1 }
 0x6d1   : > { %v723_v57 = vpop.f32.mrb[20].mxu1 }
 0x6d2   : > { %v724_v58 = vadd.f32 %v723_v57, %v685_v56  ;;  %v3641_v59 = vpop.f32.mrb[21].mxu1  ;;  %v3368_v56 = vld [vmem:[%s4783_s3 + $0x28] ss:$0 sm:$0xff] }
 0x6d3   : > { %v726_v60 = vpop.f32.mrb[22].mxu1  ;;  %v632_v57 = vadd.f32 %v3368_v56, %v4227_v51 }
 0x6d4   : > { %v778_v62 = vpack.c.bf16 %v724_v58, %v724_v58  ;;  %v3642_v63 = vpop.f32.mrb[23].mxu1 }
 0x6d5   : > { %v986_v63 = vrot.slane %v4159_v46, %v4276_v43 }
 0x6d6   : > { %v783_v0 = vsel %vm476_vm4, %v778_v62, 0 }
 0x6d7   : > { %3650 = vmatpush3.bf16.xpose.msra.mxu1 %v783_v0 }
 0x6d8   : > { %3661 = vmatprep.subr.bf16.mxu1 %v4037_v1 }
 0x6de   : > { %3652 = vmatmul.mubr.msk.bf16.vlgmr.msra.gmra.mrb[24].mxu1 %vm476_vm4, %v777_v4 }
 0x6df   : > { %3663 = vmatprep.mubr.msk.bf16.mxu1 %vm4038_vm0, %v4037_v1  ;;  %3662 = vmatpush3.bf16.msra.mxu1 %v891_v19 }
 0x6e0   : > { %3673 = vmatprep.subr.bf16.mxu1 %v4037_v1 }
 0x7b1   : > { %v819_v5 = vpop.f32.mrb[24].mxu1 }
 0x7b2   : > { %v825_v6 = vmul.f32 0.35355338, %v819_v5  ;;  %v3653_v7 = vpop.f32.mrb[25].mxu1 }
 0x7b3   : > { %v822_v9 = vpop.f32.mrb[26].mxu1 }
 0x7b4   : > { %v3654_v10 = vpop.f32.mrb[27].mxu1  ;;  %v826_v11 = vadd.f32 %v825_v6, %v4177_v3  ;;  %v938_v6 = vrot.slane %v4168_v52, %v4276_v43 }
 0x7b6   : > { %v827_v12 = vsel %vm476_vm4, %v826_v11, -inf }
 0x7b7   : > { %828 = vmax.xlane.f32.xlu0 %v827_v12 }
 0x844   : > { %v829_v13 = vpop.xlane.xlu0 %828 }
 0x845   : > { %v830_v14 = vsub.f32 %v826_v11, %v829_v13 }
 0x847   : > { %v831_v15 = vmul.f32 1.442695, %v830_v14 }
 0x849   : > { %3989 = vpow2.f32 %v831_v15 }
 0x853   : > { %v3990_v16 = vpop.eup %3989 }
 0x854   : > { %v833_v17 = vsel %vm476_vm4, %v3990_v16, 0.0 }
 0x855   : > { %834 = vadd.xlane.f32.xlu1 %v833_v17 }
 0x8e2   : > { %v835_v20 = vpop.xlane.xlu1 %834 }
 0x8e3   : > { %3991 = vrcp.f32 %v835_v20 }
 0x8ed   : > { %v3992_v21 = vpop.eup %3991 }
 0x8ee   : > { %v837_v23 = vmul.f32 %v3992_v21, %v3990_v16 }
 0x8f0   : > { %v838_v24 = vpack.c.bf16 %v837_v23, %v837_v23 }
 0x8f2   : > { %3658 = vmatmul.mubr.msk.bf16.vlgmr.msra.gmra.mrb[16].mxu0 %vm476_vm4, %v838_v24  ;;  %v319_v24 = vld [vmem:[%s4782_s2 + $0x50] sm:$0xf] }
 0x8f3   : > { %3668 = vmatpush3.bf16.xpose.msra.mxu0 %v940_v25  ;;  %3669 = vmatprep.mubr.msk.bf16.mxu0 %vm4038_vm0, %v4037_v1  ;;  %v1192_v25 = vsel %vm541_vm3, %v319_v24, 0  ;;  %v320_v24 = vld [vmem:[%s4782_s2 + $0x54] sm:$0xf] }
 0x8f4   : > { %3679 = vmatprep.subr.bf16.mxu0 %v4037_v1 }
 0x8fa   : > { %3670 = vmatmul.mubr.msk.bf16.vlgmr.msra.gmra.mrb[20].mxu0 %vm288_vm2, %v4128_v32 }
 0x8fb   : > { %3680 = vmatpush3.bf16.xpose.msra.mxu0 %v1036_v27  ;;  %3681 = vmatprep.mubr.msk.bf16.mxu0 %vm4038_vm0, %v4037_v1 }
 0x8fc   : > { %3691 = vmatprep.subr.bf16.mxu0 %v4037_v1 }
 0x902   : > { %3682 = vmatmul.mubr.msk.bf16.vlgmr.msra.gmra.mrb[24].mxu0 %vm288_vm2, %v4128_v32 }
 0x903   : > { %3693 = vmatprep.mubr.msk.bf16.mxu0 %vm4038_vm0, %v4037_v1 }
 0x9c5   : > { %v880_v29 = vpop.f32.mrb[16].mxu0 }
 0x9c6   : > { %v886_v30 = vpack.c.bf16 %v880_v29, %v880_v29  ;;  %v3659_v31 = vpop.f32.mrb[17].mxu0 }
 0x9c7   : > { %v883_v34 = vpop.f32.mrb[18].mxu0  ;;  %v1241_v31 = vsel %vm288_vm2, %v1235_v28, 0 }
 0x9c8   : > { %v3660_v38 = vpop.f32.mrb[19].mxu0  ;;  %3664 = vmatmul.mubr.msk.bf16.vlgmr.msra.gmra.mrb[28].mxu1 %vm476_vm4, %v886_v30 }
 0x9c9   : > { %3674 = vmatpush3.bf16.xpose.msra.mxu1 %v988_v33  ;;  %3675 = vmatprep.mubr.msk.bf16.mxu1 %vm4038_vm0, %v4037_v1  ;;  %v1331_v33 = vld [vmem:[%s4782_s2 + $0x44] sm:$0xf]  ;;  %v1283_v38 = vld [vmem:[%s4782_s2 + $0x34] sm:$0xf] }
 0x9ca   : > { %3685 = vmatprep.subr.bf16.mxu1 %v4037_v1  ;;  %v1337_v34 = vsel %vm288_vm2, %v1331_v33, 0 }
 0x9cd   : > { %v976_v39 = vpop.f32.mrb[20].mxu0 }
 0x9ce   : > { %v3671_v41 = vpop.f32.mrb[21].mxu0  ;;  %v977_v10 = vadd.f32 %v976_v39, %v938_v6 }
 0x9cf   : > { %v979_v42 = vpop.f32.mrb[22].mxu0 }
 0x9d0   : > { %v3672_v44 = vpop.f32.mrb[23].mxu0  ;;  %3676 = vmatmul.mubr.msk.bf16.vlgmr.msra.gmra.mrb[32].mxu1 %vm288_vm2, %v4128_v32  ;;  %v1078_v11 = vpack.c.bf16 %v977_v10, %v977_v10 }
 0x9d1   : > { %3687 = vmatprep.mubr.msk.bf16.mxu1 %vm4038_vm0, %v4037_v1  ;;  %v1289_v44 = vsel %vm288_vm2, %v1283_v38, 0 }
 0x9d5   : > { %v1072_v47 = vpop.f32.mrb[24].mxu0 }
 0x9d6   : > { %v1073_v48 = vadd.f32 %v1072_v47, %v1034_v45  ;;  %v3683_v49 = vpop.f32.mrb[25].mxu0 }
 0x9d7   : > { %v1075_v50 = vpop.f32.mrb[26].mxu0 }
 0x9d8   : > { %v1140_v53 = vpack.c.bf16 %v1073_v48, %v1073_v48  ;;  %v3684_v54 = vpop.f32.mrb[27].mxu0 }
 0x9da   : > { %v1145_v55 = vsel %vm541_vm3, %v1140_v53, 0  ;;  %v4339_v53 = vsub.s32 3, %v4144_v35 }
 0x9db   : > { %3692 = vmatpush3.bf16.msra.mxu0 %v1145_v55 }
 0x9dc   : > { %3703 = vmatprep.subr.bf16.mxu0 %v4037_v1  ;;  %v1335_v55 = vrot.slane %v4152_v37, %v4339_v53  ;;  %v1287_v37 = vrot.slane %v4159_v46, %v4339_v53 }
 0xa9b   : > { %v927_v58 = vpop.f32.mrb[28].mxu1 }
 0xa9c   : > { %v4290_v59 = vadd.f32 %v927_v58, %v632_v57  ;;  %v3665_v60 = vpop.f32.mrb[29].mxu1 }
 0xa9d   : > { %v930_v61 = vpop.f32.mrb[30].mxu1 }
 0xa9e   : > { %v3666_v62 = vpop.f32.mrb[31].mxu1 }
 0xaa3   : > { %v1024_v0 = vpop.f32.mrb[32].mxu1 }
 0xaa4   : > { %v1025_v2 = vadd.f32 %v1024_v0, %v986_v63  ;;  %v3677_v4 = vpop.f32.mrb[33].mxu1 }
 0xaa5   : > { %v1027_v5 = vpop.f32.mrb[34].mxu1 }
 0xaa6   : > { %v1079_v7 = vpack.c.bf16 %v1025_v2, %v1025_v2  ;;  %v3678_v9 = vpop.f32.mrb[35].mxu1 }
 0xaa8   : > { %v1084_v51 = vsel %vm476_vm4, %v1079_v7, 0 }
 0xaa9   : > { %3686 = vmatpush3.bf16.xpose.msra.mxu1 %v1084_v51  ;;  %v1239_v51 = vrot.slane %v4168_v52, %v4339_v53 }
 0xaaa   : > { %3697 = vmatprep.subr.bf16.mxu1 %v4037_v1 }
 0xab0   : > { %3688 = vmatmul.mubr.msk.bf16.vlgmr.msra.gmra.mrb[36].mxu1 %vm476_vm4, %v1078_v11 }
 0xab1   : > { %3699 = vmatprep.mubr.msk.bf16.mxu1 %vm4038_vm0, %v4037_v1  ;;  %3698 = vmatpush3.bf16.msra.mxu1 %v1192_v25  ;;  %v1493_v25 = vsel %vm541_vm3, %v320_v24, 0 }
 0xab2   : > { %3709 = vmatprep.subr.bf16.mxu1 %v4037_v1 }
 0xb83   : > { %v1120_v12 = vpop.f32.mrb[36].mxu1 }
 0xb84   : > { %v1126_v13 = vmul.f32 0.35355338, %v1120_v12  ;;  %v3689_v14 = vpop.f32.mrb[37].mxu1 }
 0xb85   : > { %v1123_v15 = vpop.f32.mrb[38].mxu1 }
 0xb86   : > { %v3690_v16 = vpop.f32.mrb[39].mxu1  ;;  %v1127_v17 = vadd.f32 %v1126_v13, %v4177_v3 }
 0xb88   : > { %v1128_v18 = vsel %vm476_vm4, %v1127_v17, -inf }
 0xb89   : > { %1129 = vmax.xlane.f32.xlu0 %v1128_v18 }
 0xc16   : > { %v1130_v19 = vpop.xlane.xlu0 %1129 }
 0xc17   : > { %v1131_v20 = vsub.f32 %v1127_v17, %v1130_v19 }
 0xc19   : > { %v1132_v21 = vmul.f32 1.442695, %v1131_v20 }
 0xc1b   : > { %3993 = vpow2.f32 %v1132_v21 }
 0xc25   : > { %v3994_v22 = vpop.eup %3993 }
 0xc26   : > { %v1134_v23 = vsel %vm476_vm4, %v3994_v22, 0.0 }
 0xc27   : > { %1135 = vadd.xlane.f32.xlu1 %v1134_v23 }
 0xcb4   : > { %v1136_v26 = vpop.xlane.xlu1 %1135 }
 0xcb5   : > { %3995 = vrcp.f32 %v1136_v26 }
 0xcbf   : > { %v3996_v27 = vpop.eup %3995 }
 0xcc0   : > { %v1138_v29 = vmul.f32 %v3996_v27, %v3994_v22 }
 0xcc2   : > { %v1139_v30 = vpack.c.bf16 %v1138_v29, %v1138_v29 }
 0xcc4   : > { %3694 = vmatmul.mubr.msk.bf16.vlgmr.msra.gmra.mrb[28].mxu0 %vm476_vm4, %v1139_v30 }
 0xcc5   : > { %3704 = vmatpush3.bf16.xpose.msra.mxu0 %v1241_v31  ;;  %3705 = vmatprep.mubr.msk.bf16.mxu0 %vm4038_vm0, %v4037_v1 }
 0xcc6   : > { %3715 = vmatprep.subr.bf16.mxu0 %v4037_v1 }
 0xccc   : > { %3706 = vmatmul.mubr.msk.bf16.vlgmr.msra.gmra.mrb[32].mxu0 %vm288_vm2, %v4128_v32 }
 0xccd   : > { %3716 = vmatpush3.bf16.xpose.msra.mxu0 %v1337_v34  ;;  %3717 = vmatprep.mubr.msk.bf16.mxu0 %vm4038_vm0, %v4037_v1 }
 0xcce   : > { %3727 = vmatprep.subr.bf16.mxu0 %v4037_v1 }
 0xcd4   : > { %3718 = vmatmul.mubr.msk.bf16.vlgmr.msra.gmra.mrb[36].mxu0 %vm288_vm2, %v4128_v32 }
 0xcd5   : > { %3729 = vmatprep.mubr.msk.bf16.mxu0 %vm4038_vm0, %v4037_v1 }
 0xd97   : > { %v1181_v39 = vpop.f32.mrb[28].mxu0 }
 0xd98   : > { %v1187_v41 = vpack.c.bf16 %v1181_v39, %v1181_v39  ;;  %v3695_v42 = vpop.f32.mrb[29].mxu0 }
 0xd99   : > { %v1184_v45 = vpop.f32.mrb[30].mxu0 }
 0xd9a   : > { %v3696_v47 = vpop.f32.mrb[31].mxu0  ;;  %3700 = vmatmul.mubr.msk.bf16.vlgmr.msra.gmra.mrb[40].mxu1 %vm476_vm4, %v1187_v41 }
 0xd9b   : > { %3710 = vmatpush3.bf16.xpose.msra.mxu1 %v1289_v44  ;;  %3711 = vmatprep.mubr.msk.bf16.mxu1 %vm4038_vm0, %v4037_v1 }
 0xd9c   : > { %3721 = vmatprep.subr.bf16.mxu1 %v4037_v1 }
 0xd9f   : > { %v1277_v48 = vpop.f32.mrb[32].mxu0 }
 0xda0   : > { %v3707_v49 = vpop.f32.mrb[33].mxu0  ;;  %v1278_v13 = vadd.f32 %v1277_v48, %v1239_v51  ;;  %v3968_v51 = vld [vmem:[%s4782_s2 + $0x90] sm:$0xff]  }
 0xda1   : > { %v1280_v50 = vpop.f32.mrb[34].mxu0 }
 0xda2   : > { %v3708_v54 = vpop.f32.mrb[35].mxu0  ;;  %3712 = vmatmul.mubr.msk.bf16.vlgmr.msra.gmra.mrb[44].mxu1 %vm288_vm2, %v4128_v32 }
 0xda3   : > { %3723 = vmatprep.mubr.msk.bf16.mxu1 %vm4038_vm0, %v4037_v1 }
 0xda7   : > { %v1373_v56 = vpop.f32.mrb[36].mxu0 }
 0xda8   : > { %v1374_v57 = vadd.f32 %v1373_v56, %v1335_v55  ;;  %v3719_v58 = vpop.f32.mrb[37].mxu0 }
 0xda9   : > { %v1376_v60 = vpop.f32.mrb[38].mxu0  ;;  %v3963_v58 = vld [vmem:[%s4782_s2 + $0x68] sm:$0xff]  }
 0xdaa   : > { %v1441_v61 = vpack.c.bf16 %v1374_v57, %v1374_v57  ;;  %v3720_v62 = vpop.f32.mrb[39].mxu0  ;;  %v3961_v57 = vld [vmem:[%s4782_s2 + $0x58] sm:$0xff]   ;;  %v3964_v60 = vld [vmem:[%s4782_s2 + $0x70] sm:$0xff]  }
 0xdac   : > { %v1446_v63 = vsel %vm541_vm3, %v1441_v61, 0  ;;  %v3965_v61 = vld [vmem:[%s4782_s2 + $0x78] sm:$0xff]  }
 0xdad   : > { %3728 = vmatpush3.bf16.msra.mxu0 %v1446_v63 }
 0xdae   : > { %3739 = vmatprep.subr.bf16.mxu0 %v4037_v1 }
 0xe6d   : > { %v1228_v35 = vpop.f32.mrb[40].mxu1 }
 0xe6e   : > { %v1234_v32 = vadd.f32 %v1228_v35, %v4290_v59  ;;  %v3701_v0 = vpop.f32.mrb[41].mxu1  ;;  %v1379_v59 = vpack.c.bf16 %v1278_v13, %v1278_v13 }
 0xe6f   : > { %v1231_v2 = vpop.f32.mrb[42].mxu1  ;;  %v3393_v0 = vld [vmem:[%s4783_s3 + $0x30] ss:$0 sm:$0xff] }
 0xe70   : > { %v3702_v4 = vpop.f32.mrb[43].mxu1 }
 0xe71   : > { %v3394_v4 = vld [vmem:[%s4783_s3 + $0x38] ss:$0 sm:$0xff] }
 0xe75   : > { %v1325_v5 = vpop.f32.mrb[44].mxu1 }
 0xe76   : > { %v1326_v6 = vadd.f32 %v1325_v5, %v1287_v37  ;;  %v3713_v7 = vpop.f32.mrb[45].mxu1 }
 0xe77   : > { %v1328_v9 = vpop.f32.mrb[46].mxu1  ;;  %v3966_v7 = vld [vmem:[%s4782_s2 + $0x80] sm:$0xff]  }
 0xe78   : > { %v1380_v10 = vpack.c.bf16 %v1326_v6, %v1326_v6  ;;  %v3714_v11 = vpop.f32.mrb[47].mxu1  ;;  %v3967_v9 = vld [vmem:[%s4782_s2 + $0x88] sm:$0xff]  }
 0xe79   : > { %v3970_v11 = vld [vmem:[%s4782_s2 + $0xa0] sm:$0xff]  }
 0xe7a   : > { %v1385_v12 = vsel %vm476_vm4, %v1380_v10, 0  ;;  %v3969_v10 = vld [vmem:[%s4782_s2 + $0x98] sm:$0xff]  }
 0xe7b   : > { %3722 = vmatpush3.bf16.xpose.msra.mxu1 %v1385_v12  ;;  %v3395_v12 = vld [vmem:[%s4783_s3 + $0x40] ss:$0 sm:$0xff] }
 0xe7c   : > { %3733 = vmatprep.subr.bf16.mxu1 %v4037_v1 }
 0xe82   : > { %3724 = vmatmul.mubr.msk.bf16.vlgmr.msra.gmra.mrb[48].mxu1 %vm476_vm4, %v1379_v59 }
 0xe83   : > { %3735 = vmatprep.mubr.msk.bf16.mxu1 %vm4038_vm0, %v4037_v1  ;;  %3734 = vmatpush3.bf16.msra.mxu1 %v1493_v25 }
 0xe84   : > { %3747 = vmatprep.subr.bf16.mxu1 %v4037_v1 }
 0xf55   : > { %v1421_v46 = vpop.f32.mrb[48].mxu1 }
 0xf56   : > { %v1427_v14 = vmul.f32 0.35355338, %v1421_v46  ;;  %v3725_v15 = vpop.f32.mrb[49].mxu1 }
 0xf57   : > { %v1424_v16 = vpop.f32.mrb[50].mxu1 }
 0xf58   : > { %v3726_v17 = vpop.f32.mrb[51].mxu1  ;;  %v1428_v52 = vadd.f32 %v1427_v14, %v4177_v3 }
 0xf5a   : > { %v1429_v18 = vsel %vm476_vm4, %v1428_v52, -inf }
 0xf5b   : > { %1430 = vmax.xlane.f32.xlu0 %v1429_v18 }
 0xfe8   : > { %v1431_v19 = vpop.xlane.xlu0 %1430 }
 0xfe9   : > { %v1432_v20 = vsub.f32 %v1428_v52, %v1431_v19 }
 0xfeb   : > { %v1433_v21 = vmul.f32 1.442695, %v1432_v20 }
 0xfed   : > { %3997 = vpow2.f32 %v1433_v21 }
 0xff7   : > { %v3998_v22 = vpop.eup %3997 }
 0xff8   : > { %v1435_v23 = vsel %vm476_vm4, %v3998_v22, 0.0 }
 0xff9   : > { %1436 = vadd.xlane.f32.xlu1 %v1435_v23 }
0x1086   : > { %v1437_v26 = vpop.xlane.xlu1 %1436 }
0x1087   : > { %3999 = vrcp.f32 %v1437_v26 }
0x1091   : > { %v4000_v27 = vpop.eup %3999 }
0x1092   : > { %v1439_v28 = vmul.f32 %v4000_v27, %v3998_v22  ;;  %v3407_v22 = vld [vmem:[%s4783_s3 + $0x48] ss:$0 sm:$0xff] }
0x1094   : > { %v1440_v29 = vpack.c.bf16 %v1439_v28, %v1439_v28 }
0x1096   : > { %3730 = vmatmul.mubr.msk.bf16.vlgmr.msra.gmra.mrb[40].mxu0 %vm476_vm4, %v1440_v29 }
0x1097   : > { %3743 = vmatprep.mubr.msk.bf16.mxu0 %vm4038_vm0, %v4037_v1  ;;  %3740 = vmatpush3.bf16.msra.mxu0 %v3961_v57 }
0x1098   : > { %3741 = vmatprep.subr.bf16.mxu0 %v4037_v1 }
0x1169   : > { %v1482_v30 = vpop.f32.mrb[40].mxu0 }
0x116a   : > { %v1488_v31 = vpack.c.bf16 %v1482_v30, %v1482_v30  ;;  %v3731_v33 = vpop.f32.mrb[41].mxu0 }
0x116b   : > { %v1485_v34 = vpop.f32.mrb[42].mxu0 }
0x116c   : > { %v3732_v38 = vpop.f32.mrb[43].mxu0  ;;  %3736 = vmatmul.mubr.msk.bf16.vlgmr.msra.gmra.mrb[52].mxu1 %vm476_vm4, %v1488_v31 }
0x116d   : > { %3763 = vmatprep.mubr.msk.bf16.mxu1 %vm4038_vm0, %v4037_v1  ;;  %3748 = vmatpush3.bf16.msra.mxu1 %v3963_v58  ;;  %v1783_v38 = vld [vmem:[%s4782_s2 + $0xa8] sm:$0xf] }
0x116e   : > { %3749 = vmatprep.subr.bf16.mxu1 %v4037_v1 }
0x1171   : > { %3750 = vmatpush3.bf16.msra.mxu1 %v3964_v60 }
0x1172   : > { %3751 = vmatprep.subr.bf16.mxu1 %v4037_v1 }
0x1175   : > { %3752 = vmatpush3.bf16.msra.mxu1 %v3965_v61 }
0x1176   : > { %3753 = vmatprep.subr.bf16.mxu1 %v4037_v1 }
0x1179   : > { %3754 = vmatpush3.bf16.msra.mxu1 %v3966_v7 }
0x117a   : > { %3755 = vmatprep.subr.bf16.mxu1 %v4037_v1 }
0x117d   : > { %3756 = vmatpush3.bf16.msra.mxu1 %v3967_v9 }
0x117e   : > { %3757 = vmatprep.subr.bf16.mxu1 %v4037_v1 }
0x1181   : > { %3758 = vmatpush3.bf16.msra.mxu1 %v3968_v51 }
0x1182   : > { %3759 = vmatprep.subr.bf16.mxu1 %v4037_v1 }
0x1185   : > { %3760 = vmatpush3.bf16.msra.mxu1 %v3969_v10 }
0x1186   : > { %3761 = vmatprep.subr.bf16.mxu1 %v4037_v1 }
0x1189   : > { %3762 = vmatpush3.bf16.msra.mxu1 %v3970_v11 }
0x118a   : > { %3791 = vmatprep.subr.bf16.mxu1 %v4037_v1 }
0x123f   : > { %v1529_v39 = vpop.f32.mrb[52].mxu1 }
0x1240   : > { %v1535_v41 = vadd.f32 %v1529_v39, %v1234_v32  ;;  %v3737_v42 = vpop.f32.mrb[53].mxu1  ;;  %v1792_v39 = vsel %vm288_vm2, %v1783_v38, 0  ;;  %v2087_v38 = vld [vmem:[%s4782_s2 + $0xac] sm:$0xf] }
0x1241   : > { %v1532_v44 = vpop.f32.mrb[54].mxu1 }
0x1242   : > { %v4374_v45 = vadd.f32 %v1535_v41, %v4103_v8  ;;  %v3738_v47 = vpop.f32.mrb[55].mxu1  ;;  %v3962_v8 = vld [vmem:[%s4782_s2 + $0x60] sm:$0xff]  }
0x1243   : > { %3742 = vmatpush3.bf16.msra.mxu0 %v3962_v8  ;;  %v3408_v47 = vld [vmem:[%s4783_s3 + $0x50] ss:$0 sm:$0xff]  ;;  %v1882_v8 = vld [vmem:[%s4782_s2 + $0xc8] sm:$0xf] }
0x1244   : > { %v1539_v48 = vsel %vm288_vm2, %v4374_v45, 0.0  ;;  %3767 = vmatprep.subr.bf16.mxu0 %v4037_v1  ;;  %v1888_v58 = vsel %vm288_vm2, %v1882_v8, 0 }
0x1245   : > { %1540 = vadd.xlane.f32.xlu0 %v1539_v48 }
0x12d2   : > { %v1541_v49 = vpop.xlane.xlu0 %1540 }
0x12d3   : > { %v1542_v50 = vmul.f32 0.03125, %v1541_v49  ;;  %v3409_v49 = vld [vmem:[%s4783_s3 + $0x58] ss:$0 sm:$0xff] }
0x12d5   : > { %v1543_v54 = vsub.f32 %v4374_v45, %v1542_v50 }
0x12d7   : > { %v1544_v55 = vmul.f32 %v1543_v54, %v1543_v54 }
0x12d9   : > { %v1545_v56 = vsel %vm288_vm2, %v1544_v55, 0.0 }
0x12da   : > { %1546 = vadd.xlane.f32.xlu1 %v1545_v56 }
0x1367   : > { %v1547_v62 = vpop.xlane.xlu1 %1546 }
0x1368   : > { %v1548_v63 = vmul.f32 0.03125, %v1547_v62 }
0x136a   : > { %v1549_v35 = vadd.f32 1e-06, %v1548_v63  ;;  %v4482_v63 = vld [vmem:[%s4783_s3 + $0x68] sm:$0xf] }
0x136c   : > { %4001 = vrsqrt.f32 %v1549_v35 }
0x1376   : > { %v4002_v32 = vpop.eup %4001 }
0x1377   : > { %v1551_v2 = vmul.f32 %v4002_v32, %v1543_v54  ;;  %v1834_v54 = vld [vmem:[%s4782_s2 + $0xb8] sm:$0xf]  ;;  %v1838_v32 = vrot.slane %v4482_v63, %v4147_v36 }
0x1378   : > { %v1840_v57 = vsel %vm288_vm2, %v1834_v54, 0 }
0x1379   : > { %v1556_v37 = vmul.f32 %v3393_v0, %v1551_v2  ;;  %v4489_v0 = vld [vmem:[%s4783_s3 + $0x60] sm:$0xf] }
0x137a   : > { %v1787_v7 = vrot.slane %v4489_v0, %v4147_v36 }
0x137b   : > { %v1561_v5 = vadd.f32 %v3394_v4, %v1556_v37 }
0x137d   : > { %v1562_v6 = vpack.c.bf16 %v1561_v5, %v1561_v5 }
0x137f   : > { %3744 = vmatmul.mubr.msk.bf16.vlgmr.msra.gmra.mrb[44].mxu0 %vm288_vm2, %v1562_v6  ;;  %v4494_v6 = vld [vmem:[%s4783_s3 + $0x70] sm:$0xf] }
0x1380   : > { %3769 = vmatprep.mubr.msk.bf16.mxu0 %vm4038_vm0, %v4037_v1  ;;  %3768 = vmatpush3.bf16.xpose.msra.mxu0 %v1792_v39  ;;  %v1886_v11 = vrot.slane %v4494_v6, %v4147_v36 }
0x1381   : > { %3773 = vmatprep.subr.bf16.mxu0 %v4037_v1 }
0x1452   : > { %v1621_v13 = vpop.f32.mrb[44].mxu0 }
0x1453   : > { %v1622_v59 = vadd.f32 %v3395_v12, %v1621_v13  ;;  %v3745_v46 = vpop.f32.mrb[45].mxu0 }
0x1454   : > { %v1624_v14 = vpop.f32.mrb[46].mxu0 }
0x1455   : > { %v1628_v15 = vmul.f32 0.70710677, %v1622_v59  ;;  %v3746_v16 = vpop.f32.mrb[47].mxu0  ;;  %v1627_v52 = vmul.f32 0.5, %v1622_v59 }
0x1457   : > { %4003 = verf.f32 %v1628_v15 }
0x1461   : > { %v4004_v17 = vpop.eup %4003 }
0x1462   : > { %v1630_v18 = vadd.f32 1.0, %v4004_v17 }
0x1464   : > { %v1631_v19 = vmul.f32 %v1630_v18, %v1627_v52 }
0x1466   : > { %v1648_v20 = vpack.c.bf16 %v1631_v19, %v1631_v19 }
0x1468   : > { %3764 = vmatmul.mubr.bf16.vlgmr.msra.gmra.mrb[56].mxu1 %v1648_v20 }
0x1469   : > { %3793 = vmatprep.mubr.msk.bf16.mxu1 %vm4038_vm0, %v4037_v1 }
0x153b   : > { %v1731_v21 = vpop.f32.mrb[56].mxu1 }
0x153c   : > { %v1737_v23 = vadd.f32 %v1731_v21, %v4374_v45  ;;  %v3765_v24 = vpop.f32.mrb[57].mxu1 }
0x153d   : > { %v1734_v25 = vpop.f32.mrb[58].mxu1 }
0x153e   : > { %v4438_v26 = vadd.f32 %v3407_v22, %v1737_v23  ;;  %v3766_v27 = vpop.f32.mrb[59].mxu1 }
0x1540   : > { %v1746_v28 = vsel %vm288_vm2, %v4438_v26, 0.0 }
0x1541   : > { %1747 = vadd.xlane.f32.xlu0 %v1746_v28 }
0x15ce   : > { %v1748_v29 = vpop.xlane.xlu0 %1747 }
0x15cf   : > { %v1749_v30 = vmul.f32 0.03125, %v1748_v29 }
0x15d1   : > { %v1750_v31 = vsub.f32 %v4438_v26, %v1749_v30  ;;  %v1773_v30 = vld [vmem:[%s4782_s2 + $0xd8] sm:$0xf] }
0x15d3   : > { %v1751_v33 = vmul.f32 %v1750_v31, %v1750_v31 }
0x15d5   : > { %v1752_v34 = vsel %vm288_vm2, %v1751_v33, 0.0 }
0x15d6   : > { %1753 = vadd.xlane.f32.xlu1 %v1752_v34 }
0x1663   : > { %v1754_v41 = vpop.xlane.xlu1 %1753 }
0x1664   : > { %v1755_v42 = vmul.f32 0.03125, %v1754_v41 }
0x1666   : > { %v1756_v44 = vadd.f32 1e-06, %v1755_v42  ;;  %v2093_v42 = vsel %vm288_vm2, %v2087_v38, 0 }
0x1668   : > { %4005 = vrsqrt.f32 %v1756_v44  ;;  %v2183_v44 = vld [vmem:[%s4782_s2 + $0xcc] sm:$0xf] }
0x1672   : > { %v4006_v45 = vpop.eup %4005 }
0x1673   : > { %v1758_v48 = vmul.f32 %v4006_v45, %v1750_v31  ;;  %v2044_v31 = vsel %vm541_vm3, %v1773_v30, 0  ;;  %v2189_v45 = vsel %vm288_vm2, %v2183_v44, 0 }
0x1675   : > { %v1763_v50 = vmul.f32 %v3408_v47, %v1758_v48  ;;  %v2135_v47 = vld [vmem:[%s4782_s2 + $0xbc] sm:$0xf] }
0x1676   : > { %v2141_v54 = vsel %vm288_vm2, %v2135_v47, 0 }
0x1677   : > { %v1768_v55 = vadd.f32 %v3409_v49, %v1763_v50 }
0x1679   : > { %v4458_v56 = vpack.c.bf16 %v1768_v55, %v1768_v55 }
0x167b   : > { %3770 = vmatmul.mubr.msk.bf16.vlgmr.msra.gmra.mrb[48].mxu0 %vm288_vm2, %v4458_v56 }
0x167c   : > { %3774 = vmatpush3.bf16.xpose.msra.mxu0 %v1840_v57  ;;  %3775 = vmatprep.mubr.msk.bf16.mxu0 %vm4038_vm0, %v4037_v1 }
0x167d   : > { %3779 = vmatprep.subr.bf16.mxu0 %v4037_v1 }
0x1683   : > { %3776 = vmatmul.mubr.msk.bf16.vlgmr.msra.gmra.mrb[52].mxu0 %vm288_vm2, %v4458_v56 }
0x1684   : > { %3780 = vmatpush3.bf16.xpose.msra.mxu0 %v1888_v58  ;;  %3781 = vmatprep.mubr.msk.bf16.mxu0 %vm4038_vm0, %v4037_v1 }
0x1685   : > { %3785 = vmatprep.subr.bf16.mxu0 %v4037_v1 }
0x168b   : > { %3782 = vmatmul.mubr.msk.bf16.vlgmr.msra.gmra.mrb[56].mxu0 %vm288_vm2, %v4458_v56 }
0x168c   : > { %3787 = vmatprep.mubr.msk.bf16.mxu0 %vm4038_vm0, %v4037_v1 }
0x174e   : > { %v1828_v60 = vpop.f32.mrb[48].mxu0 }
0x174f   : > { %v3771_v61 = vpop.f32.mrb[49].mxu0  ;;  %v1829_v12 = vadd.f32 %v1828_v60, %v1787_v7 }
0x1750   : > { %v1831_v62 = vpop.f32.mrb[50].mxu0 }
0x1751   : > { %v3772_v35 = vpop.f32.mrb[51].mxu0  ;;  %v1930_v15 = vpack.c.bf16 %v1829_v12, %v1829_v12  ;;  %v2187_v62 = vrot.slane %v4494_v6, %v4217_v40  ;;  %v2139_v12 = vrot.slane %v4482_v63, %v4217_v40 }
0x1756   : > { %v1876_v2 = vpop.f32.mrb[52].mxu0 }
0x1757   : > { %v1877_v4 = vadd.f32 %v1876_v2, %v1838_v32  ;;  %v3777_v37 = vpop.f32.mrb[53].mxu0 }
0x1758   : > { %v1879_v5 = vpop.f32.mrb[54].mxu0 }
0x1759   : > { %v1931_v9 = vpack.c.bf16 %v1877_v4, %v1877_v4  ;;  %v3778_v51 = vpop.f32.mrb[55].mxu0 }
0x175b   : > { %v1936_v10 = vsel %vm476_vm4, %v1931_v9, 0 }
0x175c   : > { %3786 = vmatpush3.bf16.xpose.msra.mxu0 %v1936_v10 }
0x175d   : > { %3797 = vmatprep.subr.bf16.mxu0 %v4037_v1 }
0x175e   : > { %v1924_v13 = vpop.f32.mrb[56].mxu0 }
0x175f   : > { %v1925_v59 = vadd.f32 %v1924_v13, %v1886_v11  ;;  %v3783_v46 = vpop.f32.mrb[57].mxu0 }
0x1760   : > { %v1927_v14 = vpop.f32.mrb[58].mxu0 }
0x1761   : > { %v1992_v16 = vpack.c.bf16 %v1925_v59, %v1925_v59  ;;  %v3784_v17 = vpop.f32.mrb[59].mxu0 }
0x1763   : > { %v1997_v52 = vsel %vm541_vm3, %v1992_v16, 0  ;;  %3788 = vmatmul.mubr.msk.bf16.vlgmr.msra.gmra.mrb[60].mxu0 %vm476_vm4, %v1930_v15  ;;  %v2091_v15 = vrot.slane %v4489_v0, %v4217_v40 }
0x1764   : > { %3792 = vmatpush3.bf16.msra.mxu1 %v1997_v52  ;;  %3799 = vmatprep.mubr.msk.bf16.mxu0 %vm4038_vm0, %v4037_v1 }
0x1765   : > { %3803 = vmatprep.subr.bf16.mxu1 %v4037_v1  ;;  %3798 = vmatpush3.bf16.msra.mxu0 %v2044_v31  ;;  %v1774_v31 = vld [vmem:[%s4782_s2 + $0xdc] sm:$0xf] }
0x1766   : > { %3809 = vmatprep.subr.bf16.mxu0 %v4037_v1 }
0x1836   : > { %v1972_v36 = vpop.f32.mrb[60].mxu0 }
0x1837   : > { %v1978_v18 = vmul.f32 0.35355338, %v1972_v36  ;;  %v3789_v19 = vpop.f32.mrb[61].mxu0 }
0x1838   : > { %v1975_v20 = vpop.f32.mrb[62].mxu0 }
0x1839   : > { %v3790_v21 = vpop.f32.mrb[63].mxu0  ;;  %v1979_v22 = vadd.f32 %v1978_v18, %v4177_v3 }
0x183b   : > { %v1980_v23 = vsel %vm476_vm4, %v1979_v22, -inf }
0x183c   : > { %1981 = vmax.xlane.f32.xlu0 %v1980_v23 }
0x18c9   : > { %v1982_v24 = vpop.xlane.xlu0 %1981 }
0x18ca   : > { %v1983_v25 = vsub.f32 %v1979_v22, %v1982_v24 }
0x18cc   : > { %v1984_v27 = vmul.f32 1.442695, %v1983_v25 }
0x18ce   : > { %4007 = vpow2.f32 %v1984_v27 }
0x18d8   : > { %v4008_v28 = vpop.eup %4007 }
0x18d9   : > { %v1986_v29 = vsel %vm476_vm4, %v4008_v28, 0.0 }
0x18da   : > { %1987 = vadd.xlane.f32.xlu1 %v1986_v29 }
0x1967   : > { %v1988_v33 = vpop.xlane.xlu1 %1987 }
0x1968   : > { %4009 = vrcp.f32 %v1988_v33  ;;  %v2345_v33 = vsel %vm541_vm3, %v1774_v31, 0 }
0x1972   : > { %v4010_v34 = vpop.eup %4009 }
0x1973   : > { %v1990_v39 = vmul.f32 %v4010_v34, %v4008_v28 }
0x1975   : > { %v1991_v41 = vpack.c.bf16 %v1990_v39, %v1990_v39  ;;  %v2388_v39 = vld [vmem:[%s4782_s2 + $0xb0] sm:$0xf] }
0x1976   : > { %v2394_v44 = vsel %vm288_vm2, %v2388_v39, 0 }
0x1977   : > { %3794 = vmatmul.mubr.msk.bf16.vlgmr.msra.gmra.mrb[60].mxu1 %vm476_vm4, %v1991_v41 }
0x1978   : > { %3804 = vmatpush3.bf16.xpose.msra.mxu1 %v2093_v42  ;;  %3805 = vmatprep.mubr.msk.bf16.mxu1 %vm4038_vm0, %v4037_v1 }
0x1979   : > { %3815 = vmatprep.subr.bf16.mxu1 %v4037_v1 }
0x197f   : > { %3806 = vmatmul.mubr.msk.bf16.vlgmr.msra.gmra.mrb[64].mxu1 %vm288_vm2, %v4458_v56 }
0x1980   : > { %3816 = vmatpush3.bf16.xpose.msra.mxu1 %v2189_v45  ;;  %3817 = vmatprep.mubr.msk.bf16.mxu1 %vm4038_vm0, %v4037_v1  ;;  %v2484_v45 = vld [vmem:[%s4782_s2 + $0xd0] sm:$0xf] }
0x1981   : > { %3827 = vmatprep.subr.bf16.mxu1 %v4037_v1  ;;  %v2490_v47 = vsel %vm288_vm2, %v2484_v45, 0 }
0x1987   : > { %3818 = vmatmul.mubr.msk.bf16.vlgmr.msra.gmra.mrb[68].mxu1 %vm288_vm2, %v4458_v56 }
0x1988   : > { %3829 = vmatprep.mubr.msk.bf16.mxu1 %vm4038_vm0, %v4037_v1 }
0x1a4a   : > { %v2033_v48 = vpop.f32.mrb[60].mxu1 }
0x1a4b   : > { %v2039_v49 = vpack.c.bf16 %v2033_v48, %v2033_v48  ;;  %v3795_v50 = vpop.f32.mrb[61].mxu1  ;;  %v2436_v48 = vld [vmem:[%s4782_s2 + $0xc0] sm:$0xf] }
0x1a4c   : > { %v2036_v55 = vpop.f32.mrb[62].mxu1 }
0x1a4d   : > { %v3796_v57 = vpop.f32.mrb[63].mxu1  ;;  %3800 = vmatmul.mubr.msk.bf16.vlgmr.msra.gmra.mrb[64].mxu0 %vm476_vm4, %v2039_v49  ;;  %v2442_v55 = vsel %vm288_vm2, %v2436_v48, 0 }
0x1a4e   : > { %3810 = vmatpush3.bf16.xpose.msra.mxu0 %v2141_v54  ;;  %3811 = vmatprep.mubr.msk.bf16.mxu0 %vm4038_vm0, %v4037_v1 }
0x1a4f   : > { %3821 = vmatprep.subr.bf16.mxu0 %v4037_v1 }
0x1a52   : > { %v2129_v8 = vpop.f32.mrb[64].mxu1 }
0x1a53   : > { %v3807_v58 = vpop.f32.mrb[65].mxu1  ;;  %v2130_v36 = vadd.f32 %v2129_v8, %v2091_v15  ;;  %v2440_v15 = vrot.slane %v4482_v63, %v4276_v43 }
0x1a54   : > { %v2132_v60 = vpop.f32.mrb[66].mxu1 }
0x1a55   : > { %v3808_v61 = vpop.f32.mrb[67].mxu1  ;;  %3812 = vmatmul.mubr.msk.bf16.vlgmr.msra.gmra.mrb[68].mxu0 %vm288_vm2, %v4458_v56  ;;  %v2231_v18 = vpack.c.bf16 %v2130_v36, %v2130_v36 }
0x1a56   : > { %3823 = vmatprep.mubr.msk.bf16.mxu0 %vm4038_vm0, %v4037_v1 }
0x1a5a   : > { %v2225_v35 = vpop.f32.mrb[68].mxu1 }
0x1a5b   : > { %v2226_v32 = vadd.f32 %v2225_v35, %v2187_v62  ;;  %v3819_v2 = vpop.f32.mrb[69].mxu1  ;;  %v2488_v35 = vrot.slane %v4494_v6, %v4276_v43 }
0x1a5c   : > { %v2228_v4 = vpop.f32.mrb[70].mxu1 }
0x1a5d   : > { %v2293_v37 = vpack.c.bf16 %v2226_v32, %v2226_v32  ;;  %v3820_v5 = vpop.f32.mrb[71].mxu1 }
0x1a5f   : > { %v2298_v7 = vsel %vm541_vm3, %v2293_v37, 0 }
0x1a60   : > { %3828 = vmatpush3.bf16.msra.mxu1 %v2298_v7 }
0x1a61   : > { %3839 = vmatprep.subr.bf16.mxu1 %v4037_v1 }
0x1b20   : > { %v4552_v9 = vpop.f32.mrb[64].mxu0 }
0x1b21   : > { %v3801_v51 = vpop.f32.mrb[65].mxu0 }
0x1b22   : > { %v2083_v10 = vpop.f32.mrb[66].mxu0 }
0x1b23   : > { %v3802_v11 = vpop.f32.mrb[67].mxu0  ;;  %v3410_v10 = vld [vmem:[%s4783_s3 + $0x78] ss:$0 sm:$0xff] }
0x1b24   : > { %v2086_v11 = vadd.f32 %v3410_v10, %v4552_v9 }
0x1b28   : > { %v2177_v13 = vpop.f32.mrb[68].mxu0 }
0x1b29   : > { %v2178_v59 = vadd.f32 %v2177_v13, %v2139_v12  ;;  %v3813_v46 = vpop.f32.mrb[69].mxu0 }
0x1b2a   : > { %v2180_v14 = vpop.f32.mrb[70].mxu0 }
0x1b2b   : > { %v2232_v16 = vpack.c.bf16 %v2178_v59, %v2178_v59  ;;  %v3814_v17 = vpop.f32.mrb[71].mxu0 }
0x1b2d   : > { %v2237_v52 = vsel %vm476_vm4, %v2232_v16, 0 }
0x1b2e   : > { %3822 = vmatpush3.bf16.xpose.msra.mxu0 %v2237_v52 }
0x1b2f   : > { %3833 = vmatprep.subr.bf16.mxu0 %v4037_v1 }
0x1b35   : > { %3824 = vmatmul.mubr.msk.bf16.vlgmr.msra.gmra.mrb[72].mxu0 %vm476_vm4, %v2231_v18  ;;  %v2392_v18 = vrot.slane %v4489_v0, %v4276_v43 }
0x1b36   : > { %3835 = vmatprep.mubr.msk.bf16.mxu0 %vm4038_vm0, %v4037_v1  ;;  %3834 = vmatpush3.bf16.msra.mxu0 %v2345_v33 }
0x1b37   : > { %3845 = vmatprep.subr.bf16.mxu0 %v4037_v1 }
0x1c08   : > { %v2273_v19 = vpop.f32.mrb[72].mxu0 }
0x1c09   : > { %v2279_v20 = vmul.f32 0.35355338, %v2273_v19  ;;  %v3825_v21 = vpop.f32.mrb[73].mxu0 }
0x1c0a   : > { %v2276_v22 = vpop.f32.mrb[74].mxu0 }
0x1c0b   : > { %v3826_v23 = vpop.f32.mrb[75].mxu0  ;;  %v2280_v40 = vadd.f32 %v2279_v20, %v4177_v3 }
0x1c0d   : > { %v2281_v24 = vsel %vm476_vm4, %v2280_v40, -inf }
0x1c0e   : > { %2282 = vmax.xlane.f32.xlu0 %v2281_v24 }
0x1c9b   : > { %v2283_v25 = vpop.xlane.xlu0 %2282 }
0x1c9c   : > { %v2284_v27 = vsub.f32 %v2280_v40, %v2283_v25 }
0x1c9e   : > { %v2285_v28 = vmul.f32 1.442695, %v2284_v27 }
0x1ca0   : > { %4011 = vpow2.f32 %v2285_v28 }
0x1caa   : > { %v4012_v29 = vpop.eup %4011 }
0x1cab   : > { %v2287_v30 = vsel %vm476_vm4, %v4012_v29, 0.0 }
0x1cac   : > { %2288 = vadd.xlane.f32.xlu1 %v2287_v30 }
0x1d39   : > { %v2289_v34 = vpop.xlane.xlu1 %2288 }
0x1d3a   : > { %4013 = vrcp.f32 %v2289_v34 }
0x1d44   : > { %v4014_v38 = vpop.eup %4013 }
0x1d45   : > { %v2291_v41 = vmul.f32 %v4014_v38, %v4012_v29  ;;  %v1775_v38 = vld [vmem:[%s4782_s2 + $0xe0] sm:$0xf] }
0x1d46   : > { %v2646_v39 = vsel %vm541_vm3, %v1775_v38, 0 }
0x1d47   : > { %v2292_v42 = vpack.c.bf16 %v2291_v41, %v2291_v41 }
0x1d49   : > { %3830 = vmatmul.mubr.msk.bf16.vlgmr.msra.gmra.mrb[72].mxu1 %vm476_vm4, %v2292_v42 }
0x1d4a   : > { %3840 = vmatpush3.bf16.xpose.msra.mxu1 %v2394_v44  ;;  %3841 = vmatprep.mubr.msk.bf16.mxu1 %vm4038_vm0, %v4037_v1  ;;  %v2689_v44 = vld [vmem:[%s4782_s2 + $0xb4] sm:$0xf] }
0x1d4b   : > { %3851 = vmatprep.subr.bf16.mxu1 %v4037_v1  ;;  %v2695_v48 = vsel %vm288_vm2, %v2689_v44, 0 }
0x1d51   : > { %3842 = vmatmul.mubr.msk.bf16.vlgmr.msra.gmra.mrb[76].mxu1 %vm288_vm2, %v4458_v56 }
0x1d52   : > { %3852 = vmatpush3.bf16.xpose.msra.mxu1 %v2490_v47  ;;  %3853 = vmatprep.mubr.msk.bf16.mxu1 %vm4038_vm0, %v4037_v1 }
0x1d53   : > { %3863 = vmatprep.subr.bf16.mxu1 %v4037_v1 }
0x1d59   : > { %3854 = vmatmul.mubr.msk.bf16.vlgmr.msra.gmra.mrb[80].mxu1 %vm288_vm2, %v4458_v56 }
0x1d5a   : > { %3865 = vmatprep.mubr.msk.bf16.mxu1 %vm4038_vm0, %v4037_v1 }
0x1e1c   : > { %v2334_v49 = vpop.f32.mrb[72].mxu1 }
0x1e1d   : > { %v2340_v50 = vpack.c.bf16 %v2334_v49, %v2334_v49  ;;  %v3831_v54 = vpop.f32.mrb[73].mxu1  ;;  %v2785_v49 = vld [vmem:[%s4782_s2 + $0xd4] sm:$0xf] }
0x1e1e   : > { %v2337_v57 = vpop.f32.mrb[74].mxu1  ;;  %v2737_v54 = vld [vmem:[%s4782_s2 + $0xc4] sm:$0xf] }
0x1e1f   : > { %v3832_v8 = vpop.f32.mrb[75].mxu1  ;;  %3836 = vmatmul.mubr.msk.bf16.vlgmr.msra.gmra.mrb[76].mxu0 %vm476_vm4, %v2340_v50  ;;  %v2791_v50 = vsel %vm288_vm2, %v2785_v49, 0 }
0x1e20   : > { %3846 = vmatpush3.bf16.xpose.msra.mxu0 %v2442_v55  ;;  %3847 = vmatprep.mubr.msk.bf16.mxu0 %vm4038_vm0, %v4037_v1 }
0x1e21   : > { %3857 = vmatprep.subr.bf16.mxu0 %v4037_v1 }
0x1e24   : > { %v2430_v58 = vpop.f32.mrb[76].mxu1 }
0x1e25   : > { %v3843_v60 = vpop.f32.mrb[77].mxu1  ;;  %v2431_v21 = vadd.f32 %v2430_v58, %v2392_v18  ;;  %v2743_v58 = vsel %vm288_vm2, %v2737_v54, 0  ;;  %v2693_v18 = vrot.slane %v4489_v0, %v4339_v53 }
0x1e26   : > { %v2433_v61 = vpop.f32.mrb[78].mxu1 }
0x1e27   : > { %v3844_v62 = vpop.f32.mrb[79].mxu1  ;;  %3848 = vmatmul.mubr.msk.bf16.vlgmr.msra.gmra.mrb[80].mxu0 %vm288_vm2, %v4458_v56  ;;  %v2532_v22 = vpack.c.bf16 %v2431_v21, %v2431_v21 }
0x1e28   : > { %3859 = vmatprep.mubr.msk.bf16.mxu0 %vm4038_vm0, %v4037_v1 }
0x1e2c   : > { %v2526_v32 = vpop.f32.mrb[80].mxu1 }
0x1e2d   : > { %v2527_v2 = vadd.f32 %v2526_v32, %v2488_v35  ;;  %v3855_v4 = vpop.f32.mrb[81].mxu1 }
0x1e2e   : > { %v2529_v37 = vpop.f32.mrb[82].mxu1  ;;  %v2789_v4 = vrot.slane %v4494_v6, %v4339_v53  ;;  %v2741_v6 = vrot.slane %v4482_v63, %v4339_v53 }
0x1e2f   : > { %v2594_v5 = vpack.c.bf16 %v2527_v2, %v2527_v2  ;;  %v3856_v7 = vpop.f32.mrb[83].mxu1 }
0x1e31   : > { %v2599_v51 = vsel %vm541_vm3, %v2594_v5, 0 }
0x1e32   : > { %3864 = vmatpush3.bf16.msra.mxu1 %v2599_v51 }
0x1e33   : > { %3875 = vmatprep.subr.bf16.mxu1 %v4037_v1 }
0x1ef2   : > { %v2381_v12 = vpop.f32.mrb[76].mxu0 }
0x1ef3   : > { %v4612_v13 = vadd.f32 %v2381_v12, %v2086_v11  ;;  %v3837_v59 = vpop.f32.mrb[77].mxu0 }
0x1ef4   : > { %v2384_v46 = vpop.f32.mrb[78].mxu0 }
0x1ef5   : > { %v3838_v14 = vpop.f32.mrb[79].mxu0 }
0x1efa   : > { %v2478_v16 = vpop.f32.mrb[80].mxu0 }
0x1efb   : > { %v2479_v17 = vadd.f32 %v2478_v16, %v2440_v15  ;;  %v3849_v52 = vpop.f32.mrb[81].mxu0 }
0x1efc   : > { %v2481_v36 = vpop.f32.mrb[82].mxu0 }
0x1efd   : > { %v2533_v19 = vpack.c.bf16 %v2479_v17, %v2479_v17  ;;  %v3850_v20 = vpop.f32.mrb[83].mxu0 }
0x1eff   : > { %v2538_v9 = vsel %vm476_vm4, %v2533_v19, 0 }
0x1f00   : > { %3858 = vmatpush3.bf16.xpose.msra.mxu0 %v2538_v9 }
0x1f01   : > { %3869 = vmatprep.subr.bf16.mxu0 %v4037_v1 }
0x1f07   : > { %3860 = vmatmul.mubr.msk.bf16.vlgmr.msra.gmra.mrb[84].mxu0 %vm476_vm4, %v2532_v22 }
0x1f08   : > { %3871 = vmatprep.mubr.msk.bf16.mxu0 %vm4038_vm0, %v4037_v1  ;;  %3870 = vmatpush3.bf16.msra.mxu0 %v2646_v39 }
0x1f09   : > { %3881 = vmatprep.subr.bf16.mxu0 %v4037_v1 }
0x1fda   : > { %v2574_v23 = vpop.f32.mrb[84].mxu0 }
0x1fdb   : > { %v2580_v40 = vmul.f32 0.35355338, %v2574_v23  ;;  %v3861_v24 = vpop.f32.mrb[85].mxu0 }
0x1fdc   : > { %v2577_v25 = vpop.f32.mrb[86].mxu0 }
0x1fdd   : > { %v3862_v27 = vpop.f32.mrb[87].mxu0  ;;  %v2581_v43 = vadd.f32 %v2580_v40, %v4177_v3 }
0x1fdf   : > { %v2582_v28 = vsel %vm476_vm4, %v2581_v43, -inf }
0x1fe0   : > { %2583 = vmax.xlane.f32.xlu0 %v2582_v28 }
0x206d   : > { %v2584_v29 = vpop.xlane.xlu0 %2583 }
0x206e   : > { %v2585_v30 = vsub.f32 %v2581_v43, %v2584_v29 }
0x2070   : > { %v2586_v31 = vmul.f32 1.442695, %v2585_v30  ;;  %v1776_v30 = vld [vmem:[%s4782_s2 + $0xe4] sm:$0xf] }
0x2072   : > { %4015 = vpow2.f32 %v2586_v31  ;;  %v2947_v31 = vsel %vm541_vm3, %v1776_v30, 0 }
0x207c   : > { %v4016_v33 = vpop.eup %4015 }
0x207d   : > { %v2588_v34 = vsel %vm476_vm4, %v4016_v33, 0.0 }
0x207e   : > { %2589 = vadd.xlane.f32.xlu1 %v2588_v34 }
0x210b   : > { %v2590_v41 = vpop.xlane.xlu1 %2589 }
0x210c   : > { %4017 = vrcp.f32 %v2590_v41 }
0x2116   : > { %v4018_v42 = vpop.eup %4017 }
0x2117   : > { %v2592_v45 = vmul.f32 %v4018_v42, %v4016_v33 }
0x2119   : > { %v2593_v47 = vpack.c.bf16 %v2592_v45, %v2592_v45 }
0x211b   : > { %3866 = vmatmul.mubr.msk.bf16.vlgmr.msra.gmra.mrb[84].mxu1 %vm476_vm4, %v2593_v47 }
0x211c   : > { %3876 = vmatpush3.bf16.xpose.msra.mxu1 %v2695_v48  ;;  %3877 = vmatprep.mubr.msk.bf16.mxu1 %vm4038_vm0, %v4037_v1 }
0x211d   : > { %3887 = vmatprep.subr.bf16.mxu1 %v4037_v1 }
0x2123   : > { %3878 = vmatmul.mubr.msk.bf16.vlgmr.msra.gmra.mrb[88].mxu1 %vm288_vm2, %v4458_v56 }
0x2124   : > { %3888 = vmatpush3.bf16.xpose.msra.mxu1 %v2791_v50  ;;  %3889 = vmatprep.mubr.msk.bf16.mxu1 %vm4038_vm0, %v4037_v1 }
0x2125   : > { %3899 = vmatprep.subr.bf16.mxu1 %v4037_v1 }
0x212b   : > { %3890 = vmatmul.mubr.msk.bf16.vlgmr.msra.gmra.mrb[92].mxu1 %vm288_vm2, %v4458_v56 }
0x212c   : > { %3901 = vmatprep.mubr.msk.bf16.mxu1 %vm4038_vm0, %v4037_v1 }
0x21ee   : > { %v2635_v55 = vpop.f32.mrb[84].mxu1 }
0x21ef   : > { %v2641_v57 = vpack.c.bf16 %v2635_v55, %v2635_v55  ;;  %v3867_v8 = vpop.f32.mrb[85].mxu1 }
0x21f0   : > { %v2638_v60 = vpop.f32.mrb[86].mxu1 }
0x21f1   : > { %v3868_v61 = vpop.f32.mrb[87].mxu1  ;;  %3872 = vmatmul.mubr.msk.bf16.vlgmr.msra.gmra.mrb[88].mxu0 %vm476_vm4, %v2641_v57 }
0x21f2   : > { %3882 = vmatpush3.bf16.xpose.msra.mxu0 %v2743_v58  ;;  %3883 = vmatprep.mubr.msk.bf16.mxu0 %vm4038_vm0, %v4037_v1 }
0x21f3   : > { %3893 = vmatprep.subr.bf16.mxu0 %v4037_v1 }
0x21f6   : > { %v2731_v62 = vpop.f32.mrb[88].mxu1 }
0x21f7   : > { %v3879_v35 = vpop.f32.mrb[89].mxu1  ;;  %v2732_v21 = vadd.f32 %v2731_v62, %v2693_v18 }
0x21f8   : > { %v2734_v32 = vpop.f32.mrb[90].mxu1  ;;  %v3971_v35 = vld [vmem:[%s4782_s2 + $0xe8] sm:$0xff]  }
0x21f9   : > { %v3880_v2 = vpop.f32.mrb[91].mxu1  ;;  %3884 = vmatmul.mubr.msk.bf16.vlgmr.msra.gmra.mrb[92].mxu0 %vm288_vm2, %v4458_v56  ;;  %v3973_v32 = vld [vmem:[%s4782_s2 + $0xf8] sm:$0xff]  }
0x21fa   : > { %3895 = vmatprep.mubr.msk.bf16.mxu0 %vm4038_vm0, %v4037_v1  ;;  %v3974_v2 = vld [vmem:[%s4782_s2 + $0x100] sm:$0xff]  }
0x21fe   : > { %v2827_v37 = vpop.f32.mrb[92].mxu1 }
0x21ff   : > { %v2828_v5 = vadd.f32 %v2827_v37, %v2789_v4  ;;  %v3891_v7 = vpop.f32.mrb[93].mxu1  ;;  %v3975_v4 = vld [vmem:[%s4782_s2 + $0x108] sm:$0xff]  }
0x2200   : > { %v2830_v51 = vpop.f32.mrb[94].mxu1 }
0x2201   : > { %v2895_v10 = vpack.c.bf16 %v2828_v5, %v2828_v5  ;;  %v3892_v11 = vpop.f32.mrb[95].mxu1 }
0x2203   : > { %v2900_v12 = vsel %vm541_vm3, %v2895_v10, 0  ;;  %v3435_v10 = vld [vmem:[%s4783_s3 + $0x80] ss:$0 sm:$0xff] }
0x2204   : > { %3900 = vmatpush3.bf16.msra.mxu1 %v2900_v12  ;;  %v3436_v12 = vld [vmem:[%s4783_s3 + $0x88] ss:$0 sm:$0xff] }
0x2205   : > { %3911 = vmatprep.subr.bf16.mxu1 %v4037_v1 }
0x22c4   : > { %v2682_v59 = vpop.f32.mrb[88].mxu0 }
0x22c5   : > { %v2688_v56 = vadd.f32 %v2682_v59, %v4612_v13  ;;  %v3873_v46 = vpop.f32.mrb[89].mxu0  ;;  %v2833_v13 = vpack.c.bf16 %v2732_v21, %v2732_v21 }
0x22c6   : > { %v2685_v14 = vpop.f32.mrb[90].mxu0 }
0x22c7   : > { %v3874_v15 = vpop.f32.mrb[91].mxu0  ;;  %v3976_v14 = vld [vmem:[%s4782_s2 + $0x110] sm:$0xff]  }
0x22c8   : > { %v3977_v15 = vld [vmem:[%s4782_s2 + $0x118] sm:$0xff]  }
0x22cc   : > { %v2779_v16 = vpop.f32.mrb[92].mxu0 }
0x22cd   : > { %v2780_v17 = vadd.f32 %v2779_v16, %v2741_v6  ;;  %v3885_v52 = vpop.f32.mrb[93].mxu0  ;;  %v3978_v6 = vld [vmem:[%s4782_s2 + $0x120] sm:$0xff]   ;;  %v3979_v16 = vld [vmem:[%s4782_s2 + $0x128] sm:$0xff]  }
0x22ce   : > { %v2782_v36 = vpop.f32.mrb[94].mxu0  ;;  %v3437_v52 = vld [vmem:[%s4783_s3 + $0x90] ss:$0 sm:$0xff] }
0x22cf   : > { %v2834_v19 = vpack.c.bf16 %v2780_v17, %v2780_v17  ;;  %v3886_v20 = vpop.f32.mrb[95].mxu0  ;;  %v3980_v17 = vld [vmem:[%s4782_s2 + $0x130] sm:$0xff]  }
0x22d1   : > { %v2839_v9 = vsel %vm476_vm4, %v2834_v19, 0 }
0x22d2   : > { %3894 = vmatpush3.bf16.xpose.msra.mxu0 %v2839_v9 }
0x22d3   : > { %3905 = vmatprep.subr.bf16.mxu0 %v4037_v1 }
0x22d9   : > { %3896 = vmatmul.mubr.msk.bf16.vlgmr.msra.gmra.mrb[96].mxu0 %vm476_vm4, %v2833_v13 }
0x22da   : > { %3907 = vmatprep.mubr.msk.bf16.mxu0 %vm4038_vm0, %v4037_v1  ;;  %3906 = vmatpush3.bf16.msra.mxu0 %v2947_v31 }
0x22db   : > { %3919 = vmatprep.subr.bf16.mxu0 %v4037_v1 }
0x23ac   : > { %v2875_v63 = vpop.f32.mrb[96].mxu0 }
0x23ad   : > { %v2881_v22 = vmul.f32 0.35355338, %v2875_v63  ;;  %v3897_v23 = vpop.f32.mrb[97].mxu0 }
0x23ae   : > { %v2878_v40 = vpop.f32.mrb[98].mxu0 }
0x23af   : > { %v3898_v24 = vpop.f32.mrb[99].mxu0  ;;  %v2882_v53 = vadd.f32 %v2881_v22, %v4177_v3 }
0x23b1   : > { %v2883_v0 = vsel %vm476_vm4, %v2882_v53, -inf }
0x23b2   : > { %2884 = vmax.xlane.f32.xlu0 %v2883_v0 }
0x243f   : > { %v2885_v25 = vpop.xlane.xlu0 %2884 }
0x2440   : > { %v2886_v27 = vsub.f32 %v2882_v53, %v2885_v25  ;;  %v3449_v53 = vld [vmem:[%s4783_s3 + $0x98] ss:$0 sm:$0xff] }
0x2442   : > { %v2887_v43 = vmul.f32 1.442695, %v2886_v27 }
0x2444   : > { %4019 = vpow2.f32 %v2887_v43 }
0x244e   : > { %v4020_v28 = vpop.eup %4019 }
0x244f   : > { %v2889_v29 = vsel %vm476_vm4, %v4020_v28, 0.0 }
0x2450   : > { %2890 = vadd.xlane.f32.xlu1 %v2889_v29 }
0x24dd   : > { %v2891_v3 = vpop.xlane.xlu1 %2890 }
0x24de   : > { %4021 = vrcp.f32 %v2891_v3 }
0x24e8   : > { %v4022_v33 = vpop.eup %4021 }
0x24e9   : > { %v2893_v34 = vmul.f32 %v4022_v33, %v4020_v28 }
0x24eb   : > { %v2894_v38 = vpack.c.bf16 %v2893_v34, %v2893_v34 }
0x24ed   : > { %3902 = vmatmul.mubr.msk.bf16.vlgmr.msra.gmra.mrb[96].mxu1 %vm476_vm4, %v2894_v38  ;;  %v3981_v38 = vld [vmem:[%s4782_s2 + $0x138] sm:$0xff]  }
0x24ee   : > { %3915 = vmatprep.mubr.msk.bf16.mxu1 %vm4038_vm0, %v4037_v1  ;;  %3912 = vmatpush3.bf16.msra.mxu1 %v3971_v35 }
0x24ef   : > { %3913 = vmatprep.subr.bf16.mxu1 %v4037_v1 }
0x25c0   : > { %v2936_v39 = vpop.f32.mrb[96].mxu1 }
0x25c1   : > { %v2942_v41 = vpack.c.bf16 %v2936_v39, %v2936_v39  ;;  %v3903_v42 = vpop.f32.mrb[97].mxu1  ;;  %v3982_v39 = vld [vmem:[%s4782_s2 + $0x140] sm:$0xff]  }
0x25c2   : > { %v2939_v44 = vpop.f32.mrb[98].mxu1 }
0x25c3   : > { %v3904_v45 = vpop.f32.mrb[99].mxu1  ;;  %3908 = vmatmul.mubr.msk.bf16.vlgmr.msra.gmra.mrb[100].mxu0 %vm476_vm4, %v2942_v41 }
0x25c4   : > { %3935 = vmatprep.mubr.msk.bf16.mxu0 %vm4038_vm0, %v4037_v1  ;;  %3920 = vmatpush3.bf16.msra.mxu0 %v3973_v32 }
0x25c5   : > { %3921 = vmatprep.subr.bf16.mxu0 %v4037_v1 }
0x25c8   : > { %3922 = vmatpush3.bf16.msra.mxu0 %v3974_v2 }
0x25c9   : > { %3923 = vmatprep.subr.bf16.mxu0 %v4037_v1 }
0x25cc   : > { %3924 = vmatpush3.bf16.msra.mxu0 %v3975_v4 }
0x25cd   : > { %3925 = vmatprep.subr.bf16.mxu0 %v4037_v1 }
0x25d0   : > { %3926 = vmatpush3.bf16.msra.mxu0 %v3976_v14 }
0x25d1   : > { %3927 = vmatprep.subr.bf16.mxu0 %v4037_v1 }
0x25d4   : > { %3928 = vmatpush3.bf16.msra.mxu0 %v3977_v15 }
0x25d5   : > { %3929 = vmatprep.subr.bf16.mxu0 %v4037_v1 }
0x25d8   : > { %3930 = vmatpush3.bf16.msra.mxu0 %v3978_v6 }
0x25d9   : > { %3931 = vmatprep.subr.bf16.mxu0 %v4037_v1 }
0x25dc   : > { %3932 = vmatpush3.bf16.msra.mxu0 %v3979_v16 }
0x25dd   : > { %3933 = vmatprep.subr.bf16.mxu0 %v4037_v1 }
0x25e0   : > { %3934 = vmatpush3.bf16.msra.mxu0 %v3980_v17 }
0x2696   : > { %v2983_v47 = vpop.f32.mrb[100].mxu0 }
0x2697   : > { %v2989_v48 = vadd.f32 %v2983_v47, %v2688_v56  ;;  %v3909_v49 = vpop.f32.mrb[101].mxu0  ;;  %v3450_v47 = vld [vmem:[%s4783_s3 + $0xa0] ss:$0 sm:$0xff] }
0x2698   : > { %v2986_v50 = vpop.f32.mrb[102].mxu0 }
0x2699   : > { %v4693_v54 = vadd.f32 %v2989_v48, %v4438_v26  ;;  %v3910_v55 = vpop.f32.mrb[103].mxu0  ;;  %v3972_v26 = vld [vmem:[%s4782_s2 + $0xf0] sm:$0xff]  }
0x269a   : > { %3914 = vmatpush3.bf16.msra.mxu1 %v3972_v26  ;;  %v3452_v55 = vld [vmem:[%s4783_s3 + $0xb0] ss:$0 sm:$0xff] }
0x269b   : > { %v2993_v57 = vsel %vm288_vm2, %v4693_v54, 0.0  ;;  %3939 = vmatprep.subr.bf16.mxu1 %v4037_v1 }
0x269c   : > { %2994 = vadd.xlane.f32.xlu0 %v2993_v57 }
0x2729   : > { %v2995_v8 = vpop.xlane.xlu0 %2994 }
0x272a   : > { %v2996_v58 = vmul.f32 0.03125, %v2995_v8 }
0x272c   : > { %v2997_v60 = vsub.f32 %v4693_v54, %v2996_v58 }
0x272e   : > { %v2998_v61 = vmul.f32 %v2997_v60, %v2997_v60 }
0x2730   : > { %v2999_v62 = vsel %vm288_vm2, %v2998_v61, 0.0 }
0x2731   : > { %3000 = vadd.xlane.f32.xlu1 %v2999_v62 }
0x27be   : > { %v3001_v37 = vpop.xlane.xlu1 %3000 }
0x27bf   : > { %v3002_v5 = vmul.f32 0.03125, %v3001_v37 }
0x27c1   : > { %v3003_v7 = vadd.f32 1e-06, %v3002_v5 }
0x27c3   : > { %4023 = vrsqrt.f32 %v3003_v7 }
0x27cd   : > { %v4024_v51 = vpop.eup %4023 }
0x27ce   : > { %v3005_v11 = vmul.f32 %v4024_v51, %v2997_v60 }
0x27d0   : > { %v3010_v59 = vmul.f32 %v3435_v10, %v3005_v11 }
0x27d2   : > { %v3015_v56 = vadd.f32 %v3436_v12, %v3010_v59 }
0x27d4   : > { %v3016_v46 = vpack.c.bf16 %v3015_v56, %v3015_v56 }
0x27d6   : > { %3916 = vmatmul.mubr.msk.bf16.vlgmr.msra.gmra.mrb[100].mxu1 %vm288_vm2, %v3016_v46 }
0x27d7   : > { %3943 = vmatprep.mubr.msk.bf16.mxu1 %vm4038_vm0, %v4037_v1  ;;  %3940 = vmatpush3.bf16.msra.mxu1 %v3981_v38 }
0x27d8   : > { %3941 = vmatprep.subr.bf16.mxu1 %v4037_v1  ;;  %v3451_v1 = vld [vmem:[%s4783_s3 + $0xa8] ss:$0 sm:$0xff] }
0x27db   : > { %3942 = vmatpush3.bf16.msra.mxu1 %v3982_v39 }
0x28a9   : > { %v3075_v36 = vpop.f32.mrb[100].mxu1 }
0x28aa   : > { %v3076_v18 = vadd.f32 %v3437_v52, %v3075_v36  ;;  %v3917_v19 = vpop.f32.mrb[101].mxu1 }
0x28ab   : > { %v3078_v20 = vpop.f32.mrb[102].mxu1 }
0x28ac   : > { %v3082_v9 = vmul.f32 0.70710677, %v3076_v18  ;;  %v3918_v21 = vpop.f32.mrb[103].mxu1  ;;  %v3081_v63 = vmul.f32 0.5, %v3076_v18 }
0x28ae   : > { %4025 = verf.f32 %v3082_v9 }
0x28b8   : > { %v4026_v13 = vpop.eup %4025 }
0x28b9   : > { %v3084_v22 = vadd.f32 1.0, %v4026_v13 }
0x28bb   : > { %v3085_v23 = vmul.f32 %v3084_v22, %v3081_v63 }
0x28bd   : > { %v3102_v40 = vpack.c.bf16 %v3085_v23, %v3085_v23 }
0x28bf   : > { %3936 = vmatmul.mubr.bf16.vlgmr.msra.gmra.mrb[104].mxu0 %v3102_v40 }
0x2992   : > { %v3185_v24 = vpop.f32.mrb[104].mxu0 }
0x2993   : > { %v3191_v0 = vadd.f32 %v3185_v24, %v4693_v54  ;;  %v3937_v25 = vpop.f32.mrb[105].mxu0 }
0x2994   : > { %v3188_v27 = vpop.f32.mrb[106].mxu0 }
0x2995   : > { %v3938_v43 = vpop.f32.mrb[107].mxu0  ;;  %v3197_v28 = vadd.f32 %v3449_v53, %v3191_v0 }
0x2997   : > { %v3200_v29 = vsel %vm288_vm2, %v3197_v28, 0.0 }
0x2998   : > { %3201 = vadd.xlane.f32.xlu0 %v3200_v29 }
0x2a25   : > { %v3202_v30 = vpop.xlane.xlu0 %3201 }
0x2a26   : > { %v3203_v31 = vmul.f32 0.03125, %v3202_v30 }
0x2a28   : > { %v3204_v3 = vsub.f32 %v3197_v28, %v3203_v31 }
0x2a2a   : > { %v3205_v33 = vmul.f32 %v3204_v3, %v3204_v3 }
0x2a2c   : > { %v3206_v34 = vsel %vm288_vm2, %v3205_v33, 0.0 }
0x2a2d   : > { %3207 = vadd.xlane.f32.xlu1 %v3206_v34 }
0x2aba   : > { %v3208_v41 = vpop.xlane.xlu1 %3207 }
0x2abb   : > { %v3209_v42 = vmul.f32 0.03125, %v3208_v41 }
0x2abd   : > { %v3210_v44 = vadd.f32 1e-06, %v3209_v42 }
0x2abf   : > { %4027 = vrsqrt.f32 %v3210_v44 }
0x2ac9   : > { %v4028_v45 = vpop.eup %4027 }
0x2aca   : > { %v3212_v48 = vmul.f32 %v4028_v45, %v3204_v3 }
0x2acc   : > { %v3217_v49 = vmul.f32 %v3450_v47, %v3212_v48 }
0x2ace   : > { %v3222_v50 = vadd.f32 %v3451_v1, %v3217_v49 }
0x2ad0   : > { %v3227_v54 = vpack.c.bf16 %v3222_v50, %v3222_v50 }
0x2ad2   : > { %3944 = vmatmul.mubr.msk.bf16.vlgmr.msra.gmra.mrb[104].mxu1 %vm288_vm2, %v3227_v54 }
0x2ba5   : > { %v3282_v57 = vpop.f32.mrb[104].mxu1 }
0x2ba6   : > { %v3283_v8 = vadd.f32 %v3452_v55, %v3282_v57  ;;  %v3945_v58 = vpop.f32.mrb[105].mxu1 }
0x2ba7   : > { %v3285_v60 = vpop.f32.mrb[106].mxu1 }
0x2ba8   : > { %3288 = vst [vmem:[%s209_s17] sm:$0xff] %v3283_v8  ;;  %v3946_v61 = vpop.f32.mrb[107].mxu1 }
0x2ba9 PF: > { %s14_s15 = sadd.s32 1, %s4035_s15  }
0x2baa   : > { %p11_p4 = scmp.ge.s32.totalorder %s14_s15, 4  }
0x2bac   :  { %13 = sbr.rel (!%p11_p4) target bundleno = 1 (0x1), region = 69 }

// kernel: mae_forward.3
= control target key start
LH: loop header
LB: loop body
LE: loop exit
PB: predicated region body
PF: predicated region fallthrough
CT: control target
= control target key end

     0   :  { %s3072_s21 = smov 0   ;;  %s3553_s0 = inlined_call_operand.vmem [shape: f32[2,24,32], index: 0, kind: input, shape index: {}]   ;;  %s3554_s1 = inlined_call_operand.vmem [shape: bf16[320,128], index: 1, kind: input, shape index: {}]   ;;  %s3555_s2 = inlined_call_operand.vmem [shape: f32[104,128], index: 2, kind: input, shape index: {}]   ;;  %s3556_s3 = inlined_call_operand.vmem [shape: f32[2,24,128], index: 3, kind: input, shape index: {}]   ;;  %s3557_s4 = inlined_call_operand.vmem [shape: f32[2,24,1], index: 4, kind: input, shape index: {}]   ;;  %s3558_s5 = inlined_call_operand.vmem [shape: f32[2,24,128], index: 5, kind: output, shape index: {0}]   ;;  %s3559_s6 = inlined_call_operand.vmem [shape: f32[2,1,128], index: 6, kind: output, shape index: {1}]  }
   0x1 LB: > { %s2522_s22 = sadd.s32 4294967295, %s3034_s21   ;;  %p2526_p0 = scmp.ge.s32.totalorder %s3034_s21, 1  ;;  %s3034_s21 = sphi %s3072_s21, %s17_s21  }
   0x2   : > { %p235_p1 = scmp.lt.s32.totalorder %s3034_s21, 3 }
   0x4   : > { %p236_p2 = pnand %p2526_p0, %p235_p1 }
   0x5   : > { %p278_p3 = scmp.lt.s32.totalorder (!%p236_p2), %s2522_s22, 1  ;;  %vm311_vm0 = vcmask (!%p236_p2), 261120   ;;  %v381_v21 = vld [vmem:[%s3554_s1] sm:$0xf] (!%p236_p2)  ;;  %v443_v23 = vld [vmem:[%s3554_s1 + $0x10] sm:$0xf] (!%p236_p2)  ;;  %v302_v52 = vlaneseq (!%p236_p2) }
   0x6   : > { %239 = sbr.rel (%p236_p2) target bundleno = 6218 (0x184a), region = 40  ;;  %2901 = vmatprep.subr.msk.bf16.mxu0 (!%p236_p2), %vm311_vm0, %v381_v21  ;;  %v393_v22 = vsel (!%p236_p2), %vm311_vm0, %v381_v21, 0  ;;  %v2531_v35 = vld [vmem:[%s3555_s2] ss:$0 sm:$0xff] (!%p236_p2)  ;;  %v2532_v41 = vld [vmem:[%s3555_s2 + $0x8] ss:$0 sm:$0xff] (!%p236_p2) }
   0x7   : > { %2706 = vmatpush3.bf16.xpose.msra.mxu0 (!%p236_p2), %v393_v22  ;;  %v449_v49 = vsel (!%p236_p2), %vm311_vm0, %v443_v23, 0  ;;  %v499_v50 = vld [vmem:[%s3554_s1 + $0x20] sm:$0xf] (!%p236_p2)  ;;  %v3138_v53 = vshrl.u32 (!%p236_p2), %v302_v52, 7  ;;  %v3144_v55 = vld [vmem:[%s3555_s2 + $0x10] sm:$0xf] (!%p236_p2) }
   0x8   : > { %2902 = vmatprep.subr.msk.bf16.mxu0 (!%p236_p2), %vm311_vm0, %v443_v23  ;;  %v505_v51 = vsel (!%p236_p2), %vm311_vm0, %v499_v50, 0  ;;  %v3150_v63 = vld [vmem:[%s3555_s2 + $0x18] sm:$0xf] (!%p236_p2)  ;;  %vm559_vm1 = vcmask (!%p236_p2), 64512   ;;  %v784_v22 = vld [vmem:[%s3554_s1 + $0x4] sm:$0xf] (!%p236_p2) }
   0x9   : > { %v384_v54 = vsub.s32 (!%p236_p2), 0, %v3138_v53  ;;  %vm670_vm2 = vcmask (!%p236_p2), 1043456   ;;  %vm626_vm4 = vcmask (!%p236_p2), 195584   ;;  %vm2400_vm5 = vcmask (!%p236_p2), 7168  }
   0xb   : > { %v385_v56 = vrot.slane (!%p236_p2), %v3144_v55, %v384_v54 }
   0xd   : > { %s3561_s22 = smov (!%p278_p3, %s2522_s22), 1 }
   0xe   : > { %s3083_s23 = smul.u32 24, %s3561_s22  ;;  %s300_s12 = scalar_lea.vmem %s3559_s6, %s3561_s22 }
  0x10   : > { %s3089_s26 = scalar_lea.vmem %s3553_s0, %s3083_s23  ;;  %s287_s29 = scalar_lea.vmem %s3556_s3, %s3083_s23 }
  0x11   : > { %v306_v0 = vld [vmem:[%s3089_s26] sm:$0xff]  ;;  %v308_v1 = vld [vmem:[%s3089_s26 + $0x10] sm:$0xff]  ;;  %v307_v2 = vld [vmem:[%s3089_s26 + $0x8] sm:$0xff]  ;;  %s297_s7 = scalar_lea.vmem %s3558_s5, %s3083_s23  ;;  %s292_s10 = scalar_lea.vmem %s3557_s4, %s3083_s23 }
  0x12   : > { %v312_v3 = vsel %vm311_vm0, %v306_v0, 0.0  ;;  %v318_v4 = vsel %vm311_vm0, %v308_v1, 0.0  ;;  %v315_v5 = vsel %vm311_vm0, %v307_v2, 0.0 }
  0x13   : > { %313 = vadd.xlane.f32.xlu0 %v312_v3  ;;  %319 = vadd.xlane.f32.xlu1 %v318_v4 }
  0x17   : > { %316 = vadd.xlane.f32.xlu0 %v315_v5 }
  0xa0   : > { %v314_v6 = vpop.xlane.xlu0 %313  ;;  %v320_v7 = vpop.xlane.xlu1 %319 }
  0xa1   : > { %v322_v8 = vmul.f32 0.03125, %v314_v6  ;;  %v324_v9 = vmul.f32 0.03125, %v320_v7 }
  0xa3   : > { %v325_v10 = vsub.f32 %v306_v0, %v322_v8  ;;  %v327_v11 = vsub.f32 %v308_v1, %v324_v9  ;;  %v447_v1 = vrot.slane %v3150_v63, %v384_v54  ;;  %v3157_v9 = vld [vmem:[%s3555_s2 + $0x20] sm:$0xf] }
  0xa4   : > { %v317_v12 = vpop.xlane.xlu0 %316 }
  0xa5   : > { %v323_v13 = vmul.f32 0.03125, %v317_v12  ;;  %v328_v14 = vmul.f32 %v325_v10, %v325_v10  ;;  %v330_v15 = vmul.f32 %v327_v11, %v327_v11  ;;  %v503_v12 = vrot.slane %v3157_v9, %v384_v54 }
  0xa7   : > { %v326_v16 = vsub.f32 %v307_v2, %v323_v13  ;;  %v331_v17 = vsel %vm311_vm0, %v328_v14, 0.0  ;;  %v337_v18 = vsel %vm311_vm0, %v330_v15, 0.0 }
  0xa8   : > { %332 = vadd.xlane.f32.xlu1 %v331_v17 }
  0xa9   : > { %v329_v19 = vmul.f32 %v326_v16, %v326_v16 }
  0xab   : > { %v334_v20 = vsel %vm311_vm0, %v329_v19, 0.0 }
  0xac   : > { %338 = vadd.xlane.f32.xlu1 %v337_v18  ;;  %335 = vadd.xlane.f32.xlu0 %v334_v20 }
 0x135   : > { %v333_v24 = vpop.xlane.xlu1 %332 }
 0x136   : > { %v340_v25 = vmul.f32 0.03125, %v333_v24 }
 0x138   : > { %v343_v26 = vadd.f32 1e-06, %v340_v25 }
 0x139   : > { %v339_v27 = vpop.xlane.xlu1 %338  ;;  %v336_v28 = vpop.xlane.xlu0 %335 }
 0x13a   : > { %2953 = vrsqrt.f32 %v343_v26  ;;  %v342_v29 = vmul.f32 0.03125, %v339_v27  ;;  %v341_v30 = vmul.f32 0.03125, %v336_v28  ;;  %v790_v28 = vsel %vm311_vm0, %v784_v22, 0 }
 0x13c   : > { %v345_v31 = vadd.f32 1e-06, %v342_v29  ;;  %v344_v32 = vadd.f32 1e-06, %v341_v30  ;;  %v896_v29 = vld [vmem:[%s3554_s1 + $0x24] sm:$0xf] }
 0x13d   : > { %v902_v30 = vsel %vm311_vm0, %v896_v29, 0 }
 0x13e   : > { %2955 = vrsqrt.f32 %v345_v31  ;;  %v303_v31 = vand.u32 127, %v302_v52 }
 0x13f   : > { %2957 = vrsqrt.f32 %v344_v32 }
 0x140   : > { %vm304_vm3 = vcmp.lt.s32.totalorder %v303_v31, 17 }
 0x144   : > { %v2954_v33 = vpop.eup %2953 }
 0x145   : > { %v349_v34 = vmul.f32 %v2954_v33, %v325_v10  ;;  %v3036_v33 = vmov -1e+30  }
 0x147   : > { %v356_v39 = vmul.f32 %v2531_v35, %v349_v34  ;;  %v3186_v34 = vsel %vm304_vm3, 0.0, %v3036_v33 }
 0x148   : > { %v2956_v36 = vpop.eup %2955 }
 0x149   : > { %v2958_v37 = vpop.eup %2957  ;;  %v351_v38 = vmul.f32 %v2956_v36, %v327_v11  ;;  %v363_v45 = vadd.f32 %v2532_v41, %v356_v39  ;;  %v3189_v36 = vsub.s32 1, %v3138_v53 }
 0x14a   : > { %v350_v40 = vmul.f32 %v2958_v37, %v326_v16 }
 0x14b   : > { %v358_v42 = vmul.f32 %v2531_v35, %v351_v38 }
 0x14c   : > { %v357_v43 = vmul.f32 %v2531_v35, %v350_v40 }
 0x14d   : > { %v365_v44 = vadd.f32 %v2532_v41, %v358_v42 }
 0x14e   : > { %v364_v46 = vadd.f32 %v2532_v41, %v357_v43  ;;  %v788_v43 = vrot.slane %v3144_v55, %v3189_v36 }
 0x14f   : > { %v3115_v47 = vpack.c.bf16 %v365_v44, %v365_v44 }
 0x150   : > { %v3117_v48 = vpack.c.bf16 %v364_v46, %v363_v45 }
 0x152   : > { %2707 = vmatprep.mubr.msk.bf16.mxu0 %vm311_vm0, %v3117_v48 }
 0x153   : > { %2708 = vmatmul.mubr.msk.bf16.vlgmr.msra.gmra.mrb[0].mxu0 %vm311_vm0, %v3115_v47 }
 0x154   : > { %2712 = vmatpush3.bf16.xpose.msra.mxu0 %v449_v49  ;;  %2713 = vmatprep.mubr.msk.bf16.mxu0 %vm311_vm0, %v3117_v48 }
 0x155   : > { %2903 = vmatprep.subr.msk.bf16.mxu0 %vm311_vm0, %v499_v50 }
 0x15b   : > { %2714 = vmatmul.mubr.msk.bf16.vlgmr.msra.gmra.mrb[4].mxu0 %vm311_vm0, %v3115_v47 }
 0x15c   : > { %2718 = vmatpush3.bf16.xpose.msra.mxu0 %v505_v51  ;;  %2719 = vmatprep.mubr.msk.bf16.mxu0 %vm311_vm0, %v3117_v48 }
 0x163   : > { %2720 = vmatmul.mubr.msk.bf16.vlgmr.msra.gmra.mrb[8].mxu0 %vm311_vm0, %v3115_v47 }
 0x226   : > { %v2709_v57 = vpop.f32.mrb[0].mxu0 }
 0x227   : > { %v429_v58 = vpop.f32.mrb[1].mxu0  ;;  %v438_v25 = vadd.f32 %v2709_v57, %v385_v56 }
 0x228   : > { %v2710_v59 = vpop.f32.mrb[2].mxu0  ;;  %v430_v61 = vadd.f32 %v429_v58, %v385_v56 }
 0x229   : > { %v432_v60 = vpop.f32.mrb[3].mxu0  ;;  %v556_v27 = vpack.c.bf16 %v438_v25, %v438_v25  ;;  %v371_v25 = vld [vmem:[%s3554_s1 + $0x30] sm:$0xf] }
 0x22a   : > { %v433_v62 = vadd.f32 %v432_v60, %v385_v56 }
 0x22c   : > { %v555_v0 = vpack.c.bf16 %v433_v62, %v430_v61  ;;  %v900_v61 = vrot.slane %v3157_v9, %v3189_v36 }
 0x22e   : > { %v2715_v2 = vpop.f32.mrb[4].mxu0  ;;  %2727 = vmatprep.mubr.msk.bf16.mxu1 %vm559_vm1, %v555_v0 }
 0x22f   : > { %v485_v3 = vpop.f32.mrb[5].mxu0  ;;  %v494_v6 = vadd.f32 %v2715_v2, %v447_v1 }
 0x230   : > { %v2716_v4 = vpop.f32.mrb[6].mxu0  ;;  %v486_v7 = vadd.f32 %v485_v3, %v447_v1 }
 0x231   : > { %v488_v5 = vpop.f32.mrb[7].mxu0  ;;  %v558_v11 = vpack.c.bf16 %v494_v6, %v494_v6 }
 0x232   : > { %v489_v8 = vadd.f32 %v488_v5, %v447_v1 }
 0x233   : > { %v570_v24 = vsel %vm559_vm1, %v558_v11, 0 }
 0x234   : > { %v557_v10 = vpack.c.bf16 %v489_v8, %v486_v7 }
 0x236   : > { %v2721_v13 = vpop.f32.mrb[8].mxu0  ;;  %2904 = vmatprep.subr.msk.bf16.mxu1 %vm559_vm1, %v557_v10  ;;  %v567_v14 = vsel %vm559_vm1, %v557_v10, 0 }
 0x237   : > { %v541_v15 = vpop.f32.mrb[9].mxu0  ;;  %2724 = vmatpush3.bf16.xpose.msra.mxu1 %v567_v14  ;;  %v550_v18 = vadd.f32 %v2721_v13, %v503_v12 }
 0x238   : > { %v2722_v16 = vpop.f32.mrb[10].mxu0  ;;  %2905 = vmatprep.subr.msk.bf16.mxu1 %vm559_vm1, %v558_v11  ;;  %v542_v19 = vadd.f32 %v541_v15, %v503_v12 }
 0x239   : > { %v544_v17 = vpop.f32.mrb[11].mxu0  ;;  %v663_v23 = vpack.c.bf16 %v550_v18, %v550_v18 }
 0x23a   : > { %v545_v20 = vadd.f32 %v544_v17, %v503_v12 }
 0x23b   : > { %v672_v26 = vsel %vm670_vm2, %v663_v23, 0 }
 0x23c   : > { %v662_v21 = vpack.c.bf16 %v545_v20, %v542_v19 }
 0x23e   : > { %2731 = vmatprep.subr.bf16.mxu0 %v662_v21 }
 0x23f   : > { %2726 = vmatpush3.bf16.xpose.msra.mxu1 %v570_v24  ;;  %2732 = vmatpush3.bf16.msra.mxu0 %v662_v21 }
 0x240   : > { %2906 = vmatprep.subr.msk.bf16.mxu0 %vm670_vm2, %v663_v23  ;;  %2908 = vmatprep.subr.msk.bf16.mxu1 %vm311_vm0, %v784_v22 }
 0x243   : > { %2734 = vmatpush3.bf16.msra.mxu0 %v672_v26 }
 0x244   : > { %2907 = vmatprep.subr.msk.bf16.mxu0 %vm670_vm2, %v371_v25 }
 0x246   : > { %2728 = vmatmul.mubr.msk.bf16.vlgmr.msra.gmra.mrb[0].mxu1 %vm559_vm1, %v556_v27 }
 0x247   : > { %2746 = vmatpush3.bf16.xpose.msra.mxu1 %v790_v28  ;;  %2747 = vmatprep.mubr.msk.bf16.mxu1 %vm311_vm0, %v3117_v48 }
 0x248   : > { %2910 = vmatprep.subr.msk.bf16.mxu1 %vm311_vm0, %v896_v29 }
 0x24e   : > { %2748 = vmatmul.mubr.msk.bf16.vlgmr.msra.gmra.mrb[4].mxu1 %vm311_vm0, %v3115_v47 }
 0x24f   : > { %2758 = vmatpush3.bf16.xpose.msra.mxu1 %v902_v30  ;;  %2759 = vmatprep.mubr.msk.bf16.mxu1 %vm311_vm0, %v3117_v48 }
 0x256   : > { %2760 = vmatmul.mubr.msk.bf16.vlgmr.msra.gmra.mrb[8].mxu1 %vm311_vm0, %v3115_v47 }
 0x319   : > { %v2729_v32 = vpop.f32.mrb[0].mxu1 }
 0x31a   : > { %v606_v35 = vpop.f32.mrb[1].mxu1  ;;  %v622_v37 = vmul.f32 0.35355338, %v2729_v32 }
 0x31b   : > { %v620_v38 = vmul.f32 0.35355338, %v606_v35  ;;  %v2730_v39 = vpop.f32.mrb[2].mxu1 }
 0x31c   : > { %v609_v40 = vpop.f32.mrb[3].mxu1  ;;  %v625_v46 = vadd.f32 %v622_v37, %v3186_v34  ;;  %v731_v39 = vsel %vm670_vm2, %v371_v25, 0 }
 0x31d   : > { %v621_v41 = vmul.f32 0.35355338, %v609_v40  ;;  %v623_v42 = vadd.f32 %v620_v38, %v3186_v34  ;;  %v840_v40 = vld [vmem:[%s3554_s1 + $0x14] sm:$0xf] }
 0x31e   : > { %v633_v56 = vsel %vm626_vm4, %v625_v46, -inf }
 0x31f   : > { %v627_v44 = vsel %vm626_vm4, %v623_v42, -inf  ;;  %v624_v45 = vadd.f32 %v621_v41, %v3186_v34 }
 0x320   : > { %628 = vmax.xlane.f32.xlu0 %v627_v44 }
 0x321   : > { %v2749_v49 = vpop.f32.mrb[4].mxu1  ;;  %v630_v50 = vsel %vm626_vm4, %v624_v45, -inf }
 0x322   : > { %v3198_v51 = vadd.f32 %v2749_v49, %v788_v43  ;;  %v826_v52 = vpop.f32.mrb[5].mxu1  ;;  %631 = vmax.xlane.f32.xlu1 %v630_v50  ;;  %v846_v49 = vsel %vm311_vm0, %v840_v40, 0 }
 0x323   : > { %v2750_v54 = vpop.f32.mrb[6].mxu1  ;;  %v3201_v58 = vadd.f32 %v826_v52, %v788_v43 }
 0x324   : > { %634 = vmax.xlane.f32.xlu0 %v633_v56  ;;  %v829_v57 = vpop.f32.mrb[7].mxu1 }
 0x325   : > { %v3203_v59 = vadd.f32 %v829_v57, %v788_v43  ;;  %v844_v57 = vrot.slane %v3150_v63, %v3189_v36  ;;  %v1178_v36 = vld [vmem:[%s3554_s1 + $0x8] sm:$0xf] }
 0x327   : > { %v952_v60 = vpack.c.bf16 %v3203_v59, %v3201_v58 }
 0x329   : > { %v2761_v62 = vpop.f32.mrb[8].mxu1 }
 0x32a   : > { %v938_v0 = vpop.f32.mrb[9].mxu1  ;;  %v947_v3 = vadd.f32 %v2761_v62, %v900_v61 }
 0x32b   : > { %v2762_v1 = vpop.f32.mrb[10].mxu1  ;;  %v939_v4 = vadd.f32 %v938_v0, %v900_v61 }
 0x32c   : > { %v941_v2 = vpop.f32.mrb[11].mxu1  ;;  %v1058_v7 = vpack.c.bf16 %v947_v3, %v947_v3 }
 0x32d   : > { %v942_v5 = vadd.f32 %v941_v2, %v900_v61 }
 0x32e   : > { %v1066_v8 = vsel %vm670_vm2, %v1058_v7, 0 }
 0x32f   : > { %v1057_v6 = vpack.c.bf16 %v942_v5, %v939_v4 }
 0x331   : > { %2771 = vmatprep.subr.bf16.mxu1 %v1057_v6 }
 0x332   : > { %2772 = vmatpush3.bf16.msra.mxu1 %v1057_v6  ;;  %v953_v6 = vpack.c.bf16 %v3198_v51, %v3198_v51 }
 0x333   : > { %2913 = vmatprep.subr.msk.bf16.mxu1 %vm670_vm2, %v1058_v7  ;;  %v1184_v7 = vsel %vm311_vm0, %v1178_v36, 0 }
 0x336   : > { %2774 = vmatpush3.bf16.msra.mxu1 %v1066_v8  ;;  %v1290_v8 = vld [vmem:[%s3554_s1 + $0x28] sm:$0xf] }
 0x3ad   : > { %v629_v10 = vpop.xlane.xlu0 %628 }
 0x3ae   : > { %v636_v11 = vsub.f32 %v623_v42, %v629_v10  ;;  %v1296_v10 = vsel %vm311_vm0, %v1290_v8, 0 }
 0x3af   : > { %v632_v12 = vpop.xlane.xlu1 %631 }
 0x3b0   : > { %v639_v13 = vmul.f32 1.442695, %v636_v11  ;;  %v637_v14 = vsub.f32 %v624_v45, %v632_v12  ;;  %v3270_v12 = vsub.s32 2, %v3138_v53 }
 0x3b1   : > { %v635_v15 = vpop.xlane.xlu0 %634 }
 0x3b2   : > { %2959 = vpow2.f32 %v639_v13  ;;  %v641_v16 = vmul.f32 1.442695, %v637_v14  ;;  %v638_v17 = vsub.f32 %v625_v46, %v635_v15 }
 0x3b4   : > { %2961 = vpow2.f32 %v641_v16  ;;  %v643_v18 = vmul.f32 1.442695, %v638_v17 }
 0x3b6   : > { %2963 = vpow2.f32 %v643_v18 }
 0x3bc   : > { %v2960_v19 = vpop.eup %2959 }
 0x3bd   : > { %v645_v20 = vsel %vm626_vm4, %v2960_v19, 0.0 }
 0x3be   : > { %v2962_v21 = vpop.eup %2961  ;;  %646 = vadd.xlane.f32.xlu1 %v645_v20 }
 0x3bf   : > { %v648_v22 = vsel %vm626_vm4, %v2962_v21, 0.0 }
 0x3c0   : > { %v2964_v23 = vpop.eup %2963  ;;  %649 = vadd.xlane.f32.xlu0 %v648_v22 }
 0x3c1   : > { %v651_v24 = vsel %vm626_vm4, %v2964_v23, 0.0 }
 0x3c2   : > { %652 = vadd.xlane.f32.xlu1 %v651_v24 }
 0x44b   : > { %v647_v26 = vpop.xlane.xlu1 %646 }
 0x44c   : > { %2965 = vrcp.f32 %v647_v26 }
 0x44d   : > { %v650_v27 = vpop.xlane.xlu0 %649 }
 0x44e   : > { %2967 = vrcp.f32 %v650_v27 }
 0x44f   : > { %v653_v28 = vpop.xlane.xlu1 %652 }
 0x450   : > { %2969 = vrcp.f32 %v653_v28 }
 0x456   : > { %v2966_v29 = vpop.eup %2965 }
 0x457   : > { %v657_v31 = vmul.f32 %v2966_v29, %v2960_v19  ;;  %v1182_v19 = vrot.slane %v3144_v55, %v3270_v12 }
 0x458   : > { %v2968_v30 = vpop.eup %2967 }
 0x459   : > { %v658_v32 = vmul.f32 %v2968_v30, %v2962_v21 }
 0x45a   : > { %v2970_v33 = vpop.eup %2969 }
 0x45b   : > { %v659_v35 = vmul.f32 %v2970_v33, %v2964_v23  ;;  %v660_v37 = vpack.c.bf16 %v658_v32, %v657_v31  ;;  %v1294_v33 = vrot.slane %v3157_v9, %v3270_v12 }
 0x45d   : > { %2735 = vmatprep.mubr.msk.bf16.mxu0 %vm626_vm4, %v660_v37  ;;  %v661_v38 = vpack.c.bf16 %v659_v35, %v659_v35 }
 0x45f   : > { %2736 = vmatmul.mubr.msk.bf16.vlgmr.msra.gmra.mrb[12].mxu0 %vm626_vm4, %v661_v38 }
 0x460   : > { %2740 = vmatpush3.bf16.msra.mxu0 %v731_v39 }
 0x461   : > { %2909 = vmatprep.subr.msk.bf16.mxu0 %vm311_vm0, %v840_v40 }
 0x532   : > { %v2737_v41 = vpop.f32.mrb[12].mxu0 }
 0x533   : > { %v708_v42 = vpop.f32.mrb[13].mxu0  ;;  %v723_v46 = vpack.c.bf16 %v2737_v41, %v2737_v41 }
 0x534   : > { %v2738_v43 = vpop.f32.mrb[14].mxu0 }
 0x535   : > { %v711_v44 = vpop.f32.mrb[15].mxu0 }
 0x536   : > { %v722_v45 = vpack.c.bf16 %v711_v44, %v708_v42 }
 0x538   : > { %2741 = vmatprep.mubr.msk.bf16.mxu0 %vm559_vm1, %v722_v45 }
 0x539   : > { %2742 = vmatmul.mubr.msk.bf16.vlgmr.msra.gmra.mrb[16].mxu0 %vm559_vm1, %v723_v46 }
 0x53a   : > { %2752 = vmatpush3.bf16.xpose.msra.mxu0 %v846_v49  ;;  %2753 = vmatprep.mubr.msk.bf16.mxu0 %vm311_vm0, %v3117_v48 }
 0x541   : > { %2754 = vmatmul.mubr.msk.bf16.vlgmr.msra.gmra.mrb[20].mxu0 %vm311_vm0, %v3115_v47 }
 0x542   : > { %2767 = vmatprep.mubr.msk.bf16.mxu0 %vm559_vm1, %v952_v60 }
 0x60c   : > { %v3236_v50 = vpop.f32.mrb[16].mxu0 }
 0x60d   : > { %v3238_v52 = vpop.f32.mrb[17].mxu0 }
 0x60e   : > { %v2744_v54 = vpop.f32.mrb[18].mxu0 }
 0x60f   : > { %v3240_v56 = vpop.f32.mrb[19].mxu0 }
 0x614   : > { %v2755_v61 = vpop.f32.mrb[20].mxu0 }
 0x615   : > { %v882_v62 = vpop.f32.mrb[21].mxu0  ;;  %v891_v2 = vadd.f32 %v2755_v61, %v844_v57 }
 0x616   : > { %v2756_v0 = vpop.f32.mrb[22].mxu0  ;;  %v883_v3 = vadd.f32 %v882_v62, %v844_v57 }
 0x617   : > { %v885_v1 = vpop.f32.mrb[23].mxu0  ;;  %v955_v59 = vpack.c.bf16 %v891_v2, %v891_v2 }
 0x618   : > { %v886_v4 = vadd.f32 %v885_v1, %v844_v57 }
 0x619   : > { %v966_v5 = vsel %vm559_vm1, %v955_v59, 0 }
 0x61a   : > { %v954_v58 = vpack.c.bf16 %v886_v4, %v883_v3 }
 0x61c   : > { %2911 = vmatprep.subr.msk.bf16.mxu0 %vm559_vm1, %v954_v58  ;;  %v963_v60 = vsel %vm559_vm1, %v954_v58, 0 }
 0x61d   : > { %2764 = vmatpush3.bf16.xpose.msra.mxu0 %v963_v60 }
 0x61e   : > { %2912 = vmatprep.subr.msk.bf16.mxu0 %vm559_vm1, %v955_v59 }
 0x625   : > { %2766 = vmatpush3.bf16.xpose.msra.mxu0 %v966_v5  ;;  %v372_v5 = vld [vmem:[%s3554_s1 + $0x34] sm:$0xf] }
 0x626   : > { %2915 = vmatprep.subr.msk.bf16.mxu0 %vm311_vm0, %v1178_v36  ;;  %2914 = vmatprep.subr.msk.bf16.mxu1 %vm670_vm2, %v372_v5 }
 0x62c   : > { %2768 = vmatmul.mubr.msk.bf16.vlgmr.msra.gmra.mrb[24].mxu0 %vm559_vm1, %v953_v6 }
 0x62d   : > { %2786 = vmatpush3.bf16.xpose.msra.mxu0 %v1184_v7  ;;  %2787 = vmatprep.mubr.msk.bf16.mxu0 %vm311_vm0, %v3117_v48 }
 0x62e   : > { %2917 = vmatprep.subr.msk.bf16.mxu0 %vm311_vm0, %v1290_v8 }
 0x634   : > { %2788 = vmatmul.mubr.msk.bf16.vlgmr.msra.gmra.mrb[28].mxu0 %vm311_vm0, %v3115_v47 }
 0x635   : > { %2798 = vmatpush3.bf16.xpose.msra.mxu0 %v1296_v10  ;;  %2799 = vmatprep.mubr.msk.bf16.mxu0 %vm311_vm0, %v3117_v48 }
 0x63c   : > { %2800 = vmatmul.mubr.msk.bf16.vlgmr.msra.gmra.mrb[32].mxu0 %vm311_vm0, %v3115_v47 }
 0x6ff   : > { %v2769_v51 = vpop.f32.mrb[24].mxu0 }
 0x700   : > { %v1002_v11 = vpop.f32.mrb[25].mxu0  ;;  %v1018_v13 = vmul.f32 0.35355338, %v2769_v51 }
 0x701   : > { %v1016_v14 = vmul.f32 0.35355338, %v1002_v11  ;;  %v2770_v15 = vpop.f32.mrb[26].mxu0 }
 0x702   : > { %v1005_v16 = vpop.f32.mrb[27].mxu0  ;;  %v1021_v22 = vadd.f32 %v1018_v13, %v3186_v34 }
 0x703   : > { %v1017_v17 = vmul.f32 0.35355338, %v1005_v16  ;;  %v1019_v18 = vadd.f32 %v1016_v14, %v3186_v34 }
 0x704   : > { %v1028_v28 = vsel %vm626_vm4, %v1021_v22, -inf }
 0x705   : > { %v1022_v20 = vsel %vm626_vm4, %v1019_v18, -inf  ;;  %v1020_v21 = vadd.f32 %v1017_v17, %v3186_v34 }
 0x706   : > { %1023 = vmax.xlane.f32.xlu0 %v1022_v20 }
 0x707   : > { %v2789_v23 = vpop.f32.mrb[28].mxu0  ;;  %v1025_v24 = vsel %vm626_vm4, %v1020_v21, -inf }
 0x708   : > { %v3279_v25 = vadd.f32 %v2789_v23, %v1182_v19  ;;  %v1220_v26 = vpop.f32.mrb[29].mxu0  ;;  %1026 = vmax.xlane.f32.xlu1 %v1025_v24 }
 0x709   : > { %v2790_v27 = vpop.f32.mrb[30].mxu0  ;;  %v3282_v30 = vadd.f32 %v1220_v26, %v1182_v19 }
 0x70a   : > { %1029 = vmax.xlane.f32.xlu0 %v1028_v28  ;;  %v1223_v29 = vpop.f32.mrb[31].mxu0  ;;  %v2533_v28 = vld [vmem:[%s3555_s2 + $0x28] ss:$0 sm:$0xff] }
 0x70b   : > { %v3284_v31 = vadd.f32 %v1223_v29, %v1182_v19  ;;  %v1234_v19 = vld [vmem:[%s3554_s1 + $0x18] sm:$0xf]  ;;  %v783_v29 = vadd.f32 %v3236_v50, %v2533_v28 }
 0x70c   : > { %v1240_v27 = vsel %vm311_vm0, %v1234_v19, 0 }
 0x70d   : > { %v1346_v32 = vpack.c.bf16 %v3284_v31, %v3282_v30 }
 0x70f   : > { %v2801_v35 = vpop.f32.mrb[32].mxu0 }
 0x710   : > { %v1332_v37 = vpop.f32.mrb[33].mxu0  ;;  %v1341_v40 = vadd.f32 %v2801_v35, %v1294_v33 }
 0x711   : > { %v2802_v38 = vpop.f32.mrb[34].mxu0  ;;  %v1333_v41 = vadd.f32 %v1332_v37, %v1294_v33 }
 0x712   : > { %v1335_v39 = vpop.f32.mrb[35].mxu0  ;;  %v1452_v44 = vpack.c.bf16 %v1341_v40, %v1341_v40 }
 0x713   : > { %v1336_v42 = vadd.f32 %v1335_v39, %v1294_v33  ;;  %v781_v33 = vadd.f32 %v2533_v28, %v3238_v52  ;;  %v782_v39 = vadd.f32 %v2533_v28, %v3240_v56 }
 0x714   : > { %v1460_v45 = vsel %vm670_vm2, %v1452_v44, 0 }
 0x715   : > { %v1451_v43 = vpack.c.bf16 %v1336_v42, %v1333_v41 }
 0x717   : > { %2811 = vmatprep.subr.bf16.mxu0 %v1451_v43 }
 0x718   : > { %2812 = vmatpush3.bf16.msra.mxu0 %v1451_v43 }
 0x719   : > { %2920 = vmatprep.subr.msk.bf16.mxu0 %vm670_vm2, %v1452_v44 }
 0x71c   : > { %2814 = vmatpush3.bf16.msra.mxu0 %v1460_v45 }
 0x793   : > { %v1024_v46 = vpop.xlane.xlu0 %1023 }
 0x794   : > { %v1031_v49 = vsub.f32 %v1019_v18, %v1024_v46  ;;  %v1125_v18 = vsel %vm670_vm2, %v372_v5, 0 }
 0x795   : > { %v1027_v54 = vpop.xlane.xlu1 %1026 }
 0x796   : > { %v1034_v57 = vmul.f32 1.442695, %v1031_v49  ;;  %v1032_v61 = vsub.f32 %v1020_v21, %v1027_v54 }
 0x797   : > { %v1030_v62 = vpop.xlane.xlu0 %1029 }
 0x798   : > { %2971 = vpow2.f32 %v1034_v57  ;;  %v1036_v0 = vmul.f32 1.442695, %v1032_v61  ;;  %v1033_v1 = vsub.f32 %v1021_v22, %v1030_v62  ;;  %v1347_v61 = vpack.c.bf16 %v3279_v25, %v3279_v25 }
 0x79a   : > { %2973 = vpow2.f32 %v1036_v0  ;;  %v1038_v2 = vmul.f32 1.442695, %v1033_v1  ;;  %v1684_v0 = vld [vmem:[%s3554_s1 + $0x2c] sm:$0xf] }
 0x79b   : > { %v1690_v1 = vsel %vm311_vm0, %v1684_v0, 0 }
 0x79c   : > { %2975 = vpow2.f32 %v1038_v2 }
 0x7a2   : > { %v2972_v3 = vpop.eup %2971 }
 0x7a3   : > { %v1040_v4 = vsel %vm626_vm4, %v2972_v3, 0.0 }
 0x7a4   : > { %v2974_v58 = vpop.eup %2973  ;;  %1041 = vadd.xlane.f32.xlu1 %v1040_v4 }
 0x7a5   : > { %v1043_v59 = vsel %vm626_vm4, %v2974_v58, 0.0 }
 0x7a6   : > { %v2976_v60 = vpop.eup %2975  ;;  %1044 = vadd.xlane.f32.xlu0 %v1043_v59 }
 0x7a7   : > { %v1046_v36 = vsel %vm626_vm4, %v2976_v60, 0.0 }
 0x7a8   : > { %1047 = vadd.xlane.f32.xlu1 %v1046_v36 }
 0x831   : > { %v1042_v6 = vpop.xlane.xlu1 %1041 }
 0x832   : > { %2977 = vrcp.f32 %v1042_v6 }
 0x833   : > { %v1045_v7 = vpop.xlane.xlu0 %1044 }
 0x834   : > { %2979 = vrcp.f32 %v1045_v7 }
 0x835   : > { %v1048_v8 = vpop.xlane.xlu1 %1047 }
 0x836   : > { %2981 = vrcp.f32 %v1048_v8 }
 0x83c   : > { %v2978_v10 = vpop.eup %2977 }
 0x83d   : > { %v1052_v11 = vmul.f32 %v2978_v10, %v2972_v3  ;;  %v3357_v3 = vsub.s32 3, %v3138_v53 }
 0x83e   : > { %v2980_v51 = vpop.eup %2979 }
 0x83f   : > { %v1053_v13 = vmul.f32 %v2980_v51, %v2974_v58  ;;  %v1576_v6 = vrot.slane %v3144_v55, %v3357_v3 }
 0x840   : > { %v2982_v14 = vpop.eup %2981 }
 0x841   : > { %v1054_v15 = vmul.f32 %v2982_v14, %v2976_v60  ;;  %v1055_v16 = vpack.c.bf16 %v1053_v13, %v1052_v11 }
 0x843   : > { %2775 = vmatprep.mubr.msk.bf16.mxu1 %vm626_vm4, %v1055_v16  ;;  %v1056_v17 = vpack.c.bf16 %v1054_v15, %v1054_v15 }
 0x845   : > { %2776 = vmatmul.mubr.msk.bf16.vlgmr.msra.gmra.mrb[12].mxu1 %vm626_vm4, %v1056_v17 }
 0x846   : > { %2780 = vmatpush3.bf16.msra.mxu1 %v1125_v18 }
 0x847   : > { %2916 = vmatprep.subr.msk.bf16.mxu1 %vm311_vm0, %v1234_v19  ;;  %v1688_v19 = vrot.slane %v3157_v9, %v3357_v3 }
 0x918   : > { %v2777_v20 = vpop.f32.mrb[12].mxu1 }
 0x919   : > { %v1102_v21 = vpop.f32.mrb[13].mxu1  ;;  %v1117_v26 = vpack.c.bf16 %v2777_v20, %v2777_v20 }
 0x91a   : > { %v2778_v22 = vpop.f32.mrb[14].mxu1 }
 0x91b   : > { %v1105_v23 = vpop.f32.mrb[15].mxu1 }
 0x91c   : > { %v1116_v24 = vpack.c.bf16 %v1105_v23, %v1102_v21 }
 0x91e   : > { %2781 = vmatprep.mubr.msk.bf16.mxu1 %vm559_vm1, %v1116_v24 }
 0x91f   : > { %2782 = vmatmul.mubr.msk.bf16.vlgmr.msra.gmra.mrb[16].mxu1 %vm559_vm1, %v1117_v26 }
 0x920   : > { %2792 = vmatpush3.bf16.xpose.msra.mxu1 %v1240_v27  ;;  %2793 = vmatprep.mubr.msk.bf16.mxu1 %vm311_vm0, %v3117_v48 }
 0x927   : > { %2794 = vmatmul.mubr.msk.bf16.vlgmr.msra.gmra.mrb[20].mxu1 %vm311_vm0, %v3115_v47 }
 0x928   : > { %2807 = vmatprep.mubr.msk.bf16.mxu1 %vm559_vm1, %v1346_v32  ;;  %v1238_v32 = vrot.slane %v3150_v63, %v3270_v12  ;;  %v1572_v12 = vld [vmem:[%s3554_s1 + $0xc] sm:$0xf] }
 0x929   : > { %v1578_v62 = vsel %vm311_vm0, %v1572_v12, 0 }
 0x9f2   : > { %v2783_v35 = vpop.f32.mrb[16].mxu1 }
 0x9f3   : > { %v3322_v37 = vadd.f32 %v2783_v35, %v783_v29  ;;  %v1161_v38 = vpop.f32.mrb[17].mxu1 }
 0x9f4   : > { %v3325_v40 = vadd.f32 %v1161_v38, %v781_v33  ;;  %v2784_v41 = vpop.f32.mrb[18].mxu1 }
 0x9f5   : > { %v1164_v30 = vpop.f32.mrb[19].mxu1 }
 0x9f6   : > { %v3327_v31 = vadd.f32 %v1164_v30, %v782_v39 }
 0x9fa   : > { %v2795_v42 = vpop.f32.mrb[20].mxu1 }
 0x9fb   : > { %v1276_v43 = vpop.f32.mrb[21].mxu1  ;;  %v1285_v52 = vadd.f32 %v2795_v42, %v1238_v32 }
 0x9fc   : > { %v2796_v50 = vpop.f32.mrb[22].mxu1  ;;  %v1277_v45 = vadd.f32 %v1276_v43, %v1238_v32 }
 0x9fd   : > { %v1279_v44 = vpop.f32.mrb[23].mxu1  ;;  %v1349_v54 = vpack.c.bf16 %v1285_v52, %v1285_v52 }
 0x9fe   : > { %v1280_v46 = vadd.f32 %v1279_v44, %v1238_v32 }
 0x9ff   : > { %v1360_v57 = vsel %vm559_vm1, %v1349_v54, 0 }
 0xa00   : > { %v1348_v49 = vpack.c.bf16 %v1280_v46, %v1277_v45 }
 0xa02   : > { %2918 = vmatprep.subr.msk.bf16.mxu1 %vm559_vm1, %v1348_v49  ;;  %v1357_v56 = vsel %vm559_vm1, %v1348_v49, 0 }
 0xa03   : > { %2804 = vmatpush3.bf16.xpose.msra.mxu1 %v1357_v56 }
 0xa04   : > { %2919 = vmatprep.subr.msk.bf16.mxu1 %vm559_vm1, %v1349_v54  ;;  %v373_v54 = vld [vmem:[%s3554_s1 + $0x38] sm:$0xf] }
 0xa05   : > { %2921 = vmatprep.subr.msk.bf16.mxu0 %vm670_vm2, %v373_v54 }
 0xa0b   : > { %2806 = vmatpush3.bf16.xpose.msra.mxu1 %v1360_v57 }
 0xa0c   : > { %2922 = vmatprep.subr.msk.bf16.mxu1 %vm311_vm0, %v1572_v12 }
 0xa12   : > { %2808 = vmatmul.mubr.msk.bf16.vlgmr.msra.gmra.mrb[24].mxu1 %vm559_vm1, %v1347_v61 }
 0xa13   : > { %2826 = vmatpush3.bf16.xpose.msra.mxu1 %v1578_v62  ;;  %2827 = vmatprep.mubr.msk.bf16.mxu1 %vm311_vm0, %v3117_v48 }
 0xa14   : > { %2924 = vmatprep.subr.msk.bf16.mxu1 %vm311_vm0, %v1684_v0 }
 0xa1a   : > { %2828 = vmatmul.mubr.msk.bf16.vlgmr.msra.gmra.mrb[28].mxu1 %vm311_vm0, %v3115_v47 }
 0xa1b   : > { %2838 = vmatpush3.bf16.xpose.msra.mxu1 %v1690_v1  ;;  %2839 = vmatprep.mubr.msk.bf16.mxu1 %vm311_vm0, %v3117_v48 }
 0xa22   : > { %2840 = vmatmul.mubr.msk.bf16.vlgmr.msra.gmra.mrb[32].mxu1 %vm311_vm0, %v3115_v47 }
 0xae5   : > { %v2809_v25 = vpop.f32.mrb[24].mxu1 }
 0xae6   : > { %v1396_v2 = vpop.f32.mrb[25].mxu1  ;;  %v1412_v4 = vmul.f32 0.35355338, %v2809_v25 }
 0xae7   : > { %v1410_v58 = vmul.f32 0.35355338, %v1396_v2  ;;  %v2810_v59 = vpop.f32.mrb[26].mxu1 }
 0xae8   : > { %v1399_v60 = vpop.f32.mrb[27].mxu1  ;;  %v1415_v10 = vadd.f32 %v1412_v4, %v3186_v34  ;;  %v1519_v59 = vsel %vm670_vm2, %v373_v54, 0 }
 0xae9   : > { %v1411_v36 = vmul.f32 0.35355338, %v1399_v60  ;;  %v1413_v5 = vadd.f32 %v1410_v58, %v3186_v34  ;;  %v1628_v60 = vld [vmem:[%s3554_s1 + $0x1c] sm:$0xf] }
 0xaea   : > { %v1422_v15 = vsel %vm626_vm4, %v1415_v10, -inf }
 0xaeb   : > { %v1416_v7 = vsel %vm626_vm4, %v1413_v5, -inf  ;;  %v1414_v8 = vadd.f32 %v1411_v36, %v3186_v34 }
 0xaec   : > { %1417 = vmax.xlane.f32.xlu0 %v1416_v7 }
 0xaed   : > { %v2829_v51 = vpop.f32.mrb[28].mxu1  ;;  %v1419_v53 = vsel %vm626_vm4, %v1414_v8, -inf }
 0xaee   : > { %v3366_v11 = vadd.f32 %v2829_v51, %v1576_v6  ;;  %v1614_v13 = vpop.f32.mrb[29].mxu1  ;;  %1420 = vmax.xlane.f32.xlu1 %v1419_v53  ;;  %v1634_v51 = vsel %vm311_vm0, %v1628_v60, 0 }
 0xaef   : > { %v2830_v14 = vpop.f32.mrb[30].mxu1  ;;  %v3369_v55 = vadd.f32 %v1614_v13, %v1576_v6 }
 0xaf0   : > { %1423 = vmax.xlane.f32.xlu0 %v1422_v15  ;;  %v1617_v16 = vpop.f32.mrb[31].mxu1 }
 0xaf1   : > { %v3371_v17 = vadd.f32 %v1617_v16, %v1576_v6 }
 0xaf3   : > { %v1740_v18 = vpack.c.bf16 %v3371_v17, %v3369_v55 }
 0xaf5   : > { %v2841_v20 = vpop.f32.mrb[32].mxu1 }
 0xaf6   : > { %v1726_v21 = vpop.f32.mrb[33].mxu1  ;;  %v1735_v24 = vadd.f32 %v2841_v20, %v1688_v19 }
 0xaf7   : > { %v2842_v22 = vpop.f32.mrb[34].mxu1  ;;  %v1727_v26 = vadd.f32 %v1726_v21, %v1688_v19 }
 0xaf8   : > { %v1729_v23 = vpop.f32.mrb[35].mxu1  ;;  %v1846_v29 = vpack.c.bf16 %v1735_v24, %v1735_v24 }
 0xaf9   : > { %v1730_v27 = vadd.f32 %v1729_v23, %v1688_v19 }
 0xafa   : > { %v1854_v33 = vsel %vm670_vm2, %v1846_v29, 0 }
 0xafb   : > { %v1845_v28 = vpack.c.bf16 %v1730_v27, %v1727_v26 }
 0xafd   : > { %2851 = vmatprep.subr.bf16.mxu1 %v1845_v28 }
 0xafe   : > { %2852 = vmatpush3.bf16.msra.mxu1 %v1845_v28 }
 0xaff   : > { %2927 = vmatprep.subr.msk.bf16.mxu1 %vm670_vm2, %v1846_v29 }
 0xb02   : > { %2854 = vmatpush3.bf16.msra.mxu1 %v1854_v33 }
 0xb79   : > { %v1418_v35 = vpop.xlane.xlu0 %1417 }
 0xb7a   : > { %v1425_v38 = vsub.f32 %v1413_v5, %v1418_v35 }
 0xb7b   : > { %v1421_v39 = vpop.xlane.xlu1 %1420 }
 0xb7c   : > { %v1428_v9 = vmul.f32 1.442695, %v1425_v38  ;;  %v1426_v41 = vsub.f32 %v1414_v8, %v1421_v39 }
 0xb7d   : > { %v1424_v30 = vpop.xlane.xlu0 %1423 }
 0xb7e   : > { %2983 = vpow2.f32 %v1428_v9  ;;  %v1430_v32 = vmul.f32 1.442695, %v1426_v41  ;;  %v1427_v42 = vsub.f32 %v1415_v10, %v1424_v30 }
 0xb80   : > { %2985 = vpow2.f32 %v1430_v32  ;;  %v1432_v43 = vmul.f32 1.442695, %v1427_v42 }
 0xb82   : > { %2987 = vpow2.f32 %v1432_v43 }
 0xb88   : > { %v2984_v50 = vpop.eup %2983 }
 0xb89   : > { %v1434_v44 = vsel %vm626_vm4, %v2984_v50, 0.0 }
 0xb8a   : > { %v2986_v52 = vpop.eup %2985  ;;  %1435 = vadd.xlane.f32.xlu1 %v1434_v44 }
 0xb8b   : > { %v1437_v45 = vsel %vm626_vm4, %v2986_v52, 0.0 }
 0xb8c   : > { %v2988_v46 = vpop.eup %2987  ;;  %1438 = vadd.xlane.f32.xlu0 %v1437_v45 }
 0xb8d   : > { %v1440_v49 = vsel %vm626_vm4, %v2988_v46, 0.0 }
 0xb8e   : > { %1441 = vadd.xlane.f32.xlu1 %v1440_v49 }
 0xc17   : > { %v1436_v56 = vpop.xlane.xlu1 %1435 }
 0xc18   : > { %2989 = vrcp.f32 %v1436_v56 }
 0xc19   : > { %v1439_v12 = vpop.xlane.xlu0 %1438 }
 0xc1a   : > { %2991 = vrcp.f32 %v1439_v12 }
 0xc1b   : > { %v1442_v57 = vpop.xlane.xlu1 %1441 }
 0xc1c   : > { %2993 = vrcp.f32 %v1442_v57 }
 0xc22   : > { %v2990_v61 = vpop.eup %2989 }
 0xc23   : > { %v1446_v0 = vmul.f32 %v2990_v61, %v2984_v50 }
 0xc24   : > { %v2992_v62 = vpop.eup %2991 }
 0xc25   : > { %v1447_v1 = vmul.f32 %v2992_v62, %v2986_v52  ;;  %v374_v62 = vld [vmem:[%s3554_s1 + $0x3c] sm:$0xf] }
 0xc26   : > { %v2994_v25 = vpop.eup %2993  ;;  %2928 = vmatprep.subr.msk.bf16.mxu1 %vm670_vm2, %v374_v62 }
 0xc27   : > { %v1448_v2 = vmul.f32 %v2994_v25, %v2988_v46  ;;  %v1449_v4 = vpack.c.bf16 %v1447_v1, %v1446_v0 }
 0xc29   : > { %2815 = vmatprep.mubr.msk.bf16.mxu0 %vm626_vm4, %v1449_v4  ;;  %v1450_v58 = vpack.c.bf16 %v1448_v2, %v1448_v2 }
 0xc2b   : > { %2816 = vmatmul.mubr.msk.bf16.vlgmr.msra.gmra.mrb[36].mxu0 %vm626_vm4, %v1450_v58 }
 0xc2c   : > { %2820 = vmatpush3.bf16.msra.mxu0 %v1519_v59 }
 0xc2d   : > { %2923 = vmatprep.subr.msk.bf16.mxu0 %vm311_vm0, %v1628_v60 }
 0xcfe   : > { %v2817_v36 = vpop.f32.mrb[36].mxu0 }
 0xcff   : > { %v1496_v5 = vpop.f32.mrb[37].mxu0  ;;  %v1511_v10 = vpack.c.bf16 %v2817_v36, %v2817_v36 }
 0xd00   : > { %v2818_v6 = vpop.f32.mrb[38].mxu0 }
 0xd01   : > { %v1499_v7 = vpop.f32.mrb[39].mxu0 }
 0xd02   : > { %v1510_v8 = vpack.c.bf16 %v1499_v7, %v1496_v5  ;;  %v1913_v7 = vsel %vm670_vm2, %v374_v62, 0  ;;  %v2582_v62 = vld [vmem:[%s3555_s2 + $0x30] ss:$0 sm:$0xff] }
 0xd04   : > { %2821 = vmatprep.mubr.msk.bf16.mxu0 %vm559_vm1, %v1510_v8 }
 0xd05   : > { %2822 = vmatmul.mubr.msk.bf16.vlgmr.msra.gmra.mrb[40].mxu0 %vm559_vm1, %v1511_v10 }
 0xd06   : > { %2832 = vmatpush3.bf16.xpose.msra.mxu0 %v1634_v51  ;;  %2833 = vmatprep.mubr.msk.bf16.mxu0 %vm311_vm0, %v3117_v48 }
 0xd0d   : > { %2834 = vmatmul.mubr.msk.bf16.vlgmr.msra.gmra.mrb[44].mxu0 %vm311_vm0, %v3115_v47  ;;  %v1632_v47 = vrot.slane %v3150_v63, %v3357_v3  ;;  %v1741_v63 = vpack.c.bf16 %v3366_v11, %v3366_v11 }
 0xd0e   : > { %2847 = vmatprep.mubr.msk.bf16.mxu0 %vm559_vm1, %v1740_v18 }
 0xdd8   : > { %v2823_v53 = vpop.f32.mrb[40].mxu0 }
 0xdd9   : > { %v3405_v13 = vadd.f32 %v2823_v53, %v3322_v37  ;;  %v1555_v14 = vpop.f32.mrb[41].mxu0 }
 0xdda   : > { %v3408_v15 = vadd.f32 %v1555_v14, %v3325_v40  ;;  %v2824_v16 = vpop.f32.mrb[42].mxu0 }
 0xddb   : > { %v1558_v19 = vpop.f32.mrb[43].mxu0 }
 0xddc   : > { %v3411_v48 = vadd.f32 %v1558_v19, %v3327_v31 }
 0xde0   : > { %v2835_v20 = vpop.f32.mrb[44].mxu0 }
 0xde1   : > { %v1670_v55 = vpop.f32.mrb[45].mxu0  ;;  %v1679_v21 = vadd.f32 %v2835_v20, %v1632_v47 }
 0xde2   : > { %v2836_v17 = vpop.f32.mrb[46].mxu0  ;;  %v1671_v22 = vadd.f32 %v1670_v55, %v1632_v47 }
 0xde3   : > { %v1673_v18 = vpop.f32.mrb[47].mxu0  ;;  %v1743_v24 = vpack.c.bf16 %v1679_v21, %v1679_v21  ;;  %v3025_v21 = vld [vmem:[%s3089_s26] sm:$0xff] }
 0xde4   : > { %v1674_v37 = vadd.f32 %v1673_v18, %v1632_v47 }
 0xde5   : > { %v1754_v31 = vsel %vm559_vm1, %v1743_v24, 0 }
 0xde6   : > { %v1742_v23 = vpack.c.bf16 %v1674_v37, %v1671_v22 }
 0xde8   : > { %2925 = vmatprep.subr.msk.bf16.mxu0 %vm559_vm1, %v1742_v23  ;;  %v1751_v40 = vsel %vm559_vm1, %v1742_v23, 0  ;;  %v3026_v23 = vld [vmem:[%s3089_s26 + $0x10] sm:$0xff] }
 0xde9   : > { %2844 = vmatpush3.bf16.xpose.msra.mxu0 %v1751_v40  ;;  %v3027_v40 = vld [vmem:[%s3089_s26 + $0x8] sm:$0xff] }
 0xdea   : > { %2926 = vmatprep.subr.msk.bf16.mxu0 %vm559_vm1, %v1743_v24 }
 0xdf1   : > { %2846 = vmatpush3.bf16.xpose.msra.mxu0 %v1754_v31 }
 0xdf8   : > { %2848 = vmatmul.mubr.msk.bf16.vlgmr.msra.gmra.mrb[48].mxu0 %vm559_vm1, %v1741_v63 }
 0xecb   : > { %v2849_v3 = vpop.f32.mrb[48].mxu0 }
 0xecc   : > { %v1790_v26 = vpop.f32.mrb[49].mxu0  ;;  %v1806_v27 = vmul.f32 0.35355338, %v2849_v3 }
 0xecd   : > { %v1804_v28 = vmul.f32 0.35355338, %v1790_v26  ;;  %v2850_v29 = vpop.f32.mrb[50].mxu0 }
 0xece   : > { %v1793_v33 = vpop.f32.mrb[51].mxu0  ;;  %v1809_v41 = vadd.f32 %v1806_v27, %v3186_v34 }
 0xecf   : > { %v1805_v35 = vmul.f32 0.35355338, %v1793_v33  ;;  %v1807_v38 = vadd.f32 %v1804_v28, %v3186_v34 }
 0xed0   : > { %v1816_v30 = vsel %vm626_vm4, %v1809_v41, -inf }
 0xed1   : > { %v1810_v39 = vsel %vm626_vm4, %v1807_v38, -inf  ;;  %v1808_v9 = vadd.f32 %v1805_v35, %v3186_v34 }
 0xed2   : > { %1811 = vmax.xlane.f32.xlu0 %v1810_v39 }
 0xed3   : > { %v1813_v11 = vsel %vm626_vm4, %v1808_v9, -inf }
 0xed4   : > { %1814 = vmax.xlane.f32.xlu1 %v1813_v11 }
 0xed6   : > { %1817 = vmax.xlane.f32.xlu0 %v1816_v30 }
 0xf5f   : > { %v1812_v32 = vpop.xlane.xlu0 %1811 }
 0xf60   : > { %v1819_v42 = vsub.f32 %v1807_v38, %v1812_v32 }
 0xf61   : > { %v1815_v43 = vpop.xlane.xlu1 %1814 }
 0xf62   : > { %v1822_v50 = vmul.f32 1.442695, %v1819_v42  ;;  %v1820_v44 = vsub.f32 %v1808_v9, %v1815_v43  ;;  %v2941_v42 = vld [vmem:[%s3554_s1 + $0x40] sm:$0xff]   ;;  %v2942_v43 = vld [vmem:[%s3554_s1 + $0x48] sm:$0xff]  }
 0xf63   : > { %v1818_v52 = vpop.xlane.xlu0 %1817  ;;  %2865 = vmatprep.subr.bf16.mxu0 %v2941_v42 }
 0xf64   : > { %2995 = vpow2.f32 %v1822_v50  ;;  %v1824_v45 = vmul.f32 1.442695, %v1820_v44  ;;  %v1821_v46 = vsub.f32 %v1809_v41, %v1818_v52  ;;  %2866 = vmatpush3.bf16.msra.mxu0 %v2941_v42  ;;  %v2943_v50 = vld [vmem:[%s3554_s1 + $0x50] sm:$0xff]   ;;  %v2944_v44 = vld [vmem:[%s3554_s1 + $0x58] sm:$0xff]  }
 0xf65   : > { %2867 = vmatprep.subr.bf16.mxu0 %v2942_v43 }
 0xf66   : > { %2997 = vpow2.f32 %v1824_v45  ;;  %v1826_v49 = vmul.f32 1.442695, %v1821_v46 }
 0xf68   : > { %2999 = vpow2.f32 %v1826_v49  ;;  %2868 = vmatpush3.bf16.msra.mxu0 %v2942_v43  ;;  %v2597_v43 = vld [vmem:[%s3555_s2 + $0x48] ss:$0 sm:$0xff] }
 0xf6e   : > { %v2996_v34 = vpop.eup %2995 }
 0xf6f   : > { %v1828_v54 = vsel %vm626_vm4, %v2996_v34, 0.0 }
 0xf70   : > { %v2998_v56 = vpop.eup %2997  ;;  %1829 = vadd.xlane.f32.xlu1 %v1828_v54 }
 0xf71   : > { %v1831_v12 = vsel %vm626_vm4, %v2998_v56, 0.0 }
 0xf72   : > { %v3000_v57 = vpop.eup %2999  ;;  %1832 = vadd.xlane.f32.xlu0 %v1831_v12 }
 0xf73   : > { %v1834_v61 = vsel %vm626_vm4, %v3000_v57, 0.0 }
 0xf74   : > { %1835 = vadd.xlane.f32.xlu1 %v1834_v61 }
 0xffd   : > { %v1830_v0 = vpop.xlane.xlu1 %1829 }
 0xffe   : > { %3001 = vrcp.f32 %v1830_v0 }
 0xfff   : > { %v1833_v1 = vpop.xlane.xlu0 %1832 }
0x1000   : > { %3003 = vrcp.f32 %v1833_v1 }
0x1001   : > { %v1836_v25 = vpop.xlane.xlu1 %1835 }
0x1002   : > { %3005 = vrcp.f32 %v1836_v25 }
0x1008   : > { %v3002_v2 = vpop.eup %3001 }
0x1009   : > { %v1840_v58 = vmul.f32 %v3002_v2, %v2996_v34 }
0x100a   : > { %v3004_v4 = vpop.eup %3003 }
0x100b   : > { %v1841_v59 = vmul.f32 %v3004_v4, %v2998_v56 }
0x100c   : > { %v3006_v60 = vpop.eup %3005 }
0x100d   : > { %v1842_v36 = vmul.f32 %v3006_v60, %v3000_v57  ;;  %v1843_v5 = vpack.c.bf16 %v1841_v59, %v1840_v58  ;;  %v2583_v58 = vld [vmem:[%s3555_s2 + $0x38] ss:$0 sm:$0xff] }
0x100f   : > { %2855 = vmatprep.mubr.msk.bf16.mxu1 %vm626_vm4, %v1843_v5  ;;  %v1844_v6 = vpack.c.bf16 %v1842_v36, %v1842_v36 }
0x1011   : > { %2856 = vmatmul.mubr.msk.bf16.vlgmr.msra.gmra.mrb[36].mxu1 %vm626_vm4, %v1844_v6 }
0x1012   : > { %2860 = vmatpush3.bf16.msra.mxu1 %v1913_v7 }
0x1013   : > { %2873 = vmatprep.subr.bf16.mxu1 %v2943_v50 }
0x10e4   : > { %v2857_v8 = vpop.f32.mrb[36].mxu1 }
0x10e5   : > { %v1890_v10 = vpop.f32.mrb[37].mxu1  ;;  %v1905_v16 = vpack.c.bf16 %v2857_v8, %v2857_v8 }
0x10e6   : > { %v2858_v51 = vpop.f32.mrb[38].mxu1 }
0x10e7   : > { %v1893_v53 = vpop.f32.mrb[39].mxu1  ;;  %v2945_v51 = vld [vmem:[%s3554_s1 + $0x60] sm:$0xff]  }
0x10e8   : > { %v1904_v14 = vpack.c.bf16 %v1893_v53, %v1890_v10  ;;  %v2946_v53 = vld [vmem:[%s3554_s1 + $0x68] sm:$0xff]  }
0x10ea   : > { %2861 = vmatprep.mubr.msk.bf16.mxu1 %vm559_vm1, %v1904_v14  ;;  %v2947_v14 = vld [vmem:[%s3554_s1 + $0x70] sm:$0xff]  }
0x10eb   : > { %2862 = vmatmul.mubr.msk.bf16.vlgmr.msra.gmra.mrb[40].mxu1 %vm559_vm1, %v1905_v16  ;;  %v2948_v16 = vld [vmem:[%s3554_s1 + $0x78] sm:$0xff]  }
0x10ec   : > { %2874 = vmatpush3.bf16.msra.mxu1 %v2943_v50 }
0x10ed   : > { %2875 = vmatprep.subr.bf16.mxu1 %v2944_v44 }
0x10f0   : > { %2876 = vmatpush3.bf16.msra.mxu1 %v2944_v44 }
0x10f1   : > { %2877 = vmatprep.subr.bf16.mxu1 %v2945_v51 }
0x10f4   : > { %2878 = vmatpush3.bf16.msra.mxu1 %v2945_v51 }
0x10f5   : > { %2879 = vmatprep.subr.bf16.mxu1 %v2946_v53 }
0x10f8   : > { %2880 = vmatpush3.bf16.msra.mxu1 %v2946_v53 }
0x10f9   : > { %2881 = vmatprep.subr.bf16.mxu1 %v2947_v14 }
0x10fc   : > { %2882 = vmatpush3.bf16.msra.mxu1 %v2947_v14 }
0x10fd   : > { %2883 = vmatprep.subr.bf16.mxu1 %v2948_v16 }
0x1100   : > { %2884 = vmatpush3.bf16.msra.mxu1 %v2948_v16 }
0x11be   : > { %v2863_v19 = vpop.f32.mrb[40].mxu1 }
0x11bf   : > { %v1965_v47 = vadd.f32 %v2863_v19, %v3405_v13  ;;  %v1949_v20 = vpop.f32.mrb[41].mxu1  ;;  %v2949_v19 = vld [vmem:[%s3554_s1 + $0x80] sm:$0xff]  }
0x11c0   : > { %v1963_v55 = vadd.f32 %v1949_v20, %v3408_v15  ;;  %v2864_v17 = vpop.f32.mrb[42].mxu1  ;;  %2885 = vmatprep.subr.bf16.mxu1 %v2949_v19  ;;  %v2584_v20 = vld [vmem:[%s3555_s2 + $0x40] ss:$0 sm:$0xff] }
0x11c1   : > { %v1952_v18 = vpop.f32.mrb[43].mxu1  ;;  %v3447_v24 = vadd.f32 %v3026_v23, %v1965_v47  ;;  %2886 = vmatpush3.bf16.msra.mxu1 %v2949_v19  ;;  %v2950_v47 = vld [vmem:[%s3554_s1 + $0x88] sm:$0xff]  }
0x11c2   : > { %v3443_v22 = vadd.f32 %v3025_v21, %v1963_v55  ;;  %v1964_v37 = vadd.f32 %v1952_v18, %v3411_v48  ;;  %2887 = vmatprep.subr.bf16.mxu1 %v2950_v47 }
0x11c3   : > { %v1977_v15 = vsel %vm311_vm0, %v3447_v24, 0.0 }
0x11c4   : > { %v3450_v31 = vadd.f32 %v3027_v40, %v1964_v37  ;;  %v1971_v63 = vsel %vm311_vm0, %v3443_v22, 0.0 }
0x11c5   : > { %1972 = vadd.xlane.f32.xlu0 %v1971_v63  ;;  %2888 = vmatpush3.bf16.msra.mxu1 %v2950_v47 }
0x11c6   : > { %v1974_v13 = vsel %vm311_vm0, %v3450_v31, 0.0 }
0x11c7   : > { %1975 = vadd.xlane.f32.xlu1 %v1974_v13 }
0x11c9   : > { %1978 = vadd.xlane.f32.xlu0 %v1977_v15 }
0x1252   : > { %v1973_v3 = vpop.xlane.xlu0 %1972 }
0x1253   : > { %v1980_v48 = vmul.f32 0.03125, %v1973_v3 }
0x1254   : > { %v1976_v26 = vpop.xlane.xlu1 %1975 }
0x1255   : > { %v1983_v27 = vsub.f32 %v3443_v22, %v1980_v48  ;;  %v1981_v28 = vmul.f32 0.03125, %v1976_v26 }
0x1256   : > { %v1979_v29 = vpop.xlane.xlu0 %1978 }
0x1257   : > { %v1984_v33 = vsub.f32 %v3450_v31, %v1981_v28  ;;  %v1982_v35 = vmul.f32 0.03125, %v1979_v29  ;;  %v1986_v38 = vmul.f32 %v1983_v27, %v1983_v27 }
0x1259   : > { %v1985_v39 = vsub.f32 %v3447_v24, %v1982_v35  ;;  %v1989_v9 = vsel %vm311_vm0, %v1986_v38, 0.0  ;;  %v1987_v41 = vmul.f32 %v1984_v33, %v1984_v33 }
0x125a   : > { %1990 = vadd.xlane.f32.xlu1 %v1989_v9 }
0x125b   : > { %v1992_v11 = vsel %vm311_vm0, %v1987_v41, 0.0  ;;  %v1988_v30 = vmul.f32 %v1985_v39, %v1985_v39 }
0x125c   : > { %1993 = vadd.xlane.f32.xlu0 %v1992_v11 }
0x125d   : > { %v1995_v32 = vsel %vm311_vm0, %v1988_v30, 0.0 }
0x125e   : > { %1996 = vadd.xlane.f32.xlu1 %v1995_v32 }
0x12e7   : > { %v1991_v52 = vpop.xlane.xlu1 %1990 }
0x12e8   : > { %v1998_v45 = vmul.f32 0.03125, %v1991_v52 }
0x12e9   : > { %v1994_v46 = vpop.xlane.xlu0 %1993 }
0x12ea   : > { %v2001_v49 = vadd.f32 1e-06, %v1998_v45  ;;  %v1999_v34 = vmul.f32 0.03125, %v1994_v46 }
0x12eb   : > { %v1997_v54 = vpop.xlane.xlu1 %1996 }
0x12ec   : > { %3007 = vrsqrt.f32 %v2001_v49  ;;  %v2002_v56 = vadd.f32 1e-06, %v1999_v34  ;;  %v2000_v12 = vmul.f32 0.03125, %v1997_v54 }
0x12ee   : > { %3009 = vrsqrt.f32 %v2002_v56  ;;  %v2003_v57 = vadd.f32 1e-06, %v2000_v12 }
0x12f0   : > { %3011 = vrsqrt.f32 %v2003_v57 }
0x12f6   : > { %v3008_v61 = vpop.eup %3007 }
0x12f7   : > { %v2007_v0 = vmul.f32 %v3008_v61, %v1983_v27 }
0x12f8   : > { %v3010_v1 = vpop.eup %3009 }
0x12f9   : > { %v2008_v25 = vmul.f32 %v3010_v1, %v1984_v33  ;;  %v2014_v2 = vmul.f32 %v2582_v62, %v2007_v0 }
0x12fa   : > { %v3012_v4 = vpop.eup %3011 }
0x12fb   : > { %v2009_v59 = vmul.f32 %v3012_v4, %v1985_v39  ;;  %v2015_v60 = vmul.f32 %v2582_v62, %v2008_v25  ;;  %v2021_v36 = vadd.f32 %v2583_v58, %v2014_v2 }
0x12fd   : > { %v2022_v5 = vadd.f32 %v2583_v58, %v2015_v60  ;;  %v2016_v6 = vmul.f32 %v2582_v62, %v2009_v59 }
0x12ff   : > { %v2024_v7 = vpack.c.bf16 %v2022_v5, %v2021_v36  ;;  %v2023_v8 = vadd.f32 %v2583_v58, %v2016_v6  ;;  %v2951_v6 = vld [vmem:[%s3554_s1 + $0x90] sm:$0xff]  }
0x1300   : > { %2893 = vmatprep.subr.bf16.mxu0 %v2951_v6 }
0x1301   : > { %2869 = vmatprep.mubr.msk.bf16.mxu0 %vm311_vm0, %v2024_v7  ;;  %v2025_v10 = vpack.c.bf16 %v2023_v8, %v2023_v8  ;;  %v2952_v7 = vld [vmem:[%s3554_s1 + $0x98] sm:$0xff]  }
0x1303   : > { %2870 = vmatmul.mubr.msk.bf16.vlgmr.msra.gmra.mrb[52].mxu0 %vm311_vm0, %v2025_v10 }
0x1304   : > { %2894 = vmatpush3.bf16.msra.mxu0 %v2951_v6 }
0x1305   : > { %2895 = vmatprep.subr.bf16.mxu0 %v2952_v7 }
0x1308   : > { %2896 = vmatpush3.bf16.msra.mxu0 %v2952_v7 }
0x13d6   : > { %v2871_v55 = vpop.f32.mrb[52].mxu0 }
0x13d7   : > { %v2096_v17 = vadd.f32 %v2871_v55, %v2584_v20  ;;  %v2087_v18 = vpop.f32.mrb[53].mxu0 }
0x13d8   : > { %v2088_v21 = vadd.f32 %v2584_v20, %v2087_v18  ;;  %v2872_v37 = vpop.f32.mrb[54].mxu0 }
0x13d9   : > { %v2106_v23 = vmul.f32 0.70710677, %v2096_v17  ;;  %v2090_v40 = vpop.f32.mrb[55].mxu0  ;;  %v2103_v29 = vmul.f32 0.5, %v2096_v17  ;;  %v2598_v17 = vld [vmem:[%s3555_s2 + $0x50] ss:$0 sm:$0xff] }
0x13da   : > { %v2104_v63 = vmul.f32 0.70710677, %v2088_v21  ;;  %v2091_v13 = vadd.f32 %v2584_v20, %v2090_v40  ;;  %v2101_v33 = vmul.f32 0.5, %v2088_v21 }
0x13db   : > { %3013 = verf.f32 %v2106_v23 }
0x13dc   : > { %3015 = verf.f32 %v2104_v63  ;;  %v2105_v15 = vmul.f32 0.70710677, %v2091_v13  ;;  %v2102_v35 = vmul.f32 0.5, %v2091_v13  ;;  %v2599_v63 = vld [vmem:[%s3555_s2 + $0x58] ss:$0 sm:$0xff] }
0x13de   : > { %3017 = verf.f32 %v2105_v15 }
0x13e5   : > { %v3014_v3 = vpop.eup %3013 }
0x13e6   : > { %v3016_v48 = vpop.eup %3015  ;;  %v2112_v26 = vadd.f32 1.0, %v3014_v3 }
0x13e7   : > { %v2110_v27 = vadd.f32 1.0, %v3016_v48 }
0x13e8   : > { %v3018_v28 = vpop.eup %3017  ;;  %v2115_v39 = vmul.f32 %v2112_v26, %v2103_v29 }
0x13e9   : > { %v2111_v38 = vadd.f32 1.0, %v3018_v28  ;;  %v2113_v9 = vmul.f32 %v2110_v27, %v2101_v33  ;;  %v2600_v33 = vld [vmem:[%s3555_s2 + $0x60] ss:$0 sm:$0xff] }
0x13ea   : > { %v2133_v30 = vpack.c.bf16 %v2115_v39, %v2115_v39 }
0x13eb   : > { %v2114_v41 = vmul.f32 %v2111_v38, %v2102_v35 }
0x13ed   : > { %v2132_v11 = vpack.c.bf16 %v2114_v41, %v2113_v9  ;;  %v2376_v9 = vld [vmem:[%s287_s29] sm:$0xff] }
0x13ef   : > { %2889 = vmatprep.mubr.bf16.mxu1 %v2132_v11 }
0x13f0   : > { %2890 = vmatmul.mubr.bf16.vlgmr.msra.gmra.mrb[44].mxu1 %v2133_v30 }
0x14c3   : > { %v2891_v32 = vpop.f32.mrb[44].mxu1 }
0x14c4   : > { %v2216_v42 = vpop.f32.mrb[45].mxu1  ;;  %v2232_v50 = vadd.f32 %v2891_v32, %v3447_v24  ;;  %v2377_v32 = vld [vmem:[%s287_s29 + $0x8] sm:$0xff] }
0x14c5   : > { %v2230_v44 = vadd.f32 %v2216_v42, %v3443_v22  ;;  %v2892_v52 = vpop.f32.mrb[46].mxu1  ;;  %v2378_v42 = vld [vmem:[%s287_s29 + $0x10] sm:$0xff] }
0x14c6   : > { %v2219_v45 = vpop.f32.mrb[47].mxu1  ;;  %v2240_v56 = vadd.f32 %v2597_v43, %v2232_v50 }
0x14c7   : > { %v2231_v46 = vadd.f32 %v2219_v45, %v3450_v31  ;;  %v2238_v49 = vadd.f32 %v2597_v43, %v2230_v44 }
0x14c8   : > { %v2249_v57 = vsel %vm311_vm0, %v2240_v56, 0.0 }
0x14c9   : > { %v2243_v34 = vsel %vm311_vm0, %v2238_v49, 0.0  ;;  %v2239_v54 = vadd.f32 %v2597_v43, %v2231_v46 }
0x14ca   : > { %2244 = vadd.xlane.f32.xlu0 %v2243_v34  ;;  %v2394_v34 = vld [vmem:[%s292_s10] sm:$0xff] }
0x14cb   : > { %v2246_v12 = vsel %vm311_vm0, %v2239_v54, 0.0 }
0x14cc   : > { %2247 = vadd.xlane.f32.xlu1 %v2246_v12  ;;  %v2395_v12 = vld [vmem:[%s292_s10 + $0x8] sm:$0xff] }
0x14ce   : > { %2250 = vadd.xlane.f32.xlu0 %v2249_v57 }
0x1557   : > { %v2245_v61 = vpop.xlane.xlu0 %2244 }
0x1558   : > { %v2252_v24 = vmul.f32 0.03125, %v2245_v61 }
0x1559   : > { %v2248_v62 = vpop.xlane.xlu1 %2247 }
0x155a   : > { %v2255_v22 = vsub.f32 %v2238_v49, %v2252_v24  ;;  %v2253_v0 = vmul.f32 0.03125, %v2248_v62  ;;  %v2396_v62 = vld [vmem:[%s292_s10 + $0x10] sm:$0xff] }
0x155b   : > { %v2251_v1 = vpop.xlane.xlu0 %2250 }
0x155c   : > { %v2256_v25 = vsub.f32 %v2239_v54, %v2253_v0  ;;  %v2254_v31 = vmul.f32 0.03125, %v2251_v1  ;;  %v2258_v2 = vmul.f32 %v2255_v22, %v2255_v22 }
0x155e   : > { %v2257_v4 = vsub.f32 %v2240_v56, %v2254_v31  ;;  %v2261_v58 = vsel %vm311_vm0, %v2258_v2, 0.0  ;;  %v2259_v59 = vmul.f32 %v2256_v25, %v2256_v25 }
0x155f   : > { %2262 = vadd.xlane.f32.xlu1 %v2261_v58 }
0x1560   : > { %v2264_v60 = vsel %vm311_vm0, %v2259_v59, 0.0  ;;  %v2260_v36 = vmul.f32 %v2257_v4, %v2257_v4 }
0x1561   : > { %2265 = vadd.xlane.f32.xlu0 %v2264_v60 }
0x1562   : > { %v2267_v5 = vsel %vm311_vm0, %v2260_v36, 0.0 }
0x1563   : > { %2268 = vadd.xlane.f32.xlu1 %v2267_v5 }
0x15ec   : > { %v2263_v8 = vpop.xlane.xlu1 %2262 }
0x15ed   : > { %v2270_v10 = vmul.f32 0.03125, %v2263_v8 }
0x15ee   : > { %v2266_v51 = vpop.xlane.xlu0 %2265 }
0x15ef   : > { %v2273_v53 = vadd.f32 1e-06, %v2270_v10  ;;  %v2271_v14 = vmul.f32 0.03125, %v2266_v51 }
0x15f0   : > { %v2269_v16 = vpop.xlane.xlu1 %2268 }
0x15f1   : > { %3019 = vrsqrt.f32 %v2273_v53  ;;  %v2274_v19 = vadd.f32 1e-06, %v2271_v14  ;;  %v2272_v47 = vmul.f32 0.03125, %v2269_v16 }
0x15f3   : > { %3021 = vrsqrt.f32 %v2274_v19  ;;  %v2275_v20 = vadd.f32 1e-06, %v2272_v47 }
0x15f5   : > { %3023 = vrsqrt.f32 %v2275_v20 }
0x15fb   : > { %v3020_v55 = vpop.eup %3019 }
0x15fc   : > { %v2279_v18 = vmul.f32 %v3020_v55, %v2255_v22 }
0x15fd   : > { %v3022_v21 = vpop.eup %3021 }
0x15fe   : > { %v2280_v37 = vmul.f32 %v3022_v21, %v2256_v25  ;;  %v2286_v23 = vmul.f32 %v2598_v17, %v2279_v18 }
0x15ff   : > { %v3024_v40 = vpop.eup %3023 }
0x1600   : > { %v2281_v13 = vmul.f32 %v3024_v40, %v2257_v4  ;;  %v2287_v15 = vmul.f32 %v2598_v17, %v2280_v37  ;;  %v2293_v3 = vadd.f32 %v2599_v63, %v2286_v23 }
0x1602   : > { %v2294_v48 = vadd.f32 %v2599_v63, %v2287_v15  ;;  %v2288_v26 = vmul.f32 %v2598_v17, %v2281_v13 }
0x1604   : > { %v2300_v27 = vpack.c.bf16 %v2294_v48, %v2293_v3  ;;  %v2295_v28 = vadd.f32 %v2599_v63, %v2288_v26 }
0x1606   : > { %2897 = vmatprep.mubr.msk.bf16.mxu0 %vm311_vm0, %v2300_v27  ;;  %v2301_v29 = vpack.c.bf16 %v2295_v28, %v2295_v28 }
0x1608   : > { %2898 = vmatmul.mubr.msk.bf16.vlgmr.msra.gmra.mrb[56].mxu0 %vm311_vm0, %v2301_v29 }
0x16db   : > { %v2899_v35 = vpop.f32.mrb[56].mxu0 }
0x16dc   : > { %v2368_v38 = vadd.f32 %v2899_v35, %v2600_v33  ;;  %v2359_v39 = vpop.f32.mrb[57].mxu0 }
0x16dd   : > { %v2360_v41 = vadd.f32 %v2600_v33, %v2359_v39  ;;  %v2900_v11 = vpop.f32.mrb[58].mxu0 }
0x16de   : > { %2375 = vst [vmem:[%s297_s7 + $0x10] sm:$0xff] %v2368_v38  ;;  %v2362_v30 = vpop.f32.mrb[59].mxu0  ;;  %v2381_v45 = vsub.f32 %v2368_v38, %v2378_v42 }
0x16df   : > { %2373 = vst [vmem:[%s297_s7] sm:$0xff] %v2360_v41  ;;  %v2363_v43 = vadd.f32 %v2600_v33, %v2362_v30  ;;  %v2379_v50 = vsub.f32 %v2360_v41, %v2376_v9 }
0x16e0   : > { %v2384_v49 = vmul.f32 %v2381_v45, %v2381_v45 }
0x16e1   : > { %2374 = vst [vmem:[%s297_s7 + $0x8] sm:$0xff] %v2363_v43  ;;  %v2382_v44 = vmul.f32 %v2379_v50, %v2379_v50  ;;  %v2380_v52 = vsub.f32 %v2363_v43, %v2377_v32 }
0x16e3   : > { %2385 = vadd.xlane.f32.xlu0 %v2382_v44  ;;  %v2383_v46 = vmul.f32 %v2380_v52, %v2380_v52 }
0x16e5   : > { %2387 = vadd.xlane.f32.xlu1 %v2383_v46 }
0x16e7   : > { %2389 = vadd.xlane.f32.xlu0 %v2384_v49 }
0x1770   : > { %v2386_v54 = vpop.xlane.xlu0 %2385 }
0x1771   : > { %v2391_v56 = vmul.f32 0.020833334, %v2386_v54 }
0x1772   : > { %v2388_v57 = vpop.xlane.xlu1 %2387 }
0x1773   : > { %v2397_v61 = vmul.f32 %v2394_v34, %v2391_v56  ;;  %v2392_v24 = vmul.f32 0.020833334, %v2388_v57 }
0x1774   : > { %v2390_v22 = vpop.xlane.xlu0 %2389 }
0x1775   : > { %v2398_v0 = vmul.f32 %v2395_v12, %v2392_v24  ;;  %v2393_v1 = vmul.f32 0.020833334, %v2390_v22  ;;  %v2401_v31 = vsel %vm2400_vm5, %v2397_v61, 0.0 }
0x1777   : > { %v2399_v25 = vmul.f32 %v2396_v62, %v2393_v1  ;;  %v2402_v2 = vsel %vm2400_vm5, %v2398_v0, 0.0 }
0x1778   : > { %v2403_v4 = vadd.f32 %v2402_v2, %v2401_v31 }
0x1779   : > { %v2404_v58 = vsel %vm2400_vm5, %v2399_v25, 0.0 }
0x177a   : > { %v2405_v59 = vadd.f32 %v2404_v58, %v2403_v4 }
0x177c   : > { %2406 = vadd.xlane.f32.xlu1 %v2405_v59 }
0x1809   : > { %v2407_v60 = vpop.xlane.xlu1 %2406 }
0x180a   : > { %v2408_v36 = vrot.slane %v2407_v60, 4 }
0x180c   : > { %v2409_v5 = vadd.f32 %v2408_v36, %v2407_v60 }
0x180e   : > { %v2410_v6 = vrot.slane %v2409_v5, 2 }
0x1810   : > { %v2411_v7 = vadd.f32 %v2410_v6, %v2409_v5 }
0x1812   : > { %v2412_v8 = vrot.slane %v2411_v7, 1 }
0x1814   : > { %v2413_v10 = vadd.f32 %v2412_v8, %v2411_v7 }
0x1816   : > { %2930 = vpush %v2413_v10 }
0x1847   : > { %s2931_s13 = spop %2930 }
0x1848   : > { %v2415_v51 = vstv %s2931_s13 }
0x1849   : > { %2417 = vst [vmem:[%s300_s12] sm:$0x1] %v2415_v51 }
0x184a PF: > { %s17_s21 = sadd.s32 1, %s3034_s21  }
0x184b   : > { %p14_p4 = scmp.ge.s32.totalorder %s17_s21, 4  }
0x184d   :  { %16 = sbr.rel (!%p14_p4) target bundleno = 1 (0x1), region = 88 }

</bundles_post_ra>
